<compile_context>
chip_gen: v7x
topology: tpu7x:2x2x1
jax: 0.10.0
libtpu: 0.0.40
codegen_flags: <defaults>
</compile_context>

<pallas_src>
import math
import jax
import jax.numpy as jnp
from jax.experimental import pallas as pl
from jax.experimental.pallas import tpu as pltpu

# ----------------------------- model hyper-params ---------------------------
CNN_LSTM_lstm_hidden_size = 65
CNN_LSTM_lstm_input_size = 65
CNN_LSTM_num_lstm_layers = 2          # implemented explicitly as 2 stacked cells
ANCHORS = 8
OUT_DIM = ANCHORS * 2 + 1             # 17

C_IN = 3                              # input image channels
IMG_H = IMG_W = 16                    # input spatial size
REDUCTION = 8                         # synthetic backbone reduction_factor
C_BB = 8                              # backbone out_channels[-1]
POOL_CHANNELS = 4
H_SUB = math.ceil(IMG_H / REDUCTION)  # 2
W_SUB = math.ceil(IMG_W / REDUCTION)  # 2
S_SPATIAL = H_SUB * W_SUB             # 4 spatial positions after the backbone
NUM_CHANNELS = POOL_CHANNELS * H_SUB * W_SUB       # 16
FC_HIDDEN = NUM_CHANNELS // 2                      # 8  (int(num_channels/2))

HIDDEN = CNN_LSTM_lstm_hidden_size    # 65
LSTM_IN = CNN_LSTM_lstm_input_size    # 65
HP = 128                              # LSTM width padded to a full lane tile
OP = 128                              # fc_out hidden width padded to a lane tile
NG = 4 * HP                           # 512 = fused-gate output width (i|f|g|o)
KREC = 2 * HP                         # 256 = K of the fused recurrent matmul
POOL_BLK = 128                        # lane-aligned per-spatial block width


# ------------------------------ fused kernel --------------------------------
def fused_forward_kernel(
        x_ref,                                    # (B*T, C*H*W), frame rows batch-major
        wbig1_ref, bbig1_ref,                     # subsample + backbone 1x1 conv (folded)
        wbig2_ref, bbig2_ref,                     # pool conv, block-diag per spatial pos
        wfc1_ref, bfc1_ref, wfc2_ref, bfc2_ref,   # fc MLP (2 layers)
        wih0_ref, b0_ref,                         # LSTM layer-0 input projection (bf16)
        wrec_ref, b1_ref,                         # fused recurrent weights (bf16)
        scale_ref, offset_ref,                    # lstm_out * scale + offset
        wo1_ref, bo1_ref, wo2_ref, bo2_ref,       # fc_out (2 layers)
        o_ref):                                   # (B, OUT_DIM)
    N = x_ref.shape[0]                            # number of frames = B*T
    B = o_ref.shape[0]
    T = N // B
    HPk = wih0_ref.shape[0]                       # padded hidden width (128)
    NGk = wih0_ref.shape[1]                       # fused gate width (512)

    # ---- CNN head: strided subsample + backbone 1x1 conv are ONE matmul ------
    # (the subsample / channels-last layout lives in wbig1's zero pattern)
    x = x_ref[...]                                                     # (N, C*H*W)
    h_all = jnp.maximum(
        jnp.dot(x, wbig1_ref[...], preferred_element_type=jnp.float32)
        + bbig1_ref[...], 0.0)                                         # (N, S*C_BB)
    y_all = (jnp.dot(h_all, wbig2_ref[...], preferred_element_type=jnp.float32)
             + bbig2_ref[...])                                         # (N, S*128)

    # ---- AdaptiveMaxPool2d((1,1)): max over 128-lane-aligned spatial blocks --
    pooled = y_all[:, 0:POOL_BLK]
    for s in range(1, S_SPATIAL):
        pooled = jnp.maximum(pooled, y_all[:, s * POOL_BLK:(s + 1) * POOL_BLK])

    # ---- fc: Linear -> ReLU -> Linear -> ReLU (output zero-padded to HP) -----
    f1 = jnp.maximum(
        jnp.dot(pooled, wfc1_ref[...], preferred_element_type=jnp.float32)
        + bfc1_ref[...], 0.0)                                          # (N, FC_HIDDEN)
    fea = jnp.maximum(
        jnp.dot(f1, wfc2_ref[...], preferred_element_type=jnp.float32)
        + bfc2_ref[...], 0.0)                                          # (N, HP)

    # ---- reorder fea rows once: batch-major (b*T+t) -> time-major (t*B+b) ----
    fea_tm = jnp.concatenate(
        [fea[b * T + t: b * T + t + 1] for t in range(T) for b in range(B)],
        axis=0)                                                        # (N, HP)

    # ---- hoisted layer-0 input projection for ALL timesteps ------------------
    xz0 = (jnp.dot(fea_tm.astype(jnp.bfloat16), wih0_ref[...],
                   preferred_element_type=jnp.float32) + b0_ref[...])  # (N, 4*HP)

    wrec = wrec_ref[...]                           # (2*HP, 2*NG) bf16
    b1 = b1_ref[...]                               # (1, NG)

    def gates(z, c_prev):                          # PyTorch gate order (i, f, g, o)
        i = jax.nn.sigmoid(z[:, 0 * HPk:1 * HPk])
        f = jax.nn.sigmoid(z[:, 1 * HPk:2 * HPk])
        g = jnp.tanh(z[:, 2 * HPk:3 * HPk])
        o = jax.nn.sigmoid(z[:, 3 * HPk:4 * HPk])
        c_new = f * c_prev + i * g
        return o * jnp.tanh(c_new), c_new          # padded lanes stay exactly 0

    zeros = jnp.zeros((B, HPk), jnp.float32)
    # wavefront step 0: layer-0 cell @ t=0 (h1_prev == 0 -> no recurrent matmul)
    h1, c1 = gates(xz0[0:B], zeros)
    h2, c2 = zeros, zeros
    # wavefront steps 1..T-1: layer0 @ t=k and layer1 @ t=k-1 from ONE matmul
    for k in range(1, T):                          # T static & small -> unrolled
        lhs = jnp.concatenate([h1, h2], axis=1).astype(jnp.bfloat16)   # (B, 2*HP)
        zz = jnp.dot(lhs, wrec, preferred_element_type=jnp.float32)    # (B, 2*NG)
        z0 = xz0[k * B:(k + 1) * B] + zz[:, :NGk]  # layer-0 pre-activation @ t=k
        z1 = zz[:, NGk:] + b1                      # layer-1 pre-activation @ t=k-1
        h1n, c1n = gates(z0, c1)
        h2, c2 = gates(z1, c2)
        h1, c1 = h1n, c1n
    # final wavefront step: layer-1 cell @ t=T-1 (layer-1 columns of wrec only)
    lhs = jnp.concatenate([h1, h2], axis=1).astype(jnp.bfloat16)
    z1 = jnp.dot(lhs, wrec[:, NGk:], preferred_element_type=jnp.float32) + b1
    h2, c2 = gates(z1, c2)

    # ---- lstm_out * scale + offset; only the last timestep reaches the head --
    lstm_last = h2 * scale_ref[...] + offset_ref[...]                  # (B, HP)

    # ---- fc_out: ReLU -> Linear -> ReLU -> Linear ----------------------------
    t1 = jnp.maximum(
        jnp.dot(jnp.maximum(lstm_last, 0.0), wo1_ref[...],
                preferred_element_type=jnp.float32) + bo1_ref[...], 0.0)  # (B, OP)
    o_ref[...] = (jnp.dot(t1, wo2_ref[...], preferred_element_type=jnp.float32)
                  + bo2_ref[...])                                      # (B, OUT_DIM)


# ------------------------------ pallas wrapper -------------------------------
def _full_spec(shape):
    """BlockSpec covering the whole array (grid=(1,))."""
    nd = len(shape)
    return pl.BlockSpec(shape, lambda i, _nd=nd: (0,) * _nd)


_KERNEL_PARAM_ORDER = (
    "wbig1", "bbig1", "wbig2", "bbig2",
    "w_fc1", "b_fc1", "w_fc2", "b_fc2",
    "wih0", "b0", "wrec", "b1",
    "scale", "offset",
    "w_out1", "b_out1", "w_out2", "b_out2",
)


def _fused_pallas_call(x2, kp, batch):
    args = (x2,) + tuple(kp[k] for k in _KERNEL_PARAM_ORDER)
    n_frames = x2.shape[0]
    seq_len = n_frames // batch
    cnn_flops = 2 * n_frames * (C_IN * IMG_H * IMG_W * S_SPATIAL * C_BB
                                + S_SPATIAL * C_BB * S_SPATIAL * POOL_BLK
                                + POOL_BLK * FC_HIDDEN + FC_HIDDEN * HP)
    lstm_flops = (2 * n_frames * HP * NG                     # hoisted input projection
                  + (seq_len - 1) * 2 * batch * KREC * 2 * NG  # fused wavefront steps
                  + 2 * batch * KREC * NG)                   # final layer-1 step
    head_flops = 2 * batch * (HP * OP + OP * OUT_DIM)
    bytes_accessed = (sum(int(a.size) * a.dtype.itemsize for a in args)
                      + batch * OUT_DIM * 4)
    return pl.pallas_call(
        fused_forward_kernel,
        out_shape=jax.ShapeDtypeStruct((batch, OUT_DIM), jnp.float32),
        grid=(1,),
        in_specs=[_full_spec(a.shape) for a in args],
        out_specs=_full_spec((batch, OUT_DIM)),
        compiler_params=pltpu.CompilerParams(dimension_semantics=("arbitrary",)),
        cost_estimate=pl.CostEstimate(
            flops=cnn_flops + lstm_flops + head_flops,
            transcendentals=2 * seq_len * 5 * batch * HP,
            bytes_accessed=bytes_accessed),
    )(*args)


@jax.jit
def forward(x, kp):
    """x: (B, T, C, H, W) NCHW frames, kp: packed/padded kernel params."""
    B, T, C, H, W = x.shape
    # Free bitcast-reshape only: the strided subsample + channels-last layout is
    # folded into wbig1's zero pattern, so no extra XLA op precedes the kernel.
    x2 = x.reshape(B * T, C * H * W)
    return _fused_pallas_call(x2, kp, B)


# ------------------------- parameter init & packing --------------------------
def init_params(key):
    """Logical (unpadded) parameters, PyTorch-equivalent shapes (in, out) layout."""
    ks = jax.random.split(key, 18)
    s = 0.1
    f32 = jnp.float32

    def rnd(i, shape):
        return jax.random.normal(ks[i], shape, f32) * s

    return {
        "w_bb":   rnd(0, (C_IN, C_BB)),           "b_bb":   rnd(1, (C_BB,)),
        "w_conv": rnd(2, (C_BB, NUM_CHANNELS)),   "b_conv": rnd(3, (NUM_CHANNELS,)),
        "w_fc1":  rnd(4, (NUM_CHANNELS, FC_HIDDEN)), "b_fc1": rnd(5, (FC_HIDDEN,)),
        "w_fc2":  rnd(6, (FC_HIDDEN, LSTM_IN)),   "b_fc2":  rnd(7, (LSTM_IN,)),
        # LSTM weights, gate order (i, f, g, o) as in PyTorch; b = b_ih + b_hh folded
        "wih0":   rnd(8, (4, LSTM_IN, HIDDEN)),
        "whh0":   rnd(9, (4, HIDDEN, HIDDEN)),
        "b0":     rnd(10, (4, HIDDEN)),
        "wih1":   rnd(11, (4, HIDDEN, HIDDEN)),
        "whh1":   rnd(12, (4, HIDDEN, HIDDEN)),
        "b1":     rnd(13, (4, HIDDEN)),
        "scale":  jnp.full((HIDDEN,), 0.5, f32),   # nn.Parameter(1/2 * ones)
        "offset": jnp.full((HIDDEN,), 0.5, f32),   # nn.Parameter(0.5 * ones)
        "w_out1": rnd(14, (HIDDEN, OUT_DIM)),     "b_out1": rnd(15, (OUT_DIM,)),
        "w_out2": rnd(16, (OUT_DIM, OUT_DIM)),    "b_out2": rnd(17, (OUT_DIM,)),
    }


def pack_params(p):
    """Host-side, one-time: fold subsample+conv, pad to lane-dense widths,
    fuse LSTM gates / layers, cast the big LSTM weights to bf16."""
    f32 = jnp.float32

    def pad2(w, rows, cols):
        out = jnp.zeros((rows, cols), f32)
        return out.at[:w.shape[0], :w.shape[1]].set(w)

    def pad_row(v, cols):
        out = jnp.zeros((1, cols), f32)
        return out.at[0, :v.shape[0]].set(v)

    # wbig1: (C*H*W, S*C_BB). Encodes the strided spatial subsample (rows for
    # non-sampled pixels are zero) + the synthetic backbone 1x1 conv.
    wbig1 = jnp.zeros((C_IN * IMG_H * IMG_W, S_SPATIAL * C_BB), f32)
    s = 0
    for hs in range(0, IMG_H, REDUCTION):
        for ws in range(0, IMG_W, REDUCTION):
            for c in range(C_IN):
                row = c * IMG_H * IMG_W + hs * IMG_W + ws
                wbig1 = wbig1.at[row, s * C_BB:(s + 1) * C_BB].set(p["w_bb"][c])
            s += 1
    bbig1 = jnp.tile(p["b_bb"], (S_SPATIAL,))[None, :]

    # wbig2: pool conv applied block-diagonally per spatial position; each output
    # block padded to 128 lanes so the max-pool is over lane-tile-aligned slices.
    wbig2 = jnp.zeros((S_SPATIAL * C_BB, S_SPATIAL * POOL_BLK), f32)
    bbig2 = jnp.zeros((1, S_SPATIAL * POOL_BLK), f32)
    for s in range(S_SPATIAL):
        wbig2 = wbig2.at[s * C_BB:(s + 1) * C_BB,
                         s * POOL_BLK:s * POOL_BLK + NUM_CHANNELS].set(p["w_conv"])
        bbig2 = bbig2.at[0, s * POOL_BLK:s * POOL_BLK + NUM_CHANNELS].set(p["b_conv"])

    def cat_gates(w_g):        # (4, in, H) -> (HP, 4*HP), 128-aligned gate blocks
        return jnp.concatenate([pad2(w_g[g], HP, HP) for g in range(4)], axis=1)

    def cat_gate_bias(b_g):    # (4, H) -> (1, 4*HP)
        return jnp.concatenate([pad_row(b_g[g], HP) for g in range(4)], axis=1)

    wih0 = cat_gates(p["wih0"])
    whh0 = cat_gates(p["whh0"])
    wih1 = cat_gates(p["wih1"])
    whh1 = cat_gates(p["whh1"])
    # Fused recurrent weight for the wavefront step (K=256 fills v6e/v7x MXU):
    #   rows   0..127  <- h1_prev     rows 128..255 <- h2_prev
    #   cols   0..511  -> layer-0 recurrent gates (whh0 ; 0)
    #   cols 512..1023 -> layer-1 full gates      (wih1 ; whh1)
    wrec = jnp.concatenate(
        [jnp.concatenate([whh0, wih1], axis=1),
         jnp.concatenate([jnp.zeros_like(whh1), whh1], axis=1)], axis=0)

    return {
        "wbig1": wbig1, "bbig1": bbig1, "wbig2": wbig2, "bbig2": bbig2,
        "w_fc1": pad2(p["w_fc1"], POOL_BLK, FC_HIDDEN), "b_fc1": p["b_fc1"][None, :],
        "w_fc2": pad2(p["w_fc2"], FC_HIDDEN, HP),       "b_fc2": pad_row(p["b_fc2"], HP),
        "wih0": wih0.astype(jnp.bfloat16), "b0": cat_gate_bias(p["b0"]),
        "wrec": wrec.astype(jnp.bfloat16), "b1": cat_gate_bias(p["b1"]),
        "scale": pad_row(p["scale"], HP),  "offset": pad_row(p["offset"], HP),
        "w_out1": pad2(p["w_out1"], HP, OP),      "b_out1": pad_row(p["b_out1"], OP),
        "w_out2": pad2(p["w_out2"], OP, OUT_DIM), "b_out2": p["b_out2"][None, :],
    }


# ------------------------ pure-JAX reference (check) -------------------------
def reference_forward(x, p):
    B, T, C, H, W = x.shape
    N = B * T
    xf = x.reshape(N, C, H, W)
    xs = xf[:, :, ::REDUCTION, ::REDUCTION]
    x_cl = jnp.transpose(xs, (0, 2, 3, 1)).reshape(N, -1, C)            # (N, S, C)
    h = jnp.maximum(jnp.einsum("nsc,cd->nsd", x_cl, p["w_bb"]) + p["b_bb"], 0.0)
    y = jnp.einsum("nsd,de->nse", h, p["w_conv"]) + p["b_conv"]
    pooled = jnp.max(y, axis=1)                                          # (N, NC)
    f1 = jnp.maximum(pooled @ p["w_fc1"] + p["b_fc1"], 0.0)
    fea = jnp.maximum(f1 @ p["w_fc2"] + p["b_fc2"], 0.0)                 # (N, 65)
    fea = fea.reshape(B, T, LSTM_IN)

    def cell(x_t, h, c, wih, whh, b):
        i = jax.nn.sigmoid(x_t @ wih[0] + h @ whh[0] + b[0])
        f = jax.nn.sigmoid(x_t @ wih[1] + h @ whh[1] + b[1])
        g = jnp.tanh(x_t @ wih[2] + h @ whh[2] + b[2])
        o = jax.nn.sigmoid(x_t @ wih[3] + h @ whh[3] + b[3])
        c = f * c + i * g
        return o * jnp.tanh(c), c

    def step(carry, x_t):
        h1, c1, h2, c2 = carry
        h1, c1 = cell(x_t, h1, c1, p["wih0"], p["whh0"], p["b0"])
        h2, c2 = cell(h1, h2, c2, p["wih1"], p["whh1"], p["b1"])
        return (h1, c1, h2, c2), None

    init = tuple(jnp.zeros((B, HIDDEN), jnp.float32) for _ in range(4))
    (_, _, h2, _), _ = jax.lax.scan(step, init, jnp.transpose(fea, (1, 0, 2)))
    lstm_last = h2 * p["scale"] + p["offset"]
    t1 = jnp.maximum(jnp.maximum(lstm_last, 0.0) @ p["w_out1"] + p["b_out1"], 0.0)
    return t1 @ p["w_out2"] + p["b_out2"]


# --------------------------------- main --------------------------------------
if __name__ == "__main__":
    key = jax.random.PRNGKey(0)
    kx, kparam = jax.random.split(key)

    B, T = 2, 4
    x = jax.random.normal(kx, (B, T, C_IN, IMG_H, IMG_W), jnp.float32)
    params = init_params(kparam)
    packed = pack_params(params)       # one-time host-side folding / padding / bf16

    out = jax.block_until_ready(forward(x, packed))
    assert out.shape == (B, OUT_DIM), out.shape

    ref = jax.block_until_ready(reference_forward(x, params))
    # Tolerance relaxed slightly vs. an all-f32 kernel because the LSTM weights
    # are stored/consumed as bf16 (f32 accumulation); structural errors would be O(0.1-1).
    assert jnp.allclose(out, ref, atol=3e-3, rtol=3e-3), (
        float(jnp.max(jnp.abs(out - ref))))

    print("KERNEL_OK")
</pallas_src>

<mosaic_0001>
module attributes {stable_mosaic.version = 11 : i64} {
  func.func @fused_forward_kernel(%arg0: i32, %arg1: memref<8x768xf32, #tpu.memory_space<vmem>>, %arg2: memref<768x32xf32, #tpu.memory_space<vmem>>, %arg3: memref<1x32xf32, #tpu.memory_space<vmem>>, %arg4: memref<32x512xf32, #tpu.memory_space<vmem>>, %arg5: memref<1x512xf32, #tpu.memory_space<vmem>>, %arg6: memref<128x8xf32, #tpu.memory_space<vmem>>, %arg7: memref<1x8xf32, #tpu.memory_space<vmem>>, %arg8: memref<8x128xf32, #tpu.memory_space<vmem>>, %arg9: memref<1x128xf32, #tpu.memory_space<vmem>>, %arg10: memref<128x512xbf16, #tpu.memory_space<vmem>>, %arg11: memref<1x512xf32, #tpu.memory_space<vmem>>, %arg12: memref<256x1024xbf16, #tpu.memory_space<vmem>>, %arg13: memref<1x512xf32, #tpu.memory_space<vmem>>, %arg14: memref<1x128xf32, #tpu.memory_space<vmem>>, %arg15: memref<1x128xf32, #tpu.memory_space<vmem>>, %arg16: memref<128x128xf32, #tpu.memory_space<vmem>>, %arg17: memref<1x128xf32, #tpu.memory_space<vmem>>, %arg18: memref<128x17xf32, #tpu.memory_space<vmem>>, %arg19: memref<1x17xf32, #tpu.memory_space<vmem>>, %arg20: memref<2x17xf32, #tpu.memory_space<vmem>>) attributes {dimension_semantics = [#tpu.dimension_semantics<arbitrary>], iteration_bounds = array<i64: 1>, scalar_prefetch = 0 : i64, scratch_operands = 0 : i64, tpu.core_type = #tpu.core_type<tc>, window_params = [{pipeline_mode = #tpu.pipeline_mode<synchronous>, transform_indices = @transform_0, window_bounds = array<i64: 8, 768>}, {pipeline_mode = #tpu.pipeline_mode<synchronous>, transform_indices = @transform_1, window_bounds = array<i64: 768, 32>}, {pipeline_mode = #tpu.pipeline_mode<synchronous>, transform_indices = @transform_2, window_bounds = array<i64: 1, 32>}, {pipeline_mode = #tpu.pipeline_mode<synchronous>, transform_indices = @transform_3, window_bounds = array<i64: 32, 512>}, {pipeline_mode = #tpu.pipeline_mode<synchronous>, transform_indices = @transform_4, window_bounds = array<i64: 1, 512>}, {pipeline_mode = #tpu.pipeline_mode<synchronous>, transform_indices = @transform_5, window_bounds = array<i64: 128, 8>}, {pipeline_mode = #tpu.pipeline_mode<synchronous>, transform_indices = @transform_6, window_bounds = array<i64: 1, 8>}, {pipeline_mode = #tpu.pipeline_mode<synchronous>, transform_indices = @transform_7, window_bounds = array<i64: 8, 128>}, {pipeline_mode = #tpu.pipeline_mode<synchronous>, transform_indices = @transform_8, window_bounds = array<i64: 1, 128>}, {pipeline_mode = #tpu.pipeline_mode<synchronous>, transform_indices = @transform_9, window_bounds = array<i64: 128, 512>}, {pipeline_mode = #tpu.pipeline_mode<synchronous>, transform_indices = @transform_10, window_bounds = array<i64: 1, 512>}, {pipeline_mode = #tpu.pipeline_mode<synchronous>, transform_indices = @transform_11, window_bounds = array<i64: 256, 1024>}, {pipeline_mode = #tpu.pipeline_mode<synchronous>, transform_indices = @transform_12, window_bounds = array<i64: 1, 512>}, {pipeline_mode = #tpu.pipeline_mode<synchronous>, transform_indices = @transform_13, window_bounds = array<i64: 1, 128>}, {pipeline_mode = #tpu.pipeline_mode<synchronous>, transform_indices = @transform_14, window_bounds = array<i64: 1, 128>}, {pipeline_mode = #tpu.pipeline_mode<synchronous>, transform_indices = @transform_15, window_bounds = array<i64: 128, 128>}, {pipeline_mode = #tpu.pipeline_mode<synchronous>, transform_indices = @transform_16, window_bounds = array<i64: 1, 128>}, {pipeline_mode = #tpu.pipeline_mode<synchronous>, transform_indices = @transform_17, window_bounds = array<i64: 128, 17>}, {pipeline_mode = #tpu.pipeline_mode<synchronous>, transform_indices = @transform_18, window_bounds = array<i64: 1, 17>}, {pipeline_mode = #tpu.pipeline_mode<synchronous>, transform_indices = @transform_19, window_bounds = array<i64: 2, 17>}]} {
    %c0 = arith.constant 0 : index
    %c0_0 = arith.constant 0 : index
    %0 = vector.load %arg1[%c0, %c0_0] : memref<8x768xf32, #tpu.memory_space<vmem>>, vector<8x768xf32>
    %c0_1 = arith.constant 0 : index
    %c0_2 = arith.constant 0 : index
    %1 = vector.load %arg2[%c0_1, %c0_2] : memref<768x32xf32, #tpu.memory_space<vmem>>, vector<768x32xf32>
    %cst = arith.constant dense<0.000000e+00> : vector<8x32xf32>
    %2 = tpu.matmul %0, %1, %cst {dimension_numbers = #tpu.dot_dimension_numbers<[1], [0], [0], [1], [0, 0, 1, 1], [], []>} : vector<8x768xf32>, vector<768x32xf32>, vector<8x32xf32> -> vector<8x32xf32>
    %c0_3 = arith.constant 0 : index
    %c0_4 = arith.constant 0 : index
    %3 = vector.load %arg3[%c0_3, %c0_4] : memref<1x32xf32, #tpu.memory_space<vmem>>, vector<1x32xf32>
    %4 = vector.broadcast %3 : vector<1x32xf32> to vector<8x32xf32>
    %5 = arith.addf %2, %4 : vector<8x32xf32>
    %cst_5 = arith.constant 0.000000e+00 : f32
    %6 = vector.broadcast %cst_5 : f32 to vector<8x32xf32>
    %7 = arith.maximumf %5, %6 : vector<8x32xf32>
    %c0_6 = arith.constant 0 : index
    %c0_7 = arith.constant 0 : index
    %8 = vector.load %arg4[%c0_6, %c0_7] : memref<32x512xf32, #tpu.memory_space<vmem>>, vector<32x512xf32>
    %cst_8 = arith.constant dense<0.000000e+00> : vector<8x512xf32>
    %9 = tpu.matmul %7, %8, %cst_8 {dimension_numbers = #tpu.dot_dimension_numbers<[1], [0], [0], [1], [0, 0, 1, 1], [], []>} : vector<8x32xf32>, vector<32x512xf32>, vector<8x512xf32> -> vector<8x512xf32>
    %c0_9 = arith.constant 0 : index
    %c0_10 = arith.constant 0 : index
    %10 = vector.load %arg5[%c0_9, %c0_10] : memref<1x512xf32, #tpu.memory_space<vmem>>, vector<1x512xf32>
    %11 = vector.broadcast %10 : vector<1x512xf32> to vector<8x512xf32>
    %12 = arith.addf %9, %11 : vector<8x512xf32>
    %13 = vector.extract_strided_slice %12 {offsets = [0, 0], sizes = [8, 128], strides = [1, 1]} : vector<8x512xf32> to vector<8x128xf32>
    %14 = vector.extract_strided_slice %12 {offsets = [0, 128], sizes = [8, 128], strides = [1, 1]} : vector<8x512xf32> to vector<8x128xf32>
    %15 = arith.maximumf %13, %14 : vector<8x128xf32>
    %16 = vector.extract_strided_slice %12 {offsets = [0, 256], sizes = [8, 128], strides = [1, 1]} : vector<8x512xf32> to vector<8x128xf32>
    %17 = arith.maximumf %15, %16 : vector<8x128xf32>
    %18 = vector.extract_strided_slice %12 {offsets = [0, 384], sizes = [8, 128], strides = [1, 1]} : vector<8x512xf32> to vector<8x128xf32>
    %19 = arith.maximumf %17, %18 : vector<8x128xf32>
    %c0_11 = arith.constant 0 : index
    %c0_12 = arith.constant 0 : index
    %20 = vector.load %arg6[%c0_11, %c0_12] : memref<128x8xf32, #tpu.memory_space<vmem>>, vector<128x8xf32>
    %cst_13 = arith.constant dense<0.000000e+00> : vector<8x8xf32>
    %21 = tpu.matmul %19, %20, %cst_13 {dimension_numbers = #tpu.dot_dimension_numbers<[1], [0], [0], [1], [0, 0, 1, 1], [], []>} : vector<8x128xf32>, vector<128x8xf32>, vector<8x8xf32> -> vector<8x8xf32>
    %c0_14 = arith.constant 0 : index
    %c0_15 = arith.constant 0 : index
    %22 = vector.load %arg7[%c0_14, %c0_15] : memref<1x8xf32, #tpu.memory_space<vmem>>, vector<1x8xf32>
    %23 = vector.broadcast %22 : vector<1x8xf32> to vector<8x8xf32>
    %24 = arith.addf %21, %23 : vector<8x8xf32>
    %cst_16 = arith.constant 0.000000e+00 : f32
    %25 = vector.broadcast %cst_16 : f32 to vector<8x8xf32>
    %26 = arith.maximumf %24, %25 : vector<8x8xf32>
    %c0_17 = arith.constant 0 : index
    %c0_18 = arith.constant 0 : index
    %27 = vector.load %arg8[%c0_17, %c0_18] : memref<8x128xf32, #tpu.memory_space<vmem>>, vector<8x128xf32>
    %cst_19 = arith.constant dense<0.000000e+00> : vector<8x128xf32>
    %28 = tpu.matmul %26, %27, %cst_19 {dimension_numbers = #tpu.dot_dimension_numbers<[1], [0], [0], [1], [0, 0, 1, 1], [], []>} : vector<8x8xf32>, vector<8x128xf32>, vector<8x128xf32> -> vector<8x128xf32>
    %c0_20 = arith.constant 0 : index
    %c0_21 = arith.constant 0 : index
    %29 = vector.load %arg9[%c0_20, %c0_21] : memref<1x128xf32, #tpu.memory_space<vmem>>, vector<1x128xf32>
    %30 = vector.broadcast %29 : vector<1x128xf32> to vector<8x128xf32>
    %31 = arith.addf %28, %30 : vector<8x128xf32>
    %cst_22 = arith.constant 0.000000e+00 : f32
    %32 = vector.broadcast %cst_22 : f32 to vector<8x128xf32>
    %33 = arith.maximumf %31, %32 : vector<8x128xf32>
    %34 = vector.extract_strided_slice %33 {offsets = [0, 0], sizes = [1, 128], strides = [1, 1]} : vector<8x128xf32> to vector<1x128xf32>
    %35 = vector.extract_strided_slice %33 {offsets = [4, 0], sizes = [1, 128], strides = [1, 1]} : vector<8x128xf32> to vector<1x128xf32>
    %36 = vector.extract_strided_slice %33 {offsets = [1, 0], sizes = [1, 128], strides = [1, 1]} : vector<8x128xf32> to vector<1x128xf32>
    %37 = vector.extract_strided_slice %33 {offsets = [5, 0], sizes = [1, 128], strides = [1, 1]} : vector<8x128xf32> to vector<1x128xf32>
    %38 = vector.extract_strided_slice %33 {offsets = [2, 0], sizes = [1, 128], strides = [1, 1]} : vector<8x128xf32> to vector<1x128xf32>
    %39 = vector.extract_strided_slice %33 {offsets = [6, 0], sizes = [1, 128], strides = [1, 1]} : vector<8x128xf32> to vector<1x128xf32>
    %40 = vector.extract_strided_slice %33 {offsets = [3, 0], sizes = [1, 128], strides = [1, 1]} : vector<8x128xf32> to vector<1x128xf32>
    %41 = vector.extract_strided_slice %33 {offsets = [7, 0], sizes = [1, 128], strides = [1, 1]} : vector<8x128xf32> to vector<1x128xf32>
    %42 = tpu.concatenate %34, %35, %36, %37, %38, %39, %40, %41 in 0 : vector<1x128xf32>, vector<1x128xf32>, vector<1x128xf32>, vector<1x128xf32>, vector<1x128xf32>, vector<1x128xf32>, vector<1x128xf32>, vector<1x128xf32> -> vector<8x128xf32>
    %43 = arith.truncf %42 : vector<8x128xf32> to vector<8x128xbf16>
    %c0_23 = arith.constant 0 : index
    %c0_24 = arith.constant 0 : index
    %44 = vector.load %arg10[%c0_23, %c0_24] : memref<128x512xbf16, #tpu.memory_space<vmem>>, vector<128x512xbf16>
    %cst_25 = arith.constant dense<0.000000e+00> : vector<8x512xf32>
    %45 = tpu.matmul %43, %44, %cst_25 {dimension_numbers = #tpu.dot_dimension_numbers<[1], [0], [0], [1], [0, 0, 1, 1], [], []>} : vector<8x128xbf16>, vector<128x512xbf16>, vector<8x512xf32> -> vector<8x512xf32>
    %c0_26 = arith.constant 0 : index
    %c0_27 = arith.constant 0 : index
    %46 = vector.load %arg11[%c0_26, %c0_27] : memref<1x512xf32, #tpu.memory_space<vmem>>, vector<1x512xf32>
    %47 = vector.broadcast %46 : vector<1x512xf32> to vector<8x512xf32>
    %48 = arith.addf %45, %47 : vector<8x512xf32>
    %c0_28 = arith.constant 0 : index
    %c0_29 = arith.constant 0 : index
    %49 = vector.load %arg12[%c0_28, %c0_29] : memref<256x1024xbf16, #tpu.memory_space<vmem>>, vector<256x1024xbf16>
    %c0_30 = arith.constant 0 : index
    %c0_31 = arith.constant 0 : index
    %50 = vector.load %arg13[%c0_30, %c0_31] : memref<1x512xf32, #tpu.memory_space<vmem>>, vector<1x512xf32>
    %cst_32 = arith.constant 0.000000e+00 : f32
    %51 = vector.broadcast %cst_32 : f32 to vector<2x128xf32>
    %52 = vector.extract_strided_slice %48 {offsets = [0, 0], sizes = [2, 512], strides = [1, 1]} : vector<8x512xf32> to vector<2x512xf32>
    %53 = vector.extract_strided_slice %52 {offsets = [0, 0], sizes = [2, 128], strides = [1, 1]} : vector<2x512xf32> to vector<2x128xf32>
    %54 = arith.negf %53 : vector<2x128xf32>
    %55 = math.exp %54 : vector<2x128xf32>
    %cst_33 = arith.constant 1.000000e+00 : f32
    %56 = vector.broadcast %cst_33 : f32 to vector<2x128xf32>
    %57 = arith.addf %56, %55 : vector<2x128xf32>
    %58 = arith.divf %56, %57 : vector<2x128xf32>
    %59 = vector.extract_strided_slice %52 {offsets = [0, 128], sizes = [2, 128], strides = [1, 1]} : vector<2x512xf32> to vector<2x128xf32>
    %60 = arith.negf %59 : vector<2x128xf32>
    %61 = math.exp %60 : vector<2x128xf32>
    %cst_34 = arith.constant 1.000000e+00 : f32
    %62 = vector.broadcast %cst_34 : f32 to vector<2x128xf32>
    %63 = arith.addf %62, %61 : vector<2x128xf32>
    %64 = arith.divf %62, %63 : vector<2x128xf32>
    %65 = vector.extract_strided_slice %52 {offsets = [0, 256], sizes = [2, 128], strides = [1, 1]} : vector<2x512xf32> to vector<2x128xf32>
    %66 = math.tanh %65 : vector<2x128xf32>
    %67 = vector.extract_strided_slice %52 {offsets = [0, 384], sizes = [2, 128], strides = [1, 1]} : vector<2x512xf32> to vector<2x128xf32>
    %68 = arith.negf %67 : vector<2x128xf32>
    %69 = math.exp %68 : vector<2x128xf32>
    %cst_35 = arith.constant 1.000000e+00 : f32
    %70 = vector.broadcast %cst_35 : f32 to vector<2x128xf32>
    %71 = arith.addf %70, %69 : vector<2x128xf32>
    %72 = arith.divf %70, %71 : vector<2x128xf32>
    %73 = arith.mulf %64, %51 : vector<2x128xf32>
    %74 = arith.mulf %58, %66 : vector<2x128xf32>
    %75 = arith.addf %73, %74 : vector<2x128xf32>
    %76 = math.tanh %75 : vector<2x128xf32>
    %77 = arith.mulf %72, %76 : vector<2x128xf32>
    %78 = tpu.concatenate %77, %51 in 1 : vector<2x128xf32>, vector<2x128xf32> -> vector<2x256xf32>
    %79 = arith.truncf %78 : vector<2x256xf32> to vector<2x256xbf16>
    %cst_36 = arith.constant dense<0.000000e+00> : vector<2x1024xf32>
    %80 = tpu.matmul %79, %49, %cst_36 {dimension_numbers = #tpu.dot_dimension_numbers<[1], [0], [0], [1], [0, 0, 1, 1], [], []>} : vector<2x256xbf16>, vector<256x1024xbf16>, vector<2x1024xf32> -> vector<2x1024xf32>
    %81 = vector.extract_strided_slice %48 {offsets = [2, 0], sizes = [2, 512], strides = [1, 1]} : vector<8x512xf32> to vector<2x512xf32>
    %82 = vector.extract_strided_slice %80 {offsets = [0, 0], sizes = [2, 512], strides = [1, 1]} : vector<2x1024xf32> to vector<2x512xf32>
    %83 = arith.addf %81, %82 : vector<2x512xf32>
    %84 = vector.extract_strided_slice %80 {offsets = [0, 512], sizes = [2, 512], strides = [1, 1]} : vector<2x1024xf32> to vector<2x512xf32>
    %85 = vector.broadcast %50 : vector<1x512xf32> to vector<2x512xf32>
    %86 = arith.addf %84, %85 : vector<2x512xf32>
    %87 = vector.extract_strided_slice %83 {offsets = [0, 0], sizes = [2, 128], strides = [1, 1]} : vector<2x512xf32> to vector<2x128xf32>
    %88 = arith.negf %87 : vector<2x128xf32>
    %89 = math.exp %88 : vector<2x128xf32>
    %cst_37 = arith.constant 1.000000e+00 : f32
    %90 = vector.broadcast %cst_37 : f32 to vector<2x128xf32>
    %91 = arith.addf %90, %89 : vector<2x128xf32>
    %92 = arith.divf %90, %91 : vector<2x128xf32>
    %93 = vector.extract_strided_slice %83 {offsets = [0, 128], sizes = [2, 128], strides = [1, 1]} : vector<2x512xf32> to vector<2x128xf32>
    %94 = arith.negf %93 : vector<2x128xf32>
    %95 = math.exp %94 : vector<2x128xf32>
    %cst_38 = arith.constant 1.000000e+00 : f32
    %96 = vector.broadcast %cst_38 : f32 to vector<2x128xf32>
    %97 = arith.addf %96, %95 : vector<2x128xf32>
    %98 = arith.divf %96, %97 : vector<2x128xf32>
    %99 = vector.extract_strided_slice %83 {offsets = [0, 256], sizes = [2, 128], strides = [1, 1]} : vector<2x512xf32> to vector<2x128xf32>
    %100 = math.tanh %99 : vector<2x128xf32>
    %101 = vector.extract_strided_slice %83 {offsets = [0, 384], sizes = [2, 128], strides = [1, 1]} : vector<2x512xf32> to vector<2x128xf32>
    %102 = arith.negf %101 : vector<2x128xf32>
    %103 = math.exp %102 : vector<2x128xf32>
    %cst_39 = arith.constant 1.000000e+00 : f32
    %104 = vector.broadcast %cst_39 : f32 to vector<2x128xf32>
    %105 = arith.addf %104, %103 : vector<2x128xf32>
    %106 = arith.divf %104, %105 : vector<2x128xf32>
    %107 = arith.mulf %98, %75 : vector<2x128xf32>
    %108 = arith.mulf %92, %100 : vector<2x128xf32>
    %109 = arith.addf %107, %108 : vector<2x128xf32>
    %110 = math.tanh %109 : vector<2x128xf32>
    %111 = arith.mulf %106, %110 : vector<2x128xf32>
    %112 = vector.extract_strided_slice %86 {offsets = [0, 0], sizes = [2, 128], strides = [1, 1]} : vector<2x512xf32> to vector<2x128xf32>
    %113 = arith.negf %112 : vector<2x128xf32>
    %114 = math.exp %113 : vector<2x128xf32>
    %cst_40 = arith.constant 1.000000e+00 : f32
    %115 = vector.broadcast %cst_40 : f32 to vector<2x128xf32>
    %116 = arith.addf %115, %114 : vector<2x128xf32>
    %117 = arith.divf %115, %116 : vector<2x128xf32>
    %118 = vector.extract_strided_slice %86 {offsets = [0, 128], sizes = [2, 128], strides = [1, 1]} : vector<2x512xf32> to vector<2x128xf32>
    %119 = arith.negf %118 : vector<2x128xf32>
    %120 = math.exp %119 : vector<2x128xf32>
    %cst_41 = arith.constant 1.000000e+00 : f32
    %121 = vector.broadcast %cst_41 : f32 to vector<2x128xf32>
    %122 = arith.addf %121, %120 : vector<2x128xf32>
    %123 = arith.divf %121, %122 : vector<2x128xf32>
    %124 = vector.extract_strided_slice %86 {offsets = [0, 256], sizes = [2, 128], strides = [1, 1]} : vector<2x512xf32> to vector<2x128xf32>
    %125 = math.tanh %124 : vector<2x128xf32>
    %126 = vector.extract_strided_slice %86 {offsets = [0, 384], sizes = [2, 128], strides = [1, 1]} : vector<2x512xf32> to vector<2x128xf32>
    %127 = arith.negf %126 : vector<2x128xf32>
    %128 = math.exp %127 : vector<2x128xf32>
    %cst_42 = arith.constant 1.000000e+00 : f32
    %129 = vector.broadcast %cst_42 : f32 to vector<2x128xf32>
    %130 = arith.addf %129, %128 : vector<2x128xf32>
    %131 = arith.divf %129, %130 : vector<2x128xf32>
    %132 = arith.mulf %123, %51 : vector<2x128xf32>
    %133 = arith.mulf %117, %125 : vector<2x128xf32>
    %134 = arith.addf %132, %133 : vector<2x128xf32>
    %135 = math.tanh %134 : vector<2x128xf32>
    %136 = arith.mulf %131, %135 : vector<2x128xf32>
    %137 = tpu.concatenate %111, %136 in 1 : vector<2x128xf32>, vector<2x128xf32> -> vector<2x256xf32>
    %138 = arith.truncf %137 : vector<2x256xf32> to vector<2x256xbf16>
    %cst_43 = arith.constant dense<0.000000e+00> : vector<2x1024xf32>
    %139 = tpu.matmul %138, %49, %cst_43 {dimension_numbers = #tpu.dot_dimension_numbers<[1], [0], [0], [1], [0, 0, 1, 1], [], []>} : vector<2x256xbf16>, vector<256x1024xbf16>, vector<2x1024xf32> -> vector<2x1024xf32>
    %140 = vector.extract_strided_slice %48 {offsets = [4, 0], sizes = [2, 512], strides = [1, 1]} : vector<8x512xf32> to vector<2x512xf32>
    %141 = vector.extract_strided_slice %139 {offsets = [0, 0], sizes = [2, 512], strides = [1, 1]} : vector<2x1024xf32> to vector<2x512xf32>
    %142 = arith.addf %140, %141 : vector<2x512xf32>
    %143 = vector.extract_strided_slice %139 {offsets = [0, 512], sizes = [2, 512], strides = [1, 1]} : vector<2x1024xf32> to vector<2x512xf32>
    %144 = vector.broadcast %50 : vector<1x512xf32> to vector<2x512xf32>
    %145 = arith.addf %143, %144 : vector<2x512xf32>
    %146 = vector.extract_strided_slice %142 {offsets = [0, 0], sizes = [2, 128], strides = [1, 1]} : vector<2x512xf32> to vector<2x128xf32>
    %147 = arith.negf %146 : vector<2x128xf32>
    %148 = math.exp %147 : vector<2x128xf32>
    %cst_44 = arith.constant 1.000000e+00 : f32
    %149 = vector.broadcast %cst_44 : f32 to vector<2x128xf32>
    %150 = arith.addf %149, %148 : vector<2x128xf32>
    %151 = arith.divf %149, %150 : vector<2x128xf32>
    %152 = vector.extract_strided_slice %142 {offsets = [0, 128], sizes = [2, 128], strides = [1, 1]} : vector<2x512xf32> to vector<2x128xf32>
    %153 = arith.negf %152 : vector<2x128xf32>
    %154 = math.exp %153 : vector<2x128xf32>
    %cst_45 = arith.constant 1.000000e+00 : f32
    %155 = vector.broadcast %cst_45 : f32 to vector<2x128xf32>
    %156 = arith.addf %155, %154 : vector<2x128xf32>
    %157 = arith.divf %155, %156 : vector<2x128xf32>
    %158 = vector.extract_strided_slice %142 {offsets = [0, 256], sizes = [2, 128], strides = [1, 1]} : vector<2x512xf32> to vector<2x128xf32>
    %159 = math.tanh %158 : vector<2x128xf32>
    %160 = vector.extract_strided_slice %142 {offsets = [0, 384], sizes = [2, 128], strides = [1, 1]} : vector<2x512xf32> to vector<2x128xf32>
    %161 = arith.negf %160 : vector<2x128xf32>
    %162 = math.exp %161 : vector<2x128xf32>
    %cst_46 = arith.constant 1.000000e+00 : f32
    %163 = vector.broadcast %cst_46 : f32 to vector<2x128xf32>
    %164 = arith.addf %163, %162 : vector<2x128xf32>
    %165 = arith.divf %163, %164 : vector<2x128xf32>
    %166 = arith.mulf %157, %109 : vector<2x128xf32>
    %167 = arith.mulf %151, %159 : vector<2x128xf32>
    %168 = arith.addf %166, %167 : vector<2x128xf32>
    %169 = math.tanh %168 : vector<2x128xf32>
    %170 = arith.mulf %165, %169 : vector<2x128xf32>
    %171 = vector.extract_strided_slice %145 {offsets = [0, 0], sizes = [2, 128], strides = [1, 1]} : vector<2x512xf32> to vector<2x128xf32>
    %172 = arith.negf %171 : vector<2x128xf32>
    %173 = math.exp %172 : vector<2x128xf32>
    %cst_47 = arith.constant 1.000000e+00 : f32
    %174 = vector.broadcast %cst_47 : f32 to vector<2x128xf32>
    %175 = arith.addf %174, %173 : vector<2x128xf32>
    %176 = arith.divf %174, %175 : vector<2x128xf32>
    %177 = vector.extract_strided_slice %145 {offsets = [0, 128], sizes = [2, 128], strides = [1, 1]} : vector<2x512xf32> to vector<2x128xf32>
    %178 = arith.negf %177 : vector<2x128xf32>
    %179 = math.exp %178 : vector<2x128xf32>
    %cst_48 = arith.constant 1.000000e+00 : f32
    %180 = vector.broadcast %cst_48 : f32 to vector<2x128xf32>
    %181 = arith.addf %180, %179 : vector<2x128xf32>
    %182 = arith.divf %180, %181 : vector<2x128xf32>
    %183 = vector.extract_strided_slice %145 {offsets = [0, 256], sizes = [2, 128], strides = [1, 1]} : vector<2x512xf32> to vector<2x128xf32>
    %184 = math.tanh %183 : vector<2x128xf32>
    %185 = vector.extract_strided_slice %145 {offsets = [0, 384], sizes = [2, 128], strides = [1, 1]} : vector<2x512xf32> to vector<2x128xf32>
    %186 = arith.negf %185 : vector<2x128xf32>
    %187 = math.exp %186 : vector<2x128xf32>
    %cst_49 = arith.constant 1.000000e+00 : f32
    %188 = vector.broadcast %cst_49 : f32 to vector<2x128xf32>
    %189 = arith.addf %188, %187 : vector<2x128xf32>
    %190 = arith.divf %188, %189 : vector<2x128xf32>
    %191 = arith.mulf %182, %134 : vector<2x128xf32>
    %192 = arith.mulf %176, %184 : vector<2x128xf32>
    %193 = arith.addf %191, %192 : vector<2x128xf32>
    %194 = math.tanh %193 : vector<2x128xf32>
    %195 = arith.mulf %190, %194 : vector<2x128xf32>
    %196 = tpu.concatenate %170, %195 in 1 : vector<2x128xf32>, vector<2x128xf32> -> vector<2x256xf32>
    %197 = arith.truncf %196 : vector<2x256xf32> to vector<2x256xbf16>
    %cst_50 = arith.constant dense<0.000000e+00> : vector<2x1024xf32>
    %198 = tpu.matmul %197, %49, %cst_50 {dimension_numbers = #tpu.dot_dimension_numbers<[1], [0], [0], [1], [0, 0, 1, 1], [], []>} : vector<2x256xbf16>, vector<256x1024xbf16>, vector<2x1024xf32> -> vector<2x1024xf32>
    %199 = vector.extract_strided_slice %48 {offsets = [6, 0], sizes = [2, 512], strides = [1, 1]} : vector<8x512xf32> to vector<2x512xf32>
    %200 = vector.extract_strided_slice %198 {offsets = [0, 0], sizes = [2, 512], strides = [1, 1]} : vector<2x1024xf32> to vector<2x512xf32>
    %201 = arith.addf %199, %200 : vector<2x512xf32>
    %202 = vector.extract_strided_slice %198 {offsets = [0, 512], sizes = [2, 512], strides = [1, 1]} : vector<2x1024xf32> to vector<2x512xf32>
    %203 = vector.broadcast %50 : vector<1x512xf32> to vector<2x512xf32>
    %204 = arith.addf %202, %203 : vector<2x512xf32>
    %205 = vector.extract_strided_slice %201 {offsets = [0, 0], sizes = [2, 128], strides = [1, 1]} : vector<2x512xf32> to vector<2x128xf32>
    %206 = arith.negf %205 : vector<2x128xf32>
    %207 = math.exp %206 : vector<2x128xf32>
    %cst_51 = arith.constant 1.000000e+00 : f32
    %208 = vector.broadcast %cst_51 : f32 to vector<2x128xf32>
    %209 = arith.addf %208, %207 : vector<2x128xf32>
    %210 = arith.divf %208, %209 : vector<2x128xf32>
    %211 = vector.extract_strided_slice %201 {offsets = [0, 128], sizes = [2, 128], strides = [1, 1]} : vector<2x512xf32> to vector<2x128xf32>
    %212 = arith.negf %211 : vector<2x128xf32>
    %213 = math.exp %212 : vector<2x128xf32>
    %cst_52 = arith.constant 1.000000e+00 : f32
    %214 = vector.broadcast %cst_52 : f32 to vector<2x128xf32>
    %215 = arith.addf %214, %213 : vector<2x128xf32>
    %216 = arith.divf %214, %215 : vector<2x128xf32>
    %217 = vector.extract_strided_slice %201 {offsets = [0, 256], sizes = [2, 128], strides = [1, 1]} : vector<2x512xf32> to vector<2x128xf32>
    %218 = math.tanh %217 : vector<2x128xf32>
    %219 = vector.extract_strided_slice %201 {offsets = [0, 384], sizes = [2, 128], strides = [1, 1]} : vector<2x512xf32> to vector<2x128xf32>
    %220 = arith.negf %219 : vector<2x128xf32>
    %221 = math.exp %220 : vector<2x128xf32>
    %cst_53 = arith.constant 1.000000e+00 : f32
    %222 = vector.broadcast %cst_53 : f32 to vector<2x128xf32>
    %223 = arith.addf %222, %221 : vector<2x128xf32>
    %224 = arith.divf %222, %223 : vector<2x128xf32>
    %225 = arith.mulf %216, %168 : vector<2x128xf32>
    %226 = arith.mulf %210, %218 : vector<2x128xf32>
    %227 = arith.addf %225, %226 : vector<2x128xf32>
    %228 = math.tanh %227 : vector<2x128xf32>
    %229 = arith.mulf %224, %228 : vector<2x128xf32>
    %230 = vector.extract_strided_slice %204 {offsets = [0, 0], sizes = [2, 128], strides = [1, 1]} : vector<2x512xf32> to vector<2x128xf32>
    %231 = arith.negf %230 : vector<2x128xf32>
    %232 = math.exp %231 : vector<2x128xf32>
    %cst_54 = arith.constant 1.000000e+00 : f32
    %233 = vector.broadcast %cst_54 : f32 to vector<2x128xf32>
    %234 = arith.addf %233, %232 : vector<2x128xf32>
    %235 = arith.divf %233, %234 : vector<2x128xf32>
    %236 = vector.extract_strided_slice %204 {offsets = [0, 128], sizes = [2, 128], strides = [1, 1]} : vector<2x512xf32> to vector<2x128xf32>
    %237 = arith.negf %236 : vector<2x128xf32>
    %238 = math.exp %237 : vector<2x128xf32>
    %cst_55 = arith.constant 1.000000e+00 : f32
    %239 = vector.broadcast %cst_55 : f32 to vector<2x128xf32>
    %240 = arith.addf %239, %238 : vector<2x128xf32>
    %241 = arith.divf %239, %240 : vector<2x128xf32>
    %242 = vector.extract_strided_slice %204 {offsets = [0, 256], sizes = [2, 128], strides = [1, 1]} : vector<2x512xf32> to vector<2x128xf32>
    %243 = math.tanh %242 : vector<2x128xf32>
    %244 = vector.extract_strided_slice %204 {offsets = [0, 384], sizes = [2, 128], strides = [1, 1]} : vector<2x512xf32> to vector<2x128xf32>
    %245 = arith.negf %244 : vector<2x128xf32>
    %246 = math.exp %245 : vector<2x128xf32>
    %cst_56 = arith.constant 1.000000e+00 : f32
    %247 = vector.broadcast %cst_56 : f32 to vector<2x128xf32>
    %248 = arith.addf %247, %246 : vector<2x128xf32>
    %249 = arith.divf %247, %248 : vector<2x128xf32>
    %250 = arith.mulf %241, %193 : vector<2x128xf32>
    %251 = arith.mulf %235, %243 : vector<2x128xf32>
    %252 = arith.addf %250, %251 : vector<2x128xf32>
    %253 = math.tanh %252 : vector<2x128xf32>
    %254 = arith.mulf %249, %253 : vector<2x128xf32>
    %255 = tpu.concatenate %229, %254 in 1 : vector<2x128xf32>, vector<2x128xf32> -> vector<2x256xf32>
    %256 = arith.truncf %255 : vector<2x256xf32> to vector<2x256xbf16>
    %257 = vector.extract_strided_slice %49 {offsets = [0, 512], sizes = [256, 512], strides = [1, 1]} : vector<256x1024xbf16> to vector<256x512xbf16>
    %cst_57 = arith.constant dense<0.000000e+00> : vector<2x512xf32>
    %258 = tpu.matmul %256, %257, %cst_57 {dimension_numbers = #tpu.dot_dimension_numbers<[1], [0], [0], [1], [0, 0, 1, 1], [], []>} : vector<2x256xbf16>, vector<256x512xbf16>, vector<2x512xf32> -> vector<2x512xf32>
    %259 = vector.broadcast %50 : vector<1x512xf32> to vector<2x512xf32>
    %260 = arith.addf %258, %259 : vector<2x512xf32>
    %261 = vector.extract_strided_slice %260 {offsets = [0, 0], sizes = [2, 128], strides = [1, 1]} : vector<2x512xf32> to vector<2x128xf32>
    %262 = arith.negf %261 : vector<2x128xf32>
    %263 = math.exp %262 : vector<2x128xf32>
    %cst_58 = arith.constant 1.000000e+00 : f32
    %264 = vector.broadcast %cst_58 : f32 to vector<2x128xf32>
    %265 = arith.addf %264, %263 : vector<2x128xf32>
    %266 = arith.divf %264, %265 : vector<2x128xf32>
    %267 = vector.extract_strided_slice %260 {offsets = [0, 128], sizes = [2, 128], strides = [1, 1]} : vector<2x512xf32> to vector<2x128xf32>
    %268 = arith.negf %267 : vector<2x128xf32>
    %269 = math.exp %268 : vector<2x128xf32>
    %cst_59 = arith.constant 1.000000e+00 : f32
    %270 = vector.broadcast %cst_59 : f32 to vector<2x128xf32>
    %271 = arith.addf %270, %269 : vector<2x128xf32>
    %272 = arith.divf %270, %271 : vector<2x128xf32>
    %273 = vector.extract_strided_slice %260 {offsets = [0, 256], sizes = [2, 128], strides = [1, 1]} : vector<2x512xf32> to vector<2x128xf32>
    %274 = math.tanh %273 : vector<2x128xf32>
    %275 = vector.extract_strided_slice %260 {offsets = [0, 384], sizes = [2, 128], strides = [1, 1]} : vector<2x512xf32> to vector<2x128xf32>
    %276 = arith.negf %275 : vector<2x128xf32>
    %277 = math.exp %276 : vector<2x128xf32>
    %cst_60 = arith.constant 1.000000e+00 : f32
    %278 = vector.broadcast %cst_60 : f32 to vector<2x128xf32>
    %279 = arith.addf %278, %277 : vector<2x128xf32>
    %280 = arith.divf %278, %279 : vector<2x128xf32>
    %281 = arith.mulf %272, %252 : vector<2x128xf32>
    %282 = arith.mulf %266, %274 : vector<2x128xf32>
    %283 = arith.addf %281, %282 : vector<2x128xf32>
    %284 = math.tanh %283 : vector<2x128xf32>
    %285 = arith.mulf %280, %284 : vector<2x128xf32>
    %c0_61 = arith.constant 0 : index
    %c0_62 = arith.constant 0 : index
    %286 = vector.load %arg14[%c0_61, %c0_62] : memref<1x128xf32, #tpu.memory_space<vmem>>, vector<1x128xf32>
    %287 = vector.broadcast %286 : vector<1x128xf32> to vector<2x128xf32>
    %288 = arith.mulf %285, %287 : vector<2x128xf32>
    %c0_63 = arith.constant 0 : index
    %c0_64 = arith.constant 0 : index
    %289 = vector.load %arg15[%c0_63, %c0_64] : memref<1x128xf32, #tpu.memory_space<vmem>>, vector<1x128xf32>
    %290 = vector.broadcast %289 : vector<1x128xf32> to vector<2x128xf32>
    %291 = arith.addf %288, %290 : vector<2x128xf32>
    %cst_65 = arith.constant 0.000000e+00 : f32
    %292 = vector.broadcast %cst_65 : f32 to vector<2x128xf32>
    %293 = arith.maximumf %291, %292 : vector<2x128xf32>
    %c0_66 = arith.constant 0 : index
    %c0_67 = arith.constant 0 : index
    %294 = vector.load %arg16[%c0_66, %c0_67] : memref<128x128xf32, #tpu.memory_space<vmem>>, vector<128x128xf32>
    %cst_68 = arith.constant dense<0.000000e+00> : vector<2x128xf32>
    %295 = tpu.matmul %293, %294, %cst_68 {dimension_numbers = #tpu.dot_dimension_numbers<[1], [0], [0], [1], [0, 0, 1, 1], [], []>} : vector<2x128xf32>, vector<128x128xf32>, vector<2x128xf32> -> vector<2x128xf32>
    %c0_69 = arith.constant 0 : index
    %c0_70 = arith.constant 0 : index
    %296 = vector.load %arg17[%c0_69, %c0_70] : memref<1x128xf32, #tpu.memory_space<vmem>>, vector<1x128xf32>
    %297 = vector.broadcast %296 : vector<1x128xf32> to vector<2x128xf32>
    %298 = arith.addf %295, %297 : vector<2x128xf32>
    %cst_71 = arith.constant 0.000000e+00 : f32
    %299 = vector.broadcast %cst_71 : f32 to vector<2x128xf32>
    %300 = arith.maximumf %298, %299 : vector<2x128xf32>
    %c0_72 = arith.constant 0 : index
    %c0_73 = arith.constant 0 : index
    %301 = vector.load %arg18[%c0_72, %c0_73] : memref<128x17xf32, #tpu.memory_space<vmem>>, vector<128x17xf32>
    %cst_74 = arith.constant dense<0.000000e+00> : vector<2x17xf32>
    %302 = tpu.matmul %300, %301, %cst_74 {dimension_numbers = #tpu.dot_dimension_numbers<[1], [0], [0], [1], [0, 0, 1, 1], [], []>} : vector<2x128xf32>, vector<128x17xf32>, vector<2x17xf32> -> vector<2x17xf32>
    %c0_75 = arith.constant 0 : index
    %c0_76 = arith.constant 0 : index
    %303 = vector.load %arg19[%c0_75, %c0_76] : memref<1x17xf32, #tpu.memory_space<vmem>>, vector<1x17xf32>
    %304 = vector.broadcast %303 : vector<1x17xf32> to vector<2x17xf32>
    %305 = arith.addf %302, %304 : vector<2x17xf32>
    %c0_77 = arith.constant 0 : index
    %c0_78 = arith.constant 0 : index
    %306 = vector.load %arg20[%c0_77, %c0_78] : memref<2x17xf32, #tpu.memory_space<vmem>>, vector<2x17xf32>
    tpu.vector_store %arg20[%c0_77, %c0_78], %305 {strides = array<i32>} : memref<2x17xf32, #tpu.memory_space<vmem>>, vector<2x17xf32>,
    return
  }
  func.func @transform_0(%arg0: i32) -> (i32, i32) {
    %c0_i32 = arith.constant 0 : i32
    %c0_i32_0 = arith.constant 0 : i32
    %c0_i32_1 = arith.constant 0 : i32
    return %c0_i32, %c0_i32_0 : i32, i32
  }
  func.func @transform_1(%arg0: i32) -> (i32, i32) {
    %c0_i32 = arith.constant 0 : i32
    %c0_i32_0 = arith.constant 0 : i32
    %c0_i32_1 = arith.constant 0 : i32
    return %c0_i32, %c0_i32_0 : i32, i32
  }
  func.func @transform_2(%arg0: i32) -> (i32, i32) {
    %c0_i32 = arith.constant 0 : i32
    %c0_i32_0 = arith.constant 0 : i32
    %c0_i32_1 = arith.constant 0 : i32
    return %c0_i32, %c0_i32_0 : i32, i32
  }
  func.func @transform_3(%arg0: i32) -> (i32, i32) {
    %c0_i32 = arith.constant 0 : i32
    %c0_i32_0 = arith.constant 0 : i32
    %c0_i32_1 = arith.constant 0 : i32
    return %c0_i32, %c0_i32_0 : i32, i32
  }
  func.func @transform_4(%arg0: i32) -> (i32, i32) {
    %c0_i32 = arith.constant 0 : i32
    %c0_i32_0 = arith.constant 0 : i32
    %c0_i32_1 = arith.constant 0 : i32
    return %c0_i32, %c0_i32_0 : i32, i32
  }
  func.func @transform_5(%arg0: i32) -> (i32, i32) {
    %c0_i32 = arith.constant 0 : i32
    %c0_i32_0 = arith.constant 0 : i32
    %c0_i32_1 = arith.constant 0 : i32
    return %c0_i32, %c0_i32_0 : i32, i32
  }
  func.func @transform_6(%arg0: i32) -> (i32, i32) {
    %c0_i32 = arith.constant 0 : i32
    %c0_i32_0 = arith.constant 0 : i32
    %c0_i32_1 = arith.constant 0 : i32
    return %c0_i32, %c0_i32_0 : i32, i32
  }
  func.func @transform_7(%arg0: i32) -> (i32, i32) {
    %c0_i32 = arith.constant 0 : i32
    %c0_i32_0 = arith.constant 0 : i32
    %c0_i32_1 = arith.constant 0 : i32
    return %c0_i32, %c0_i32_0 : i32, i32
  }
  func.func @transform_8(%arg0: i32) -> (i32, i32) {
    %c0_i32 = arith.constant 0 : i32
    %c0_i32_0 = arith.constant 0 : i32
    %c0_i32_1 = arith.constant 0 : i32
    return %c0_i32, %c0_i32_0 : i32, i32
  }
  func.func @transform_9(%arg0: i32) -> (i32, i32) {
    %c0_i32 = arith.constant 0 : i32
    %c0_i32_0 = arith.constant 0 : i32
    %c0_i32_1 = arith.constant 0 : i32
    return %c0_i32, %c0_i32_0 : i32, i32
  }
  func.func @transform_10(%arg0: i32) -> (i32, i32) {
    %c0_i32 = arith.constant 0 : i32
    %c0_i32_0 = arith.constant 0 : i32
    %c0_i32_1 = arith.constant 0 : i32
    return %c0_i32, %c0_i32_0 : i32, i32
  }
  func.func @transform_11(%arg0: i32) -> (i32, i32) {
    %c0_i32 = arith.constant 0 : i32
    %c0_i32_0 = arith.constant 0 : i32
    %c0_i32_1 = arith.constant 0 : i32
    return %c0_i32, %c0_i32_0 : i32, i32
  }
  func.func @transform_12(%arg0: i32) -> (i32, i32) {
    %c0_i32 = arith.constant 0 : i32
    %c0_i32_0 = arith.constant 0 : i32
    %c0_i32_1 = arith.constant 0 : i32
    return %c0_i32, %c0_i32_0 : i32, i32
  }
  func.func @transform_13(%arg0: i32) -> (i32, i32) {
    %c0_i32 = arith.constant 0 : i32
    %c0_i32_0 = arith.constant 0 : i32
    %c0_i32_1 = arith.constant 0 : i32
    return %c0_i32, %c0_i32_0 : i32, i32
  }
  func.func @transform_14(%arg0: i32) -> (i32, i32) {
    %c0_i32 = arith.constant 0 : i32
    %c0_i32_0 = arith.constant 0 : i32
    %c0_i32_1 = arith.constant 0 : i32
    return %c0_i32, %c0_i32_0 : i32, i32
  }
  func.func @transform_15(%arg0: i32) -> (i32, i32) {
    %c0_i32 = arith.constant 0 : i32
    %c0_i32_0 = arith.constant 0 : i32
    %c0_i32_1 = arith.constant 0 : i32
    return %c0_i32, %c0_i32_0 : i32, i32
  }
  func.func @transform_16(%arg0: i32) -> (i32, i32) {
    %c0_i32 = arith.constant 0 : i32
    %c0_i32_0 = arith.constant 0 : i32
    %c0_i32_1 = arith.constant 0 : i32
    return %c0_i32, %c0_i32_0 : i32, i32
  }
  func.func @transform_17(%arg0: i32) -> (i32, i32) {
    %c0_i32 = arith.constant 0 : i32
    %c0_i32_0 = arith.constant 0 : i32
    %c0_i32_1 = arith.constant 0 : i32
    return %c0_i32, %c0_i32_0 : i32, i32
  }
  func.func @transform_18(%arg0: i32) -> (i32, i32) {
    %c0_i32 = arith.constant 0 : i32
    %c0_i32_0 = arith.constant 0 : i32
    %c0_i32_1 = arith.constant 0 : i32
    return %c0_i32, %c0_i32_0 : i32, i32
  }
  func.func @transform_19(%arg0: i32) -> (i32, i32) {
    %c0_i32 = arith.constant 0 : i32
    %c0_i32_0 = arith.constant 0 : i32
    %c0_i32_1 = arith.constant 0 : i32
    return %c0_i32, %c0_i32_0 : i32, i32
  }
}

</mosaic_0001>

<bundles_post_ra>
// kernel: forward.1
= control target key start
LH: loop header
LB: loop body
LE: loop exit
PB: predicated region body
PF: predicated region fallthrough
CT: control target
= control target key end

     0   :  { %s5784_s0 = inlined_call_operand.vmem [shape: f32[8,768], index: 0, kind: input, shape index: {}]   ;;  %s5785_s1 = inlined_call_operand.vmem [shape: f32[768,32], index: 1, kind: input, shape index: {}]   ;;  %s5786_s2 = inlined_call_operand.vmem [shape: f32[1,32], index: 2, kind: input, shape index: {}]   ;;  %s5787_s3 = inlined_call_operand.vmem [shape: f32[32,512], index: 3, kind: input, shape index: {}]   ;;  %s5788_s4 = inlined_call_operand.vmem [shape: f32[1,512], index: 4, kind: input, shape index: {}]   ;;  %s5789_s5 = inlined_call_operand.vmem [shape: f32[128,8], index: 5, kind: input, shape index: {}]   ;;  %s5790_s6 = inlined_call_operand.vmem [shape: f32[1,8], index: 6, kind: input, shape index: {}]   ;;  %s5791_s7 = inlined_call_operand.vmem [shape: f32[8,128], index: 7, kind: input, shape index: {}]   ;;  %s5792_s8 = inlined_call_operand.vmem [shape: f32[1,128], index: 8, kind: input, shape index: {}]   ;;  %s5793_s9 = inlined_call_operand.vmem [shape: bf16[128,512], index: 9, kind: input, shape index: {}]   ;;  %s5794_s10 = inlined_call_operand.vmem [shape: f32[1,512], index: 10, kind: input, shape index: {}]   ;;  %s5795_s11 = inlined_call_operand.vmem [shape: bf16[256,1024], index: 11, kind: input, shape index: {}]   ;;  %s5796_s12 = inlined_call_operand.vmem [shape: f32[1,512], index: 12, kind: input, shape index: {}]   ;;  %s5797_s13 = inlined_call_operand.vmem [shape: f32[1,128], index: 13, kind: input, shape index: {}]   ;;  %s5798_s14 = inlined_call_operand.vmem [shape: f32[1,128], index: 14, kind: input, shape index: {}]   ;;  %s5799_s15 = inlined_call_operand.vmem [shape: f32[128,128], index: 15, kind: input, shape index: {}]   ;;  %s5800_s16 = inlined_call_operand.vmem [shape: f32[1,128], index: 16, kind: input, shape index: {}]   ;;  %s5801_s17 = inlined_call_operand.vmem [shape: f32[128,17], index: 17, kind: input, shape index: {}]   ;;  %s5802_s18 = inlined_call_operand.vmem [shape: f32[1,17], index: 18, kind: input, shape index: {}]   ;;  %s5803_s19 = inlined_call_operand.hbm [shape: f32[2,17], index: 19, kind: output, shape index: {}]  }
   0x1   :  { %5997 = sst [smem:[#allocation100_spill]] %s5784_s0 }
   0x2   :  { %5998 = sst [smem:[#allocation101_spill]] %s5785_s1 }
   0x3   :  { %5999 = sst [smem:[#allocation102_spill]] %s5786_s2 }
   0x4   :  { %6000 = sst [smem:[#allocation103_spill]] %s5787_s3 }
   0x5   :  { %s6001_s20 = sld [smem:[#allocation101_spill]]  ;;  %s6002_s26 = sld [smem:[#allocation100_spill]] }
   0xb   :  { %v86_v0 = vld [vmem:[%s6001_s20 + $0x80] sm:$0xff]  ;;  %v87_v1 = vld [vmem:[%s6001_s20 + $0x88] sm:$0xff]  ;;  %v88_v11 = vld [vmem:[%s6001_s20 + $0x90] sm:$0xff] }
   0xc   :  { %v70_v2 = vld [vmem:[%s6001_s20] sm:$0xff]  ;;  %v3414_v3 = vpack.c.bf16 %v87_v1, %v86_v0  ;;  %v71_v4 = vld [vmem:[%s6001_s20 + $0x8] sm:$0xff]  ;;  %v89_v13 = vld [vmem:[%s6001_s20 + $0x98] sm:$0xff] }
   0xd   :  { %v118_v5 = vld [vmem:[%s6001_s20 + $0x180] sm:$0xff]  ;;  %v119_v6 = vld [vmem:[%s6001_s20 + $0x188] sm:$0xff]  ;;  %v3416_v7 = vpack.c.bf16 %v71_v4, %v70_v2  ;;  %v72_v14 = vld [vmem:[%s6001_s20 + $0x10] sm:$0xff]  ;;  %v3418_v16 = vpack.c.bf16 %v89_v13, %v88_v11 }
   0xe   :  { %v3446_v8 = vpack.c.bf16 %v119_v6, %v118_v5  ;;  %v102_v9 = vld [vmem:[%s6001_s20 + $0x100] sm:$0xff]  ;;  %v103_v10 = vld [vmem:[%s6001_s20 + $0x108] sm:$0xff]  ;;  %3415 = vmatprep.subr.bf16.mxu0 %v3414_v3  ;;  %v73_v15 = vld [vmem:[%s6001_s20 + $0x18] sm:$0xff] }
   0xf   :  { %v3448_v12 = vpack.c.bf16 %v103_v10, %v102_v9  ;;  %3417 = vmatpush3.bf16.msra.mxu0 %v3416_v7  ;;  %v3420_v17 = vpack.c.bf16 %v73_v15, %v72_v14  ;;  %v120_v18 = vld [vmem:[%s6001_s20 + $0x190] sm:$0xff]  ;;  %v121_v19 = vld [vmem:[%s6001_s20 + $0x198] sm:$0xff]  ;;  %v90_v23 = vld [vmem:[%s6001_s20 + $0xa0] sm:$0xff] }
  0x10   :  { %3447 = vmatprep.subr.bf16.mxu1 %v3446_v8  ;;  %v104_v20 = vld [vmem:[%s6001_s20 + $0x110] sm:$0xff]  ;;  %v3450_v21 = vpack.c.bf16 %v121_v19, %v120_v18  ;;  %v105_v22 = vld [vmem:[%s6001_s20 + $0x118] sm:$0xff]  ;;  %v91_v24 = vld [vmem:[%s6001_s20 + $0xa8] sm:$0xff]  ;;  %3419 = vmatprep.subr.bf16.mxu0 %v3418_v16 }
  0x11   :  { %3449 = vmatpush3.bf16.msra.mxu1 %v3448_v12  ;;  %v3452_v25 = vpack.c.bf16 %v105_v22, %v104_v20  ;;  %v3422_v26 = vpack.c.bf16 %v91_v24, %v90_v23  ;;  %v74_v27 = vld [vmem:[%s6001_s20 + $0x20] sm:$0xff]  ;;  %v75_v28 = vld [vmem:[%s6001_s20 + $0x28] sm:$0xff]  ;;  %v92_v35 = vld [vmem:[%s6001_s20 + $0xb0] sm:$0xff] }
  0x12   :  { %v122_v29 = vld [vmem:[%s6001_s20 + $0x1a0] sm:$0xff]  ;;  %3451 = vmatprep.subr.bf16.mxu1 %v3450_v21  ;;  %v123_v30 = vld [vmem:[%s6001_s20 + $0x1a8] sm:$0xff]  ;;  %v3424_v33 = vpack.c.bf16 %v75_v28, %v74_v27  ;;  %v93_v36 = vld [vmem:[%s6001_s20 + $0xb8] sm:$0xff] }
  0x13   :  { %v106_v31 = vld [vmem:[%s6001_s20 + $0x120] sm:$0xff]  ;;  %v107_v32 = vld [vmem:[%s6001_s20 + $0x128] sm:$0xff]  ;;  %3421 = vmatpush3.bf16.msra.mxu0 %v3420_v17  ;;  %v3454_v34 = vpack.c.bf16 %v123_v30, %v122_v29  ;;  %v76_v37 = vld [vmem:[%s6001_s20 + $0x30] sm:$0xff]  ;;  %v3426_v39 = vpack.c.bf16 %v93_v36, %v92_v35 }
  0x14   :  { %3423 = vmatprep.subr.bf16.mxu0 %v3422_v26  ;;  %v3456_v38 = vpack.c.bf16 %v107_v32, %v106_v31  ;;  %v77_v40 = vld [vmem:[%s6001_s20 + $0x38] sm:$0xff]  ;;  %v124_v41 = vld [vmem:[%s6001_s20 + $0x1b0] sm:$0xff]  ;;  %v94_v46 = vld [vmem:[%s6001_s20 + $0xc0] sm:$0xff] }
  0x15   :  { %3453 = vmatpush3.bf16.msra.mxu1 %v3452_v25  ;;  %v125_v42 = vld [vmem:[%s6001_s20 + $0x1b8] sm:$0xff]  ;;  %v108_v44 = vld [vmem:[%s6001_s20 + $0x130] sm:$0xff]  ;;  %v95_v47 = vld [vmem:[%s6001_s20 + $0xc8] sm:$0xff]  ;;  %v3428_v48 = vpack.c.bf16 %v77_v40, %v76_v37 }
  0x16   :  { %3455 = vmatprep.subr.bf16.mxu1 %v3454_v34  ;;  %v3458_v43 = vpack.c.bf16 %v125_v42, %v124_v41  ;;  %v109_v45 = vld [vmem:[%s6001_s20 + $0x138] sm:$0xff]  ;;  %v126_v49 = vld [vmem:[%s6001_s20 + $0x1c0] sm:$0xff]  ;;  %v127_v50 = vld [vmem:[%s6001_s20 + $0x1c8] sm:$0xff]  ;;  %v3430_v52 = vpack.c.bf16 %v95_v47, %v94_v46 }
  0x17   :  { %3425 = vmatpush3.bf16.msra.mxu0 %v3424_v33  ;;  %v3460_v51 = vpack.c.bf16 %v109_v45, %v108_v44  ;;  %v78_v53 = vld [vmem:[%s6001_s20 + $0x40] sm:$0xff]  ;;  %v79_v54 = vld [vmem:[%s6001_s20 + $0x48] sm:$0xff]  ;;  %v3462_v56 = vpack.c.bf16 %v127_v50, %v126_v49  ;;  %v96_v58 = vld [vmem:[%s6001_s20 + $0xd0] sm:$0xff] }
  0x18   :  { %3427 = vmatprep.subr.bf16.mxu0 %v3426_v39  ;;  %v110_v55 = vld [vmem:[%s6001_s20 + $0x140] sm:$0xff]  ;;  %v111_v57 = vld [vmem:[%s6001_s20 + $0x148] sm:$0xff]  ;;  %v97_v59 = vld [vmem:[%s6001_s20 + $0xd8] sm:$0xff]  ;;  %v3432_v62 = vpack.c.bf16 %v79_v54, %v78_v53 }
  0x19   :  { %3457 = vmatpush3.bf16.msra.mxu1 %v3456_v38  ;;  %v128_v60 = vld [vmem:[%s6001_s20 + $0x1d0] sm:$0xff]  ;;  %v129_v61 = vld [vmem:[%s6001_s20 + $0x1d8] sm:$0xff]  ;;  %v3464_v63 = vpack.c.bf16 %v111_v57, %v110_v55  ;;  %v3434_v0 = vpack.c.bf16 %v97_v59, %v96_v58  ;;  %v98_v6 = vld [vmem:[%s6001_s20 + $0xe0] sm:$0xff] }
  0x1a   :  { %3459 = vmatprep.subr.bf16.mxu1 %v3458_v43  ;;  %v80_v1 = vld [vmem:[%s6001_s20 + $0x50] sm:$0xff]  ;;  %v81_v2 = vld [vmem:[%s6001_s20 + $0x58] sm:$0xff]  ;;  %v3466_v4 = vpack.c.bf16 %v129_v61, %v128_v60  ;;  %v99_v7 = vld [vmem:[%s6001_s20 + $0xe8] sm:$0xff] }
  0x1b   :  { %3429 = vmatpush3.bf16.msra.mxu0 %v3428_v48  ;;  %v112_v3 = vld [vmem:[%s6001_s20 + $0x150] sm:$0xff]  ;;  %v113_v5 = vld [vmem:[%s6001_s20 + $0x158] sm:$0xff]  ;;  %v130_v8 = vld [vmem:[%s6001_s20 + $0x1e0] sm:$0xff]  ;;  %v3436_v10 = vpack.c.bf16 %v81_v2, %v80_v1  ;;  %v3438_v14 = vpack.c.bf16 %v99_v7, %v98_v6 }
  0x1c   :  { %3431 = vmatprep.subr.bf16.mxu0 %v3430_v52  ;;  %v131_v9 = vld [vmem:[%s6001_s20 + $0x1e8] sm:$0xff]  ;;  %v82_v11 = vld [vmem:[%s6001_s20 + $0x60] sm:$0xff]  ;;  %v3468_v13 = vpack.c.bf16 %v113_v5, %v112_v3  ;;  %v100_v19 = vld [vmem:[%s6001_s20 + $0xf0] sm:$0xff] }
  0x1d   :  { %3461 = vmatpush3.bf16.msra.mxu1 %v3460_v51  ;;  %v65_v12 = vld [vmem:[%s6002_s26 + $0x8] sm:$0xff]  ;;  %v114_v16 = vld [vmem:[%s6001_s20 + $0x160] sm:$0xff]  ;;  %v3470_v18 = vpack.c.bf16 %v131_v9, %v130_v8  ;;  %v101_v20 = vld [vmem:[%s6001_s20 + $0xf8] sm:$0xff] }
  0x1e   :  { %3463 = vmatprep.subr.bf16.mxu1 %v3462_v56  ;;  %v83_v15 = vld [vmem:[%s6001_s20 + $0x68] sm:$0xff]  ;;  %237 = vmatprep.mubr.f32.mxu0 %v65_v12  ;;  %v67_v21 = vld [vmem:[%s6002_s26 + $0x18] sm:$0xff]  ;;  %v132_v22 = vld [vmem:[%s6001_s20 + $0x1f0] sm:$0xff]  ;;  %v3442_v26 = vpack.c.bf16 %v101_v20, %v100_v19 }
  0x1f   :  { %3433 = vmatpush3.bf16.msra.mxu0 %v3432_v62  ;;  %v115_v17 = vld [vmem:[%s6001_s20 + $0x168] sm:$0xff]  ;;  %v133_v23 = vld [vmem:[%s6001_s20 + $0x1f8] sm:$0xff]  ;;  %307 = vmatprep.mubr.f32.mxu1 %v67_v21  ;;  %v3440_v24 = vpack.c.bf16 %v83_v15, %v82_v11  ;;  %v84_v27 = vld [vmem:[%s6001_s20 + $0x70] sm:$0xff] }
  0x20   :  { %3435 = vmatprep.subr.bf16.mxu0 %v3434_v0  ;;  %v3472_v25 = vpack.c.bf16 %v115_v17, %v114_v16  ;;  %v85_v28 = vld [vmem:[%s6001_s20 + $0x78] sm:$0xff]  ;;  %v116_v29 = vld [vmem:[%s6001_s20 + $0x170] sm:$0xff]  ;;  %v3474_v30 = vpack.c.bf16 %v133_v23, %v132_v22  ;;  %v150_v32 = vld [vmem:[%s6001_s20 + $0x280] sm:$0xff] }
  0x21   :  { %3465 = vmatpush3.bf16.msra.mxu1 %v3464_v63  ;;  %v117_v31 = vld [vmem:[%s6001_s20 + $0x178] sm:$0xff]  ;;  %v151_v33 = vld [vmem:[%s6001_s20 + $0x288] sm:$0xff]  ;;  %v3444_v34 = vpack.c.bf16 %v85_v28, %v84_v27  ;;  %v134_v37 = vld [vmem:[%s6001_s20 + $0x200] sm:$0xff] }
  0x22   :  { %3467 = vmatprep.subr.bf16.mxu1 %v3466_v4  ;;  %v3476_v35 = vpack.c.bf16 %v117_v31, %v116_v29  ;;  %v3478_v36 = vpack.c.bf16 %v151_v33, %v150_v32  ;;  %v135_v38 = vld [vmem:[%s6001_s20 + $0x208] sm:$0xff]  ;;  %v152_v39 = vld [vmem:[%s6001_s20 + $0x290] sm:$0xff]  ;;  %v153_v40 = vld [vmem:[%s6001_s20 + $0x298] sm:$0xff] }
  0x23   :  { %3437 = vmatpush3.bf16.msra.mxu0 %v3436_v10  ;;  %v64_v41 = vld [vmem:[%s6002_s26] sm:$0xff]  ;;  %v3480_v42 = vpack.c.bf16 %v135_v38, %v134_v37  ;;  %v66_v43 = vld [vmem:[%s6002_s26 + $0x10] sm:$0xff]  ;;  %v137_v45 = vld [vmem:[%s6001_s20 + $0x218] sm:$0xff]  ;;  %v3482_v46 = vpack.c.bf16 %v153_v40, %v152_v39 }
  0x24   :  { %3439 = vmatprep.subr.bf16.mxu0 %v3438_v14  ;;  %v136_v44 = vld [vmem:[%s6001_s20 + $0x210] sm:$0xff]  ;;  %v154_v47 = vld [vmem:[%s6001_s20 + $0x2a0] sm:$0xff]  ;;  %v155_v48 = vld [vmem:[%s6001_s20 + $0x2a8] sm:$0xff] }
  0x25   :  { %3469 = vmatpush3.bf16.msra.mxu1 %v3468_v13  ;;  %v69_v49 = vld [vmem:[%s6002_s26 + $0x28] sm:$0xff]  ;;  %v138_v50 = vld [vmem:[%s6001_s20 + $0x220] sm:$0xff]  ;;  %v3484_v52 = vpack.c.bf16 %v137_v45, %v136_v44  ;;  %v156_v53 = vld [vmem:[%s6001_s20 + $0x2b0] sm:$0xff]  ;;  %v3486_v55 = vpack.c.bf16 %v155_v48, %v154_v47 }
  0x26   :  { %3471 = vmatprep.subr.bf16.mxu1 %v3470_v18  ;;  %v139_v51 = vld [vmem:[%s6001_s20 + $0x228] sm:$0xff]  ;;  %v157_v54 = vld [vmem:[%s6001_s20 + $0x2b8] sm:$0xff]  ;;  %v140_v56 = vld [vmem:[%s6001_s20 + $0x230] sm:$0xff] }
  0x27   :  { %3441 = vmatpush3.bf16.msra.mxu0 %v3440_v24  ;;  %v141_v57 = vld [vmem:[%s6001_s20 + $0x238] sm:$0xff]  ;;  %v3488_v58 = vpack.c.bf16 %v139_v51, %v138_v50  ;;  %v158_v59 = vld [vmem:[%s6001_s20 + $0x2c0] sm:$0xff]  ;;  %v159_v60 = vld [vmem:[%s6001_s20 + $0x2c8] sm:$0xff]  ;;  %v3490_v61 = vpack.c.bf16 %v157_v54, %v156_v53 }
  0x28   :  { %3443 = vmatprep.subr.bf16.mxu0 %v3442_v26  ;;  %v3492_v62 = vpack.c.bf16 %v141_v57, %v140_v56 }
  0x29   :  { %3473 = vmatpush3.bf16.msra.mxu1 %v3472_v25 }
  0x2a   :  { %3475 = vmatprep.subr.bf16.mxu1 %v3474_v30 }
  0x2b   :  { %3445 = vmatpush3.bf16.msra.mxu0 %v3444_v34 }
  0x2c   :  { %3479 = vmatprep.subr.bf16.mxu0 %v3478_v36 }
  0x2d   :  { %3477 = vmatpush3.bf16.msra.mxu1 %v3476_v35 }
  0x2e   :  { %238 = vmatmul.mubr.f32.vlgmr.msra.gmra.mrb[0].mxu0 %v64_v41 }
  0x2f   :  { %3481 = vmatpush3.bf16.msra.mxu0 %v3480_v42  ;;  %377 = vmatprep.mubr.f32.mxu0 %v69_v49 }
  0x30   :  { %308 = vmatmul.mubr.f32.vlgmr.msra.gmra.mrb[0].mxu1 %v66_v43  ;;  %3483 = vmatprep.subr.bf16.mxu0 %v3482_v46 }
  0x33   :  { %3485 = vmatpush3.bf16.msra.mxu0 %v3484_v52 }
  0x34   :  { %3487 = vmatprep.subr.bf16.mxu0 %v3486_v55 }
  0x37   :  { %3489 = vmatpush3.bf16.msra.mxu0 %v3488_v58 }
  0x38   :  { %24 = vsyncpa [#allocation3], 0  ;;  %3491 = vmatprep.subr.bf16.mxu0 %v3490_v61  ;;  %v3494_v63 = vpack.c.bf16 %v159_v60, %v158_v59  ;;  %v142_v0 = vld [vmem:[%s6001_s20 + $0x240] sm:$0xff]  ;;  %v143_v1 = vld [vmem:[%s6001_s20 + $0x248] sm:$0xff]  ;;  %s6003_s22 = sld [smem:[#allocation103_spill]]  ;;  %v5807_v46 = vmov 0.0  }
  0x39   :  { %v160_v2 = vld [vmem:[%s6001_s20 + $0x2d0] sm:$0xff]  ;;  %v161_v3 = vld [vmem:[%s6001_s20 + $0x2d8] sm:$0xff]  ;;  %v3496_v4 = vpack.c.bf16 %v143_v1, %v142_v0  ;;  %v162_v8 = vld [vmem:[%s6001_s20 + $0x2e0] sm:$0xff]  ;;  %561 = vmatprep.mubr.f32.mxu1 %v5807_v46  ;;  %v5809_v47 = vmov 0.0|0.0   ;;  %vm422_vm0 = vcmask 261120   ;;  %vm3805_vm1 = vmmov 0  }
  0x3a   :  { %v3498_v5 = vpack.c.bf16 %v161_v3, %v160_v2  ;;  %v144_v6 = vld [vmem:[%s6001_s20 + $0x250] sm:$0xff]  ;;  %v145_v7 = vld [vmem:[%s6001_s20 + $0x258] sm:$0xff]  ;;  %v163_v9 = vld [vmem:[%s6001_s20 + $0x2e8] sm:$0xff]  ;;  %vm673_vm2 = vcmask 64512   ;;  %vm761_vm3 = vcmask 1040384   ;;  %vm763_vm4 = vcmask 1041408  }
  0x3b   :  { %3493 = vmatpush3.bf16.msra.mxu0 %v3492_v62  ;;  %v3500_v10 = vpack.c.bf16 %v145_v7, %v144_v6  ;;  %v3502_v11 = vpack.c.bf16 %v163_v9, %v162_v8  ;;  %v146_v12 = vld [vmem:[%s6001_s20 + $0x260] sm:$0xff]  ;;  %v147_v13 = vld [vmem:[%s6001_s20 + $0x268] sm:$0xff]  ;;  %v164_v14 = vld [vmem:[%s6001_s20 + $0x2f0] sm:$0xff]  ;;  %vm765_vm5 = vcmask 1042432   ;;  %vm767_vm6 = vcmask 1043456   ;;  %s3807_s24 = smov [#allocation2]  }
  0x3c   :  { %3495 = vmatprep.subr.bf16.mxu0 %v3494_v63  ;;  %v165_v15 = vld [vmem:[%s6001_s20 + $0x2f8] sm:$0xff]  ;;  %v3504_v16 = vpack.c.bf16 %v147_v13, %v146_v12  ;;  %v148_v18 = vld [vmem:[%s6001_s20 + $0x270] sm:$0xff]  ;;  %v68_v21 = vld [vmem:[%s6002_s26 + $0x20] sm:$0xff]  ;;  %vm769_vm7 = vcmask 1044480   ;;  %vm771_vm8 = vcmask 1045504   ;;  %vm773_vm9 = vcmask 1046528  }
  0x3d   :  { %v3506_v17 = vpack.c.bf16 %v165_v15, %v164_v14  ;;  %v149_v19 = vld [vmem:[%s6001_s20 + $0x278] sm:$0xff]  ;;  %s6004_s20 = sld [smem:[#allocation102_spill]]  ;;  %v571_v60 = vld [vmem:[%s5789_s5] sm:$0xff]  ;;  %v572_v61 = vld [vmem:[%s5789_s5 + $0x8] sm:$0xff]  ;;  %s2944_s25 = sshll.u32 %s3807_s24, 4  ;;  %vm2936_vm10 = vcmask 132096   ;;  %s2945_s25 = int_to_ptr.vmem [resolvable:$true] %s2944_s25 }
  0x3e   :  { %v3508_v20 = vpack.c.bf16 %v149_v19, %v148_v18  ;;  %v385_v22 = vld [vmem:[%s6003_s22 + $0x8] sm:$0xff]  ;;  %v387_v24 = vld [vmem:[%s6003_s22 + $0x18] sm:$0xff]  ;;  %v384_v27 = vld [vmem:[%s6003_s22] sm:$0xff]  ;;  %v3527_v63 = vpack.c.bf16 %v572_v61, %v571_v60  ;;  %p3784_p1 = scmp.lt.s32.totalorder %s2945_s25, %s2945_s25 }
  0x3f   :  { %3497 = vmatpush3.bf16.msra.mxu0 %v3496_v4  ;;  %v389_v23 = vld [vmem:[%s6003_s22 + $0x28] sm:$0xff]  ;;  %v391_v26 = vld [vmem:[%s6003_s22 + $0x38] sm:$0xff]  ;;  %v388_v28 = vld [vmem:[%s6003_s22 + $0x20] sm:$0xff] }
  0x40   :  { %3499 = vmatprep.subr.bf16.mxu0 %v3498_v5  ;;  %v3510_v25 = vpack.c.bf16 %v389_v23, %v385_v22  ;;  %v3518_v29 = vpack.c.bf16 %v391_v26, %v387_v24  ;;  %v3512_v30 = vpack.c.bf16 %v388_v28, %v384_v27  ;;  %v386_v31 = vld [vmem:[%s6003_s22 + $0x10] sm:$0xff]  ;;  %v393_v34 = vld [vmem:[%s6003_s22 + $0x48] sm:$0xff]  ;;  %v395_v36 = vld [vmem:[%s6003_s22 + $0x58] sm:$0xff]  ;;  %v402_v22 = vlaneseq }
  0x41   :  { %v390_v32 = vld [vmem:[%s6003_s22 + $0x30] sm:$0xff]  ;;  %v397_v35 = vld [vmem:[%s6003_s22 + $0x68] sm:$0xff]  ;;  %v399_v38 = vld [vmem:[%s6003_s22 + $0x78] sm:$0xff] }
  0x42   :  { %v3520_v33 = vpack.c.bf16 %v390_v32, %v386_v31  ;;  %3519 = vmatprep.subr.bf16.mxu1 %v3518_v29  ;;  %v3514_v37 = vpack.c.bf16 %v397_v35, %v393_v34  ;;  %v392_v39 = vld [vmem:[%s6003_s22 + $0x40] sm:$0xff]  ;;  %v3522_v41 = vpack.c.bf16 %v399_v38, %v395_v36  ;;  %v394_v43 = vld [vmem:[%s6003_s22 + $0x50] sm:$0xff]  ;;  %v574_v2 = vld [vmem:[%s5789_s5 + $0x18] sm:$0xff]  ;;  %v403_v23 = vshrl.u32 %v402_v22, 7 }
  0x43   :  { %3501 = vmatpush3.bf16.msra.mxu0 %v3500_v10  ;;  %v396_v40 = vld [vmem:[%s6003_s22 + $0x60] sm:$0xff]  ;;  %v398_v44 = vld [vmem:[%s6003_s22 + $0x70] sm:$0xff]  ;;  %v576_v5 = vld [vmem:[%s5789_s5 + $0x28] sm:$0xff] }
  0x44   :  { %3503 = vmatprep.subr.bf16.mxu0 %v3502_v11  ;;  %3521 = vmatpush1.bf16.msra.mxu1 %v3520_v33  ;;  %v3516_v42 = vpack.c.bf16 %v396_v40, %v392_v39  ;;  %v3524_v45 = vpack.c.bf16 %v398_v44, %v394_v43  ;;  %v2952_v49 = vld [vmem:[%s6004_s20] ss:$0 sm:$0xff]  ;;  %v573_v1 = vld [vmem:[%s5789_s5 + $0x10] sm:$0xff]  ;;  %v578_v8 = vld [vmem:[%s5789_s5 + $0x38] sm:$0xff]  ;;  %v4328_v24 = vsub.s32 0, %v403_v23  ;;  %v4333_v26 = vsub.s32 1, %v403_v23 }
  0x45   :  { %3523 = vmatprep.subr.bf16.mxu1 %v3522_v41  ;;  %v3530_v3 = vpack.c.bf16 %v574_v2, %v573_v1  ;;  %v575_v4 = vld [vmem:[%s5789_s5 + $0x20] sm:$0xff]  ;;  %v577_v7 = vld [vmem:[%s5789_s5 + $0x30] sm:$0xff]  ;;  %v580_v11 = vld [vmem:[%s5789_s5 + $0x48] sm:$0xff]  ;;  %v4335_v27 = vsub.s32 2, %v403_v23 }
  0x46   :  { %v3533_v6 = vpack.c.bf16 %v576_v5, %v575_v4  ;;  %v3536_v9 = vpack.c.bf16 %v578_v8, %v577_v7  ;;  %v579_v10 = vld [vmem:[%s5789_s5 + $0x40] sm:$0xff]  ;;  %v581_v13 = vld [vmem:[%s5789_s5 + $0x50] sm:$0xff]  ;;  %v582_v14 = vld [vmem:[%s5789_s5 + $0x58] sm:$0xff]  ;;  %6005 = vst [vmem:[#allocation5_spill] sm:$0xff] %v4328_v24 }
  0x47   :  { %3505 = vmatpush3.bf16.msra.mxu0 %v3504_v16  ;;  %v3539_v12 = vpack.c.bf16 %v580_v11, %v579_v10  ;;  %v3542_v15 = vpack.c.bf16 %v582_v14, %v581_v13  ;;  %v583_v16 = vld [vmem:[%s5789_s5 + $0x60] sm:$0xff]  ;;  %v585_v19 = vld [vmem:[%s5789_s5 + $0x70] sm:$0xff]  ;;  %6006 = vst [vmem:[#allocation6_spill] sm:$0xff] %v4333_v26  ;;  %6007 = vst [vmem:[#allocation7_spill] sm:$0xff] %v4335_v27 }
  0x48   :  { %3507 = vmatprep.subr.bf16.mxu0 %v3506_v17  ;;  %3525 = vmatpush1.bf16.msra.mxu1 %v3524_v45  ;;  %v584_v17 = vld [vmem:[%s5789_s5 + $0x68] sm:$0xff]  ;;  %v665_v44 = vld [vmem:[%s5791_s7] sm:$0xff] }
  0x49   :  { %3526 = vmatprep.subr.bf16.mxu1 %v5809_v47  ;;  %v3545_v18 = vpack.c.bf16 %v584_v17, %v583_v16  ;;  %v3605_v45 = vld [vmem:[%s5793_s9 + $0x4] ss:$16 sps:$4 sm:$0xff]   ;;  %v3603_v60 = vld [vmem:[%s5793_s9] ss:$16 sps:$4 sm:$0xff]   ;;  %v3632_v5 = vld [vmem:[%s5793_s9 + $0x8c] ss:$16 sps:$4 sm:$0xff]  }
  0x4a   :  { %v3615_v1 = vld [vmem:[%s5793_s9 + $0x40] ss:$16 sps:$4 sm:$0xff]   ;;  %v3623_v2 = vld [vmem:[%s5793_s9 + $0x64] ss:$16 sps:$4 sm:$0xff]   ;;  %v3630_v7 = vld [vmem:[%s5793_s9 + $0x88] ss:$16 sps:$4 sm:$0xff]  }
  0x4b   :  { %3509 = vmatpush3.bf16.msra.mxu0 %v3508_v20  ;;  %v586_v20 = vld [vmem:[%s5789_s5 + $0x78] sm:$0xff]  ;;  %v3629_v4 = vld [vmem:[%s5793_s9 + $0x84] ss:$16 sps:$4 sm:$0xff]   ;;  %v3633_v10 = vld [vmem:[%s5793_s9 + $0xa0] ss:$16 sps:$4 sm:$0xff]  }
  0x4c   :  { %3511 = vmatprep.subr.bf16.mxu0 %v3510_v25  ;;  %v400_v25 = vld [vmem:[%s5788_s4] sm:$0xf]  ;;  %v3635_v8 = vld [vmem:[%s5793_s9 + $0xa4] ss:$16 sps:$4 sm:$0xff]   ;;  %v3636_v11 = vld [vmem:[%s5793_s9 + $0xa8] ss:$16 sps:$4 sm:$0xff]  }
  0x4d   :  { %v405_v28 = vrot.slane %v400_v25, %v4328_v24  ;;  %v409_v29 = vrot.slane %v400_v25, %v4333_v26  ;;  %v413_v32 = vrot.slane %v400_v25, %v4335_v27  ;;  %v3644_v13 = vld [vmem:[%s5793_s9 + $0xcc] ss:$16 sps:$4 sm:$0xff]   ;;  %v3639_v14 = vld [vmem:[%s5793_s9 + $0xc0] ss:$16 sps:$4 sm:$0xff]   ;;  %v3647_v16 = vld [vmem:[%s5793_s9 + $0xe4] ss:$16 sps:$4 sm:$0xff]  }
  0x4e   :  { %378 = vmatmul.mubr.f32.vlgmr.msra.gmra.mrb[2].mxu0 %v68_v21  ;;  %v3548_v21 = vpack.c.bf16 %v586_v20, %v585_v19  ;;  %v3650_v17 = vld [vmem:[%s5793_s9 + $0xec] ss:$16 sps:$4 sm:$0xff]   ;;  %v3645_v19 = vld [vmem:[%s5793_s9 + $0xe0] ss:$16 sps:$4 sm:$0xff]   ;;  %v3648_v20 = vld [vmem:[%s5793_s9 + $0xe8] ss:$16 sps:$4 sm:$0xff]  }
  0x4f   :  { %3513 = vmatpush1.bf16.msra.mxu0 %v3512_v30  ;;  %490 = vmatprep.mubr.f32.mxu0 %v5807_v46  ;;  %v4339_v30 = vsub.s32 3, %v403_v23  ;;  %v1076_v22 = vld [vmem:[%s5795_s11 + $0x20] sm:$0xff]  ;;  %v1073_v23 = vld [vmem:[%s5795_s11 + $0x8] sm:$0xff] }
  0x50   :  { %3515 = vmatprep.subr.bf16.mxu0 %v3514_v37 }
  0x51   :  { %6008 = vst [vmem:[#allocation8_spill] sm:$0xff] %v4339_v30  ;;  %v417_v38 = vrot.slane %v400_v25, %v4339_v30 }
  0x53   :  { %3517 = vmatpush1.bf16.msra.mxu0 %v3516_v42 }
  0x54   :  { %3339 = vmatprep.subr.mxu0 %v5807_v46 }
 0x101   :  { %v3178_v48 = vpop.f32.mrb[0].mxu0 }
 0x102   :  { %v3179_v50 = vpop.f32.mrb[1].mxu0 }
 0x103   :  { %v3213_v51 = vpop.f32.mrb[0].mxu1  ;;  %v3180_v52 = vadd.f32 %v3179_v50, %v3178_v48  ;;  %v3606_v48 = vld [vmem:[%s5793_s9 + $0x8] ss:$16 sps:$4 sm:$0xff]   ;;  %v3614_v50 = vld [vmem:[%s5793_s9 + $0x2c] ss:$16 sps:$4 sm:$0xff]  }
 0x104   :  { %v3214_v53 = vpop.f32.mrb[1].mxu1 }
 0x105   :  { %v3215_v54 = vadd.f32 %v3214_v53, %v3213_v51  ;;  %v240_v55 = vadd.f32 %v3180_v52, %v2952_v49  ;;  %v3608_v49 = vld [vmem:[%s5793_s9 + $0xc] ss:$16 sps:$4 sm:$0xff]   ;;  %v3612_v51 = vld [vmem:[%s5793_s9 + $0x28] ss:$16 sps:$4 sm:$0xff]  }
 0x106   :  { %v3620_v52 = vld [vmem:[%s5793_s9 + $0x4c] ss:$16 sps:$4 sm:$0xff]   ;;  %v3618_v53 = vld [vmem:[%s5793_s9 + $0x48] ss:$16 sps:$4 sm:$0xff]  }
 0x107   :  { %v310_v56 = vadd.f32 %v3215_v54, %v240_v55  ;;  %v3626_v54 = vld [vmem:[%s5793_s9 + $0x6c] ss:$16 sps:$4 sm:$0xff]   ;;  %v3624_v55 = vld [vmem:[%s5793_s9 + $0x68] ss:$16 sps:$4 sm:$0xff]  }
 0x121   :  { %v3248_v57 = vpop.f32.mrb[2].mxu0 }
 0x122   :  { %v3249_v58 = vpop.f32.mrb[3].mxu0 }
 0x123   :  { %v3250_v59 = vadd.f32 %v3249_v58, %v3248_v57 }
 0x125   :  { %v380_v62 = vadd.f32 %v3250_v59, %v310_v56  ;;  %v2955_v56 = vld [vmem:[%s5790_s6] ss:$0 sm:$0xff] }
 0x127   :  { %v383_v0 = vmax.f32 %v380_v62, 0.0  ;;  %v3611_v62 = vld [vmem:[%s5793_s9 + $0x24] ss:$16 sps:$4 sm:$0xff]  }
 0x129   :  { %2953 = vmatmul.mubr.msk.f32.vlgmr.msra.gmra.mrb[4].mxu0 %vm422_vm0, %v383_v0  ;;  %2954 = vmatmul.mubr.msk.f32.vlgmr.msra.gmra.mrb[2].mxu1 %vm422_vm0, %v383_v0  ;;  %v3617_v0 = vld [vmem:[%s5793_s9 + $0x44] ss:$16 sps:$4 sm:$0xff]  }
 0x12a   :  { %3528 = vmatpush3.bf16.msra.mxu1 %v3527_v63  ;;  %3336 = vmatprep.mubr.msk.f32.mxu1 %vm3805_vm1, %v5807_v46  ;;  %v3609_v63 = vld [vmem:[%s5793_s9 + $0x20] ss:$16 sps:$4 sm:$0xff]  }
 0x12b   :  { %3529 = vmatprep.subr.bf16.mxu1 %v5809_v47  ;;  %3341 = vmatprep.mubr.msk.f32.mxu0 %vm3805_vm1, %v5807_v46  ;;  %v1184_v46 = vld [vmem:[%s5795_s11 + $0x380] sm:$0xff] }
 0x12c   :  { %3340 = vmatpush3.msra.mxu0 %v665_v44 }
 0x12d   :  { %990 = vmatprep.subr.bf16.mxu0 %v3605_v45 }
 0x12e   :  { %3531 = vmatpush3.bf16.msra.mxu1 %v3530_v3  ;;  %v3621_v3 = vld [vmem:[%s5793_s9 + $0x60] ss:$16 sps:$4 sm:$0xff]  }
 0x12f   :  { %3532 = vmatprep.subr.bf16.mxu1 %v5809_v47 }
 0x132   :  { %3534 = vmatpush3.bf16.msra.mxu1 %v3533_v6  ;;  %v3627_v6 = vld [vmem:[%s5793_s9 + $0x80] ss:$16 sps:$4 sm:$0xff]  }
 0x133   :  { %3535 = vmatprep.subr.bf16.mxu1 %v5809_v47 }
 0x136   :  { %3537 = vmatpush3.bf16.msra.mxu1 %v3536_v9  ;;  %v3638_v9 = vld [vmem:[%s5793_s9 + $0xac] ss:$16 sps:$4 sm:$0xff]  }
 0x137   :  { %3538 = vmatprep.subr.bf16.mxu1 %v5809_v47 }
 0x13a   :  { %3540 = vmatpush3.bf16.msra.mxu1 %v3539_v12  ;;  %v3641_v12 = vld [vmem:[%s5793_s9 + $0xc4] ss:$16 sps:$4 sm:$0xff]  }
 0x13b   :  { %3541 = vmatprep.subr.bf16.mxu1 %v5809_v47 }
 0x13e   :  { %3543 = vmatpush3.bf16.msra.mxu1 %v3542_v15  ;;  %v3642_v15 = vld [vmem:[%s5793_s9 + $0xc8] ss:$16 sps:$4 sm:$0xff]  }
 0x13f   :  { %3544 = vmatprep.subr.bf16.mxu1 %v5809_v47 }
 0x142   :  { %3546 = vmatpush3.bf16.msra.mxu1 %v3545_v18  ;;  %v3806_v18 = vmov 0  }
 0x143   :  { %3547 = vmatprep.subr.bf16.mxu1 %v5809_v47 }
 0x146   :  { %3549 = vmatpush3.bf16.msra.mxu1 %v3548_v21  ;;  %v1072_v21 = vld [vmem:[%s5795_s11] sm:$0xff] }
 0x147   :  { %1031 = vmatprep.subr.bf16.mxu1 %v3608_v49  ;;  %v4454_v25 = vcombine.low %v1072_v21, %v1076_v22 }
 0x1fc   :  { %v492_v31 = vpop.f32.mrb[4].mxu0  ;;  %v563_v33 = vpop.f32.mrb[2].mxu1 }
 0x1fd   :  { %v493_v34 = vadd.f32 %v492_v31, %v405_v28  ;;  %v494_v35 = vpop.f32.mrb[5].mxu0  ;;  %v565_v36 = vpop.f32.mrb[3].mxu1  ;;  %v564_v39 = vadd.f32 %v563_v33, %v413_v32  ;;  %v4456_v28 = vcombine.high %v1072_v21, %v1076_v22  ;;  %v2956_v33 = vld [vmem:[%s5792_s8] ss:$0 sm:$0xff] }
 0x1fe   :  { %v495_v37 = vadd.f32 %v494_v35, %v409_v29  ;;  %v566_v41 = vadd.f32 %v565_v36, %v417_v38  ;;  %v1077_v29 = vld [vmem:[%s5795_s11 + $0x28] sm:$0xff]  ;;  %v1112_v22 = vld [vmem:[%s5795_s11 + $0x140] sm:$0xff] }
 0x1ff   :  { %v4461_v31 = vcombine.low %v1073_v23, %v1077_v29  ;;  %v4463_v32 = vcombine.high %v1073_v23, %v1077_v29  ;;  %v1116_v23 = vld [vmem:[%s5795_s11 + $0x160] sm:$0xff]  ;;  %v1113_v29 = vld [vmem:[%s5795_s11 + $0x148] sm:$0xff] }
 0x200   :  { %v568_v40 = vmax.f32 %v493_v34, %v495_v37 }
 0x202   :  { %v569_v42 = vmax.f32 %v568_v40, %v564_v39 }
 0x204   :  { %v570_v43 = vmax.f32 %v569_v42, %v566_v41 }
 0x206   :  { %3337 = vmatmul.mubr.f32.vlgmr.msra.gmra.mrb[4].mxu1 %v570_v43 }
 0x207   :  { %1032 = vmatpush1.bf16.msra.mxu1 %v3606_v48  ;;  %1063 = vmatprep.mubr.bf16.mxu1 %v3806_v18 }
 0x208   :  { %1033 = vmatprep.subr.bf16.mxu1 %v3614_v50  ;;  %v1080_v50 = vld [vmem:[%s5795_s11 + $0x40] sm:$0xff] }
 0x20b   :  { %1034 = vmatpush1.bf16.msra.mxu1 %v3612_v51 }
 0x20c   :  { %1035 = vmatprep.subr.bf16.mxu1 %v3620_v52  ;;  %v1084_v52 = vld [vmem:[%s5795_s11 + $0x60] sm:$0xff] }
 0x20f   :  { %1036 = vmatpush1.bf16.msra.mxu1 %v3618_v53  ;;  %v1081_v53 = vld [vmem:[%s5795_s11 + $0x48] sm:$0xff] }
 0x210   :  { %1037 = vmatprep.subr.bf16.mxu1 %v3626_v54  ;;  %v1085_v54 = vld [vmem:[%s5795_s11 + $0x68] sm:$0xff] }
 0x213   :  { %1038 = vmatpush1.bf16.msra.mxu1 %v3624_v55 }
 0x214   :  { %1039 = vmatprep.subr.bf16.mxu1 %v3632_v5  ;;  %v1100_v5 = vld [vmem:[%s5795_s11 + $0xe0] sm:$0xff] }
 0x217   :  { %1040 = vmatpush1.bf16.msra.mxu1 %v3630_v7  ;;  %v1101_v7 = vld [vmem:[%s5795_s11 + $0xe8] sm:$0xff] }
 0x218   :  { %1041 = vmatprep.subr.bf16.mxu1 %v3638_v9 }
 0x21b   :  { %1042 = vmatpush1.bf16.msra.mxu1 %v3636_v11 }
 0x21c   :  { %1043 = vmatprep.subr.bf16.mxu1 %v3644_v13 }
 0x21f   :  { %1044 = vmatpush1.bf16.msra.mxu1 %v3642_v15  ;;  %v1108_v15 = vld [vmem:[%s5795_s11 + $0x120] sm:$0xff] }
 0x220   :  { %1045 = vmatprep.subr.bf16.mxu1 %v3650_v17 }
 0x223   :  { %1046 = vmatpush1.bf16.msra.mxu1 %v3648_v20 }
 0x224   :  { %1908 = vmatprep.subr.bf16.mxu1 %v4463_v32 }
 0x2d9   :  { %v660_v57 = vpop.f32.mrb[4].mxu1 }
 0x2da   :  { %v661_v58 = vadd.f32 %v2955_v56, %v660_v57  ;;  %v3338_v59 = vpop.f32.mrb[5].mxu1 }
 0x2db   :  { %v4484_v59 = vcombine.high %v1081_v53, %v1085_v54 }
 0x2dc   :  { %v664_v61 = vmax.f32 %v661_v58, 0.0  ;;  %v4482_v58 = vcombine.high %v1080_v50, %v1084_v52 }
 0x2de   :  { %3342 = vmatmul.mubr.msk.f32.vlgmr.msra.gmra.mrb[6].mxu0 %vm673_vm2, %v664_v61  ;;  %v1092_v61 = vld [vmem:[%s5795_s11 + $0xa0] sm:$0xff] }
 0x2df   :  { %991 = vmatpush1.bf16.msra.mxu0 %v3603_v60  ;;  %1022 = vmatprep.mubr.bf16.mxu0 %v3806_v18  ;;  %v1088_v60 = vld [vmem:[%s5795_s11 + $0x80] sm:$0xff]  ;;  %v1109_v18 = vld [vmem:[%s5795_s11 + $0x128] sm:$0xff] }
 0x2e0   :  { %992 = vmatprep.subr.bf16.mxu0 %v3611_v62  ;;  %v1089_v62 = vld [vmem:[%s5795_s11 + $0x88] sm:$0xff] }
 0x2e3   :  { %993 = vmatpush1.bf16.msra.mxu0 %v3609_v63  ;;  %v1093_v63 = vld [vmem:[%s5795_s11 + $0xa8] sm:$0xff] }
 0x2e4   :  { %994 = vmatprep.subr.bf16.mxu0 %v3617_v0  ;;  %v4500_v0 = vcombine.low %v1080_v50, %v1084_v52  ;;  %v4528_v9 = vcombine.low %v1089_v62, %v1093_v63  ;;  %v1129_v50 = vld [vmem:[%s5795_s11 + $0x1c8] sm:$0xff] }
 0x2e5   :  { %v1133_v52 = vld [vmem:[%s5795_s11 + $0x1e8] sm:$0xff] }
 0x2e7   :  { %995 = vmatpush1.bf16.msra.mxu0 %v3615_v1  ;;  %v4502_v1 = vcombine.low %v1081_v53, %v1085_v54  ;;  %v4634_v54 = vcombine.low %v1129_v50, %v1133_v52 }
 0x2e8   :  { %996 = vmatprep.subr.bf16.mxu0 %v3623_v2  ;;  %v4506_v2 = vcombine.high %v1088_v60, %v1092_v61 }
 0x2eb   :  { %997 = vmatpush1.bf16.msra.mxu0 %v3621_v3  ;;  %v4508_v3 = vcombine.high %v1089_v62, %v1093_v63  ;;  %v1141_v62 = vld [vmem:[%s5795_s11 + $0x228] sm:$0xff] }
 0x2ec   :  { %998 = vmatprep.subr.bf16.mxu0 %v3629_v4  ;;  %v1096_v4 = vld [vmem:[%s5795_s11 + $0xc0] sm:$0xff] }
 0x2ef   :  { %999 = vmatpush1.bf16.msra.mxu0 %v3627_v6  ;;  %v1097_v6 = vld [vmem:[%s5795_s11 + $0xc8] sm:$0xff] }
 0x2f0   :  { %1000 = vmatprep.subr.bf16.mxu0 %v3635_v8  ;;  %v4526_v8 = vcombine.low %v1088_v60, %v1092_v61  ;;  %v4534_v11 = vcombine.high %v1097_v6, %v1101_v7  ;;  %v4540_v13 = vcombine.low %v1097_v6, %v1101_v7  ;;  %v1137_v60 = vld [vmem:[%s5795_s11 + $0x208] sm:$0xff]  ;;  %v1144_v6 = vld [vmem:[%s5795_s11 + $0x240] sm:$0xff] }
 0x2f1   :  { %v1148_v7 = vld [vmem:[%s5795_s11 + $0x260] sm:$0xff] }
 0x2f3   :  { %1001 = vmatpush1.bf16.msra.mxu0 %v3633_v10  ;;  %v4532_v10 = vcombine.high %v1096_v4, %v1100_v5 }
 0x2f4   :  { %1002 = vmatprep.subr.bf16.mxu0 %v3641_v12  ;;  %v4538_v12 = vcombine.low %v1096_v4, %v1100_v5  ;;  %v4658_v4 = vcombine.low %v1137_v60, %v1141_v62  ;;  %v4660_v5 = vcombine.high %v1137_v60, %v1141_v62  ;;  %v1165_v60 = vld [vmem:[%s5795_s11 + $0x2e8] sm:$0xff] }
 0x2f6   :  { %6010 = vst [vmem:[#allocation10_spill] sm:$0xff] %v4658_v4  ;;  %6011 = vst [vmem:[#allocation11_spill] sm:$0xff] %v4660_v5 }
 0x2f7   :  { %1003 = vmatpush1.bf16.msra.mxu0 %v3639_v14  ;;  %v1104_v14 = vld [vmem:[%s5795_s11 + $0x100] sm:$0xff] }
 0x2f8   :  { %1004 = vmatprep.subr.bf16.mxu0 %v3647_v16  ;;  %v1105_v16 = vld [vmem:[%s5795_s11 + $0x108] sm:$0xff]  ;;  %v4555_v17 = vcombine.high %v1104_v14, %v1108_v15 }
 0x2f9   :  { %v4562_v20 = vcombine.low %v1105_v16, %v1109_v18  ;;  %v4564_v21 = vcombine.high %v1105_v16, %v1109_v18  ;;  %v1149_v16 = vld [vmem:[%s5795_s11 + $0x268] sm:$0xff]  ;;  %v4680_v18 = vcombine.low %v1144_v6, %v1148_v7 }
 0x2fb   :  { %1005 = vmatpush1.bf16.msra.mxu0 %v3645_v19  ;;  %v4560_v19 = vcombine.low %v1104_v14, %v1108_v15  ;;  %v1145_v14 = vld [vmem:[%s5795_s11 + $0x248] sm:$0xff]  ;;  %v4675_v15 = vcombine.high %v1144_v6, %v1148_v7  ;;  %6013 = vst [vmem:[#allocation13_spill] sm:$0xff] %v4680_v18 }
 0x2fc   :  { %1867 = vmatprep.subr.bf16.mxu0 %v4456_v28 }
 0x2fd   :  { %6012 = vst [vmem:[#allocation12_spill] sm:$0xff] %v4675_v15 }
 0x3b1   :  { %v743_v34 = vpop.f32.mrb[6].mxu0 }
 0x3b2   :  { %v744_v35 = vadd.f32 %v2956_v33, %v743_v34  ;;  %v3343_v36 = vpop.f32.mrb[7].mxu0  ;;  %v4579_v33 = vcombine.high %v1112_v22, %v1116_v23  ;;  %v1117_v34 = vld [vmem:[%s5795_s11 + $0x168] sm:$0xff] }
 0x3b3   :  { %v4586_v36 = vcombine.low %v1113_v29, %v1117_v34 }
 0x3b4   :  { %v747_v37 = vmax.f32 %v744_v35, 0.0  ;;  %v4584_v35 = vcombine.low %v1112_v22, %v1116_v23  ;;  %v4682_v22 = vcombine.low %v1145_v14, %v1149_v16  ;;  %v4684_v23 = vcombine.high %v1145_v14, %v1149_v16  ;;  %v1168_v14 = vld [vmem:[%s5795_s11 + $0x300] sm:$0xff] }
 0x3b5   :  { %v1172_v16 = vld [vmem:[%s5795_s11 + $0x320] sm:$0xff] }
 0x3b6   :  { %v749_v38 = vrot.slane %v747_v37, 3  ;;  %v751_v39 = vrot.slane %v747_v37, 7  ;;  %v753_v40 = vrot.slane %v747_v37, 2  ;;  %v755_v42 = vrot.slane %v747_v37, 6  ;;  %6014 = vst [vmem:[#allocation14_spill] sm:$0xff] %v4682_v22  ;;  %6015 = vst [vmem:[#allocation15_spill] sm:$0xff] %v4684_v23 }
 0x3b7   :  { %v757_v44 = vrot.slane %v747_v37, 1  ;;  %v759_v48 = vrot.slane %v747_v37, 5 }
 0x3b8   :  { %v762_v41 = vsel %vm761_vm3, %v747_v37, %v749_v38  ;;  %v1120_v38 = vld [vmem:[%s5795_s11 + $0x180] sm:$0xff] }
 0x3b9   :  { %v764_v43 = vsel %vm763_vm4, %v762_v41, %v751_v39  ;;  %v1124_v39 = vld [vmem:[%s5795_s11 + $0x1a0] sm:$0xff] }
 0x3ba   :  { %v766_v45 = vsel %vm765_vm5, %v764_v43, %v753_v40  ;;  %v1121_v40 = vld [vmem:[%s5795_s11 + $0x188] sm:$0xff]  ;;  %v4603_v41 = vcombine.high %v1120_v38, %v1124_v39  ;;  %v4608_v43 = vcombine.low %v1120_v38, %v1124_v39 }
 0x3bb   :  { %v768_v49 = vsel %vm767_vm6, %v766_v45, %v755_v42  ;;  %v1125_v42 = vld [vmem:[%s5795_s11 + $0x1a8] sm:$0xff] }
 0x3bc   :  { %v770_v51 = vsel %vm769_vm7, %v768_v49, %v757_v44  ;;  %v4610_v44 = vcombine.low %v1121_v40, %v1125_v42  ;;  %v4612_v45 = vcombine.high %v1121_v40, %v1125_v42  ;;  %v1132_v49 = vld [vmem:[%s5795_s11 + $0x1e0] sm:$0xff]  ;;  %v1153_v38 = vld [vmem:[%s5795_s11 + $0x288] sm:$0xff] }
 0x3bd   :  { %v772_v55 = vsel %vm771_vm8, %v770_v51, %v759_v48  ;;  %v1128_v48 = vld [vmem:[%s5795_s11 + $0x1c0] sm:$0xff]  ;;  %v1157_v40 = vld [vmem:[%s5795_s11 + $0x2a8] sm:$0xff] }
 0x3be   :  { %v774_v56 = vsel %vm773_vm9, %v772_v55, %v747_v37  ;;  %v4588_v37 = vcombine.high %v1113_v29, %v1117_v34  ;;  %v4627_v51 = vcombine.high %v1128_v48, %v1132_v49  ;;  %v4632_v53 = vcombine.low %v1128_v48, %v1132_v49  ;;  %v1152_v29 = vld [vmem:[%s5795_s11 + $0x280] sm:$0xff] }
 0x3bf   :  { %v775_v57 = vpack.c.bf16 %v774_v56, %v774_v56  ;;  %v4636_v55 = vcombine.high %v1129_v50, %v1133_v52  ;;  %v1136_v56 = vld [vmem:[%s5795_s11 + $0x200] sm:$0xff]  ;;  %v4706_v48 = vcombine.low %v1153_v38, %v1157_v40  ;;  %v4708_v49 = vcombine.high %v1153_v38, %v1157_v40  ;;  %v1173_v38 = vld [vmem:[%s5795_s11 + $0x328] sm:$0xff] }
 0x3c0   :  { %v1156_v34 = vld [vmem:[%s5795_s11 + $0x2a0] sm:$0xff]  ;;  %v4752_v40 = vcombine.low %v1168_v14, %v1172_v16 }
 0x3c1   :  { %1023 = vmatmul.mubr.bf16.vlgmr.msra.gmra.mrb[8].mxu0 %v775_v57  ;;  %1064 = vmatmul.mubr.bf16.vlgmr.msra.gmra.mrb[8].mxu1 %v775_v57  ;;  %v1140_v57 = vld [vmem:[%s5795_s11 + $0x220] sm:$0xff]  ;;  %v4699_v39 = vcombine.high %v1152_v29, %v1156_v34  ;;  %v4704_v42 = vcombine.low %v1152_v29, %v1156_v34  ;;  %6018 = vst [vmem:[#allocation18_spill] sm:$0xff] %v4706_v48  ;;  %6019 = vst [vmem:[#allocation19_spill] sm:$0xff] %v4708_v49  ;;  %v1169_v29 = vld [vmem:[%s5795_s11 + $0x308] sm:$0xff] }
 0x3c2   :  { %1868 = vmatpush1.bf16.msra.mxu0 %v4454_v25  ;;  %1909 = vmatpush1.bf16.msra.mxu1 %v4461_v31  ;;  %v4651_v61 = vcombine.high %v1136_v56, %v1140_v57  ;;  %v4656_v63 = vcombine.low %v1136_v56, %v1140_v57  ;;  %v1160_v50 = vld [vmem:[%s5795_s11 + $0x2c0] sm:$0xff]  ;;  %v1161_v56 = vld [vmem:[%s5795_s11 + $0x2c8] sm:$0xff]  ;;  %v4747_v34 = vcombine.high %v1168_v14, %v1172_v16 }
 0x3c3   :  { %1869 = vmatprep.subr.bf16.mxu0 %v4482_v58  ;;  %1910 = vmatprep.subr.bf16.mxu1 %v4484_v59  ;;  %6016 = vst [vmem:[#allocation16_spill] sm:$0xff] %v4699_v39  ;;  %6017 = vst [vmem:[#allocation17_spill] sm:$0xff] %v4704_v42  ;;  %v1164_v52 = vld [vmem:[%s5795_s11 + $0x2e0] sm:$0xff]  ;;  %v4730_v6 = vcombine.low %v1161_v56, %v1165_v60  ;;  %v4732_v7 = vcombine.high %v1161_v56, %v1165_v60  ;;  %v1177_v14 = vld [vmem:[%s5795_s11 + $0x348] sm:$0xff] }
 0x3c4   :  { %1899 = vmatprep.mubr.bf16.mxu0 %v5809_v47  ;;  %1940 = vmatprep.mubr.bf16.mxu1 %v5809_v47  ;;  %6009 = vst [vmem:[#allocation9_spill] sm:$0xff] %v4656_v63  ;;  %v4723_v57 = vcombine.high %v1160_v50, %v1164_v52  ;;  %v4728_v62 = vcombine.low %v1160_v50, %v1164_v52  ;;  %6024 = vst [vmem:[#allocation24_spill] sm:$0xff] %v4747_v34  ;;  %v1176_v56 = vld [vmem:[%s5795_s11 + $0x340] sm:$0xff] }
 0x3c5   :  { %6022 = vst [vmem:[#allocation22_spill] sm:$0xff] %v4730_v6  ;;  %6023 = vst [vmem:[#allocation23_spill] sm:$0xff] %v4732_v7  ;;  %v4754_v50 = vcombine.low %v1169_v29, %v1173_v38  ;;  %v4756_v52 = vcombine.high %v1169_v29, %v1173_v38  ;;  %v1180_v60 = vld [vmem:[%s5795_s11 + $0x360] sm:$0xff]  ;;  %v1181_v38 = vld [vmem:[%s5795_s11 + $0x368] sm:$0xff] }
 0x3c6   :  { %1870 = vmatpush1.bf16.msra.mxu0 %v4500_v0  ;;  %1911 = vmatpush1.bf16.msra.mxu1 %v4502_v1  ;;  %6020 = vst [vmem:[#allocation20_spill] sm:$0xff] %v4723_v57  ;;  %6021 = vst [vmem:[#allocation21_spill] sm:$0xff] %v4728_v62  ;;  %v4771_v16 = vcombine.low %v1176_v56, %v1180_v60  ;;  %v4773_v29 = vcombine.high %v1176_v56, %v1180_v60  ;;  %v1188_v47 = vld [vmem:[%s5795_s11 + $0x3a0] sm:$0xff]  ;;  %v1185_v56 = vld [vmem:[%s5795_s11 + $0x388] sm:$0xff] }
 0x3c7   :  { %1871 = vmatprep.subr.bf16.mxu0 %v4506_v2  ;;  %1912 = vmatprep.subr.bf16.mxu1 %v4508_v3  ;;  %6025 = vst [vmem:[#allocation25_spill] sm:$0xff] %v4752_v40  ;;  %6026 = vst [vmem:[#allocation26_spill] sm:$0xff] %v4754_v50  ;;  %v1189_v60 = vld [vmem:[%s5795_s11 + $0x3a8] sm:$0xff] }
 0x3c8   :  { %6027 = vst [vmem:[#allocation27_spill] sm:$0xff] %v4756_v52  ;;  %6028 = vst [vmem:[#allocation28_spill] sm:$0xff] %v4771_v16 }
 0x3c9   :  { %6029 = vst [vmem:[#allocation29_spill] sm:$0xff] %v4773_v29 }
 0x3ca   :  { %1872 = vmatpush1.bf16.msra.mxu0 %v4526_v8  ;;  %1913 = vmatpush1.bf16.msra.mxu1 %v4528_v9 }
 0x3cb   :  { %1873 = vmatprep.subr.bf16.mxu0 %v4532_v10  ;;  %1914 = vmatprep.subr.bf16.mxu1 %v4534_v11 }
 0x3ce   :  { %1874 = vmatpush1.bf16.msra.mxu0 %v4538_v12  ;;  %1915 = vmatpush1.bf16.msra.mxu1 %v4540_v13 }
 0x3cf   :  { %1875 = vmatprep.subr.bf16.mxu0 %v4555_v17  ;;  %1916 = vmatprep.subr.bf16.mxu1 %v4564_v21 }
 0x3d2   :  { %1876 = vmatpush1.bf16.msra.mxu0 %v4560_v19  ;;  %1917 = vmatpush1.bf16.msra.mxu1 %v4562_v20 }
 0x3d3   :  { %1877 = vmatprep.subr.bf16.mxu0 %v4579_v33  ;;  %1918 = vmatprep.subr.bf16.mxu1 %v4588_v37 }
 0x3d6   :  { %1878 = vmatpush1.bf16.msra.mxu0 %v4584_v35  ;;  %1919 = vmatpush1.bf16.msra.mxu1 %v4586_v36 }
 0x3d7   :  { %1879 = vmatprep.subr.bf16.mxu0 %v4603_v41  ;;  %1920 = vmatprep.subr.bf16.mxu1 %v4612_v45 }
 0x3da   :  { %1880 = vmatpush1.bf16.msra.mxu0 %v4608_v43  ;;  %1921 = vmatpush1.bf16.msra.mxu1 %v4610_v44 }
 0x3db   :  { %1881 = vmatprep.subr.bf16.mxu0 %v4627_v51  ;;  %1922 = vmatprep.subr.bf16.mxu1 %v4636_v55 }
 0x3de   :  { %1882 = vmatpush1.bf16.msra.mxu0 %v4632_v53  ;;  %1923 = vmatpush1.bf16.msra.mxu1 %v4634_v54 }
 0x3df   :  { %1883 = vmatprep.subr.bf16.mxu0 %v4651_v61  ;;  %1924 = vmatprep.subr.bf16.mxu1 %v4660_v5 }
 0x3e2   :  { %1884 = vmatpush1.bf16.msra.mxu0 %v4656_v63  ;;  %1925 = vmatpush1.bf16.msra.mxu1 %v4658_v4 }
 0x3e3   :  { %1885 = vmatprep.subr.bf16.mxu0 %v4675_v15  ;;  %1926 = vmatprep.subr.bf16.mxu1 %v4684_v23 }
 0x3e6   :  { %1886 = vmatpush1.bf16.msra.mxu0 %v4680_v18  ;;  %1927 = vmatpush1.bf16.msra.mxu1 %v4682_v22 }
 0x3e7   :  { %1887 = vmatprep.subr.bf16.mxu0 %v4699_v39  ;;  %1928 = vmatprep.subr.bf16.mxu1 %v4708_v49 }
 0x3ea   :  { %1888 = vmatpush1.bf16.msra.mxu0 %v4704_v42  ;;  %1929 = vmatpush1.bf16.msra.mxu1 %v4706_v48 }
 0x3eb   :  { %1889 = vmatprep.subr.bf16.mxu0 %v4723_v57  ;;  %1930 = vmatprep.subr.bf16.mxu1 %v4732_v7  ;;  %v4813_v7 = vcombine.low %v1184_v46, %v1188_v47 }
 0x3ed   :  { %6034 = vst [vmem:[#allocation34_spill] sm:$0xff] %v4813_v7 }
 0x3ee   :  { %1890 = vmatpush1.bf16.msra.mxu0 %v4728_v62  ;;  %1931 = vmatpush1.bf16.msra.mxu1 %v4730_v6  ;;  %v4800_v6 = vcombine.high %v1185_v56, %v1189_v60  ;;  %v1197_v62 = vld [vmem:[%s5795_s11 + $0x3e8] sm:$0xff] }
 0x3ef   :  { %1891 = vmatprep.subr.bf16.mxu0 %v4747_v34  ;;  %1932 = vmatprep.subr.bf16.mxu1 %v4756_v52  ;;  %v4786_v52 = vcombine.high %v1177_v14, %v1181_v38  ;;  %v1192_v34 = vld [vmem:[%s5795_s11 + $0x3c0] sm:$0xff] }
 0x3f0   :  { %6033 = vst [vmem:[#allocation33_spill] sm:$0xff] %v4800_v6 }
 0x3f1   :  { %6031 = vst [vmem:[#allocation31_spill] sm:$0xff] %v4786_v52 }
 0x3f2   :  { %1892 = vmatpush1.bf16.msra.mxu0 %v4752_v40  ;;  %1933 = vmatpush1.bf16.msra.mxu1 %v4754_v50  ;;  %v4784_v40 = vcombine.low %v1177_v14, %v1181_v38  ;;  %v4788_v50 = vcombine.high %v1184_v46, %v1188_v47  ;;  %v1196_v14 = vld [vmem:[%s5795_s11 + $0x3e0] sm:$0xff]  ;;  %v1193_v38 = vld [vmem:[%s5795_s11 + $0x3c8] sm:$0xff]  ;;  %v1078_v46 = vld [vmem:[%s5795_s11 + $0x30] sm:$0xff] }
 0x3f3   :  { %1893 = vmatprep.subr.bf16.mxu0 %v4773_v29  ;;  %1934 = vmatprep.subr.bf16.mxu1 %v4786_v52  ;;  %v4817_v29 = vcombine.low %v1185_v56, %v1189_v60  ;;  %v4819_v57 = vcombine.high %v1192_v34, %v1196_v14  ;;  %v4822_v48 = vcombine.high %v1193_v38, %v1197_v62  ;;  %v1074_v52 = vld [vmem:[%s5795_s11 + $0x10] sm:$0xff]  ;;  %v1075_v47 = vld [vmem:[%s5795_s11 + $0x18] sm:$0xff] }
 0x3f4   :  { %6030 = vst [vmem:[#allocation30_spill] sm:$0xff] %v4784_v40  ;;  %6032 = vst [vmem:[#allocation32_spill] sm:$0xff] %v4788_v50  ;;  %v1079_v56 = vld [vmem:[%s5795_s11 + $0x38] sm:$0xff]  ;;  %v4837_v60 = vcombine.low %v1192_v34, %v1196_v14  ;;  %v4852_v34 = vcombine.low %v1074_v52, %v1078_v46 }
 0x3f5   :  { %6035 = vst [vmem:[#allocation35_spill] sm:$0xff] %v4817_v29  ;;  %6036 = vst [vmem:[#allocation36_spill] sm:$0xff] %v4819_v57  ;;  %v4854_v14 = vcombine.low %v1075_v47, %v1079_v56 }
 0x3f6   :  { %1894 = vmatpush1.bf16.msra.mxu0 %v4771_v16  ;;  %1935 = vmatpush1.bf16.msra.mxu1 %v4784_v40  ;;  %6037 = vst [vmem:[#allocation37_spill] sm:$0xff] %v4822_v48  ;;  %6038 = vst [vmem:[#allocation38_spill] sm:$0xff] %v4837_v60  ;;  %v4846_v40 = vcombine.high %v1075_v47, %v1079_v56 }
 0x3f7   :  { %1895 = vmatprep.subr.bf16.mxu0 %v4788_v50  ;;  %1936 = vmatprep.subr.bf16.mxu1 %v4800_v6  ;;  %v4841_v6 = vcombine.low %v1193_v38, %v1197_v62  ;;  %v4843_v50 = vcombine.high %v1074_v52, %v1078_v46  ;;  %6042 = vst [vmem:[#allocation42_spill] sm:$0xff] %v4852_v34  ;;  %6043 = vst [vmem:[#allocation43_spill] sm:$0xff] %v4854_v14  ;;  %v808_v62 = vld [vmem:[%s5794_s10] sm:$0xf] }
 0x3f8   :  { %6041 = vst [vmem:[#allocation41_spill] sm:$0xff] %v4846_v40  ;;  %v813_v38 = vrot.slane %v808_v62, %v4328_v24  ;;  %v825_v24 = vrot.slane %v808_v62, %v4339_v30 }
 0x3f9   :  { %6039 = vst [vmem:[#allocation39_spill] sm:$0xff] %v4841_v6  ;;  %6040 = vst [vmem:[#allocation40_spill] sm:$0xff] %v4843_v50 }
 0x3fa   :  { %1896 = vmatpush1.bf16.msra.mxu0 %v4813_v7  ;;  %1937 = vmatpush1.bf16.msra.mxu1 %v4817_v29 }
 0x3fb   :  { %1897 = vmatprep.subr.bf16.mxu0 %v4819_v57  ;;  %1938 = vmatprep.subr.bf16.mxu1 %v4822_v48  ;;  %v817_v48 = vrot.slane %v808_v62, %v4333_v26 }
 0x3fe   :  { %1898 = vmatpush1.bf16.msra.mxu0 %v4837_v60  ;;  %1939 = vmatpush1.bf16.msra.mxu1 %v4841_v6 }
 0x3ff   :  { %1949 = vmatprep.subr.bf16.mxu0 %v4843_v50  ;;  %1990 = vmatprep.subr.bf16.mxu1 %v4846_v40 }
 0x494   :  { %v1024_v57 = vpop.f32.mrb[8].mxu0  ;;  %v1065_v60 = vpop.f32.mrb[8].mxu1 }
 0x495   :  { %v4861_v29 = vadd.f32 %v1024_v57, %v813_v38  ;;  %v1026_v6 = vpop.f32.mrb[9].mxu0  ;;  %v1067_v50 = vpop.f32.mrb[9].mxu1  ;;  %v821_v57 = vrot.slane %v808_v62, %v4335_v27 }
 0x496   :  { %v4863_v7 = vadd.f32 %v1026_v6, %v817_v48  ;;  %v1028_v52 = vpop.f32.mrb[10].mxu0  ;;  %v1069_v46 = vpop.f32.mrb[10].mxu1  ;;  %v4868_v26 = vadd.f32 %v1067_v50, %v825_v24 }
 0x497   :  { %6044 = vst [vmem:[#allocation44_spill] sm:$0xff] %v4861_v29  ;;  %v2990_v47 = vmul.f32 -1.442695, %v4861_v29  ;;  %v1029_v56 = vpop.f32.mrb[11].mxu0  ;;  %v1070_v40 = vpop.f32.mrb[11].mxu1  ;;  %v4872_v48 = vadd.f32 %v1065_v60, %v821_v57  ;;  %v1082_v57 = vld [vmem:[%s5795_s11 + $0x50] sm:$0xff] }
 0x498   :  { %6045 = vst [vmem:[#allocation45_spill] sm:$0xff] %v4863_v7  ;;  %v2991_v16 = vmul.f32 -1.442695, %v4863_v7  ;;  %6046 = vst [vmem:[#allocation46_spill] sm:$0xff] %v4868_v26  ;;  %v2992_v38 = vmul.f32 -1.442695, %v4868_v26 }
 0x499   :  { %3651 = vpow2.f32 %v2990_v47  ;;  %6047 = vst [vmem:[#allocation47_spill] sm:$0xff] %v4872_v48 }
 0x49a   :  { %3653 = vpow2.f32 %v2991_v16 }
 0x49b   :  { %3655 = vpow2.f32 %v2992_v38 }
 0x49c   :  { %3657 = vtanh.f32 %v4872_v48  ;;  %v1098_v48 = vld [vmem:[%s5795_s11 + $0xd0] sm:$0xff] }
 0x4a3   :  { %v3652_v6 = vpop.eup %3651 }
 0x4a4   :  { %v3654_v52 = vpop.eup %3653  ;;  %v1204_v46 = vadd.f32 1.0, %v3652_v6  ;;  %v1086_v6 = vld [vmem:[%s5795_s11 + $0x70] sm:$0xff] }
 0x4a5   :  { %v1210_v40 = vadd.f32 1.0, %v3654_v52  ;;  %v3656_v56 = vpop.eup %3655  ;;  %v1083_v52 = vld [vmem:[%s5795_s11 + $0x58] sm:$0xff] }
 0x4a6   :  { %3659 = vrcp.f32 %v1204_v46  ;;  %v3658_v47 = vpop.eup %3657  ;;  %v1217_v30 = vadd.f32 1.0, %v3656_v56  ;;  %v4892_v56 = vcombine.high %v1082_v57, %v1086_v6 }
 0x4a7   :  { %3661 = vrcp.f32 %v1210_v40 }
 0x4a8   :  { %3663 = vrcp.f32 %v1217_v30  ;;  %v1087_v30 = vld [vmem:[%s5795_s11 + $0x78] sm:$0xff]  ;;  %6049 = vst [vmem:[#allocation49_spill] sm:$0xff] %v4892_v56 }
 0x4b0   :  { %v3660_v16 = vpop.eup %3659 }
 0x4b1   :  { %v3662_v24 = vpop.eup %3661  ;;  %v1221_v50 = vmul.f32 %v3660_v16, %v3658_v47  ;;  %v4894_v47 = vcombine.high %v1083_v52, %v1087_v30  ;;  %v1090_v16 = vld [vmem:[%s5795_s11 + $0x90] sm:$0xff] }
 0x4b2   :  { %v1220_v62 = vmul.f32 0.0, %v3662_v24  ;;  %v3664_v60 = vpop.eup %3663  ;;  %v1094_v24 = vld [vmem:[%s5795_s11 + $0xb0] sm:$0xff] }
 0x4b3   :  { %6050 = vst [vmem:[#allocation50_spill] sm:$0xff] %v4894_v47 }
 0x4b4   :  { %v4875_v27 = vadd.f32 %v1221_v50, %v1220_v62  ;;  %v1091_v50 = vld [vmem:[%s5795_s11 + $0x98] sm:$0xff] }
 0x4b5   :  { %v1095_v62 = vld [vmem:[%s5795_s11 + $0xb8] sm:$0xff] }
 0x4b6   :  { %6048 = vst [vmem:[#allocation48_spill] sm:$0xff] %v4875_v27  ;;  %3665 = vtanh.f32 %v4875_v27  ;;  %v4920_v27 = vcombine.high %v1091_v50, %v1095_v62 }
 0x4b8   :  { %6054 = vst [vmem:[#allocation54_spill] sm:$0xff] %v4920_v27 }
 0x4c0   :  { %v3666_v38 = vpop.eup %3665 }
 0x4c1   :  { %v1224_v46 = vmul.f32 %v3666_v38, %v3664_v60  ;;  %v4912_v60 = vcombine.low %v1082_v57, %v1086_v6  ;;  %v4914_v38 = vcombine.low %v1083_v52, %v1087_v30  ;;  %v1099_v57 = vld [vmem:[%s5795_s11 + $0xd8] sm:$0xff]  ;;  %v6055_v52 = vmov 0.0|0.0  }
 0x4c2   :  { %v1103_v6 = vld [vmem:[%s5795_s11 + $0xf8] sm:$0xff]  ;;  %v4938_v30 = vcombine.low %v1090_v16, %v1094_v24 }
 0x4c3   :  { %v4890_v40 = vpack.c.bf16 %v1224_v46, %v1224_v46  ;;  %6051 = vst [vmem:[#allocation51_spill] sm:$0xff] %v4912_v60  ;;  %6052 = vst [vmem:[#allocation52_spill] sm:$0xff] %v4914_v38  ;;  %v4918_v46 = vcombine.high %v1090_v16, %v1094_v24  ;;  %v1107_v16 = vld [vmem:[%s5795_s11 + $0x118] sm:$0xff] }
 0x4c4   :  { %6056 = vst [vmem:[#allocation55_spill] sm:$0xff] %v4938_v30  ;;  %v1111_v24 = vld [vmem:[%s5795_s11 + $0x138] sm:$0xff] }
 0x4c5   :  { %1900 = vmatmul.mubr.bf16.vlgmr.msra.gmra.mrb[12].mxu0 %v4890_v40  ;;  %1941 = vmatmul.mubr.bf16.vlgmr.msra.gmra.mrb[12].mxu1 %v4890_v40  ;;  %6053 = vst [vmem:[#allocation53_spill] sm:$0xff] %v4918_v46 }
 0x4c6   :  { %1950 = vmatpush1.bf16.msra.mxu0 %v4852_v34  ;;  %1991 = vmatpush1.bf16.msra.mxu1 %v4854_v14  ;;  %v1102_v14 = vld [vmem:[%s5795_s11 + $0xf0] sm:$0xff]  ;;  %v4946_v34 = vcombine.high %v1099_v57, %v1103_v6 }
 0x4c7   :  { %1951 = vmatprep.subr.bf16.mxu0 %v4892_v56  ;;  %1992 = vmatprep.subr.bf16.mxu1 %v4894_v47  ;;  %v4940_v47 = vcombine.low %v1091_v50, %v1095_v62  ;;  %v4944_v56 = vcombine.high %v1098_v48, %v1102_v14  ;;  %v4962_v50 = vcombine.low %v1098_v48, %v1102_v14  ;;  %v1115_v14 = vld [vmem:[%s5795_s11 + $0x158] sm:$0xff] }
 0x4c8   :  { %1981 = vmatprep.mubr.bf16.mxu0 %v6055_v52  ;;  %2022 = vmatprep.mubr.bf16.mxu1 %v6055_v52  ;;  %6059 = vst [vmem:[#allocation58_spill] sm:$0xff] %v4946_v34  ;;  %v1106_v52 = vld [vmem:[%s5795_s11 + $0x110] sm:$0xff]  ;;  %v4964_v62 = vcombine.low %v1099_v57, %v1103_v6  ;;  %v1119_v48 = vld [vmem:[%s5795_s11 + $0x178] sm:$0xff]  ;;  %v4988_v6 = vcombine.low %v1107_v16, %v1111_v24 }
 0x4c9   :  { %6057 = vst [vmem:[#allocation56_spill] sm:$0xff] %v4940_v47  ;;  %6058 = vst [vmem:[#allocation57_spill] sm:$0xff] %v4944_v56 }
 0x4ca   :  { %1952 = vmatpush1.bf16.msra.mxu0 %v4912_v60  ;;  %1993 = vmatpush1.bf16.msra.mxu1 %v4914_v38  ;;  %v1110_v38 = vld [vmem:[%s5795_s11 + $0x130] sm:$0xff]  ;;  %6060 = vst [vmem:[#allocation59_spill] sm:$0xff] %v4962_v50  ;;  %6061 = vst [vmem:[#allocation60_spill] sm:$0xff] %v4964_v62 }
 0x4cb   :  { %1953 = vmatprep.subr.bf16.mxu0 %v4918_v46  ;;  %1994 = vmatprep.subr.bf16.mxu1 %v4920_v27  ;;  %v4968_v27 = vcombine.high %v1106_v52, %v1110_v38  ;;  %v4970_v46 = vcombine.high %v1107_v16, %v1111_v24  ;;  %v1114_v60 = vld [vmem:[%s5795_s11 + $0x150] sm:$0xff]  ;;  %v4986_v57 = vcombine.low %v1106_v52, %v1110_v38  ;;  %v1123_v38 = vld [vmem:[%s5795_s11 + $0x198] sm:$0xff] }
 0x4cc   :  { %6065 = vst [vmem:[#allocation64_spill] sm:$0xff] %v4988_v6  ;;  %v1127_v52 = vld [vmem:[%s5795_s11 + $0x1b8] sm:$0xff]  ;;  %v5012_v24 = vcombine.low %v1115_v14, %v1119_v48 }
 0x4cd   :  { %6062 = vst [vmem:[#allocation61_spill] sm:$0xff] %v4968_v27  ;;  %6063 = vst [vmem:[#allocation62_spill] sm:$0xff] %v4970_v46 }
 0x4ce   :  { %1954 = vmatpush1.bf16.msra.mxu0 %v4938_v30  ;;  %1995 = vmatpush1.bf16.msra.mxu1 %v4940_v47  ;;  %v1118_v47 = vld [vmem:[%s5795_s11 + $0x170] sm:$0xff]  ;;  %6064 = vst [vmem:[#allocation63_spill] sm:$0xff] %v4986_v57  ;;  %6069 = vst [vmem:[#allocation68_spill] sm:$0xff] %v5012_v24 }
 0x4cf   :  { %1955 = vmatprep.subr.bf16.mxu0 %v4944_v56  ;;  %1996 = vmatprep.subr.bf16.mxu1 %v4946_v34  ;;  %v4992_v34 = vcombine.high %v1114_v60, %v1118_v47  ;;  %v4994_v56 = vcombine.high %v1115_v14, %v1119_v48  ;;  %v1122_v30 = vld [vmem:[%s5795_s11 + $0x190] sm:$0xff]  ;;  %v5010_v16 = vcombine.low %v1114_v60, %v1118_v47  ;;  %v1131_v47 = vld [vmem:[%s5795_s11 + $0x1d8] sm:$0xff] }
 0x4d0   :  { %v1135_v60 = vld [vmem:[%s5795_s11 + $0x1f8] sm:$0xff]  ;;  %v5036_v48 = vcombine.low %v1123_v38, %v1127_v52 }
 0x4d1   :  { %6066 = vst [vmem:[#allocation65_spill] sm:$0xff] %v4992_v34  ;;  %6067 = vst [vmem:[#allocation66_spill] sm:$0xff] %v4994_v56 }
 0x4d2   :  { %1956 = vmatpush1.bf16.msra.mxu0 %v4962_v50  ;;  %1997 = vmatpush1.bf16.msra.mxu1 %v4964_v62  ;;  %v1126_v62 = vld [vmem:[%s5795_s11 + $0x1b0] sm:$0xff]  ;;  %6068 = vst [vmem:[#allocation67_spill] sm:$0xff] %v5010_v16  ;;  %6073 = vst [vmem:[#allocation72_spill] sm:$0xff] %v5036_v48 }
 0x4d3   :  { %1957 = vmatprep.subr.bf16.mxu0 %v4968_v27  ;;  %1998 = vmatprep.subr.bf16.mxu1 %v4970_v46  ;;  %v5016_v46 = vcombine.high %v1122_v30, %v1126_v62  ;;  %v5018_v27 = vcombine.high %v1123_v38, %v1127_v52  ;;  %v1130_v50 = vld [vmem:[%s5795_s11 + $0x1d0] sm:$0xff]  ;;  %v5034_v14 = vcombine.low %v1122_v30, %v1126_v62  ;;  %v1139_v30 = vld [vmem:[%s5795_s11 + $0x218] sm:$0xff] }
 0x4d4   :  { %v1143_v62 = vld [vmem:[%s5795_s11 + $0x238] sm:$0xff]  ;;  %v5060_v52 = vcombine.low %v1131_v47, %v1135_v60 }
 0x4d5   :  { %6070 = vst [vmem:[#allocation69_spill] sm:$0xff] %v5016_v46  ;;  %6071 = vst [vmem:[#allocation70_spill] sm:$0xff] %v5018_v27 }
 0x4d6   :  { %1958 = vmatpush1.bf16.msra.mxu0 %v4986_v57  ;;  %1999 = vmatpush1.bf16.msra.mxu1 %v4988_v6  ;;  %v1134_v6 = vld [vmem:[%s5795_s11 + $0x1f0] sm:$0xff]  ;;  %6072 = vst [vmem:[#allocation71_spill] sm:$0xff] %v5034_v14  ;;  %6077 = vst [vmem:[#allocation76_spill] sm:$0xff] %v5060_v52 }
 0x4d7   :  { %1959 = vmatprep.subr.bf16.mxu0 %v4992_v34  ;;  %2000 = vmatprep.subr.bf16.mxu1 %v4994_v56  ;;  %v5040_v56 = vcombine.high %v1130_v50, %v1134_v6  ;;  %v5042_v34 = vcombine.high %v1131_v47, %v1135_v60  ;;  %v1138_v57 = vld [vmem:[%s5795_s11 + $0x210] sm:$0xff]  ;;  %v5058_v38 = vcombine.low %v1130_v50, %v1134_v6  ;;  %v1147_v50 = vld [vmem:[%s5795_s11 + $0x258] sm:$0xff] }
 0x4d8   :  { %v1151_v6 = vld [vmem:[%s5795_s11 + $0x278] sm:$0xff]  ;;  %v5084_v60 = vcombine.low %v1139_v30, %v1143_v62 }
 0x4d9   :  { %6074 = vst [vmem:[#allocation73_spill] sm:$0xff] %v5040_v56  ;;  %6075 = vst [vmem:[#allocation74_spill] sm:$0xff] %v5042_v34 }
 0x4da   :  { %1960 = vmatpush1.bf16.msra.mxu0 %v5010_v16  ;;  %2001 = vmatpush1.bf16.msra.mxu1 %v5012_v24  ;;  %v1142_v24 = vld [vmem:[%s5795_s11 + $0x230] sm:$0xff]  ;;  %6076 = vst [vmem:[#allocation75_spill] sm:$0xff] %v5058_v38  ;;  %6081 = vst [vmem:[#allocation80_spill] sm:$0xff] %v5084_v60 }
 0x4db   :  { %1961 = vmatprep.subr.bf16.mxu0 %v5016_v46  ;;  %2002 = vmatprep.subr.bf16.mxu1 %v5018_v27  ;;  %v5064_v27 = vcombine.high %v1138_v57, %v1142_v24  ;;  %v5066_v46 = vcombine.high %v1139_v30, %v1143_v62  ;;  %v1146_v16 = vld [vmem:[%s5795_s11 + $0x250] sm:$0xff]  ;;  %v5082_v47 = vcombine.low %v1138_v57, %v1142_v24  ;;  %v1155_v57 = vld [vmem:[%s5795_s11 + $0x298] sm:$0xff] }
 0x4dc   :  { %v1159_v24 = vld [vmem:[%s5795_s11 + $0x2b8] sm:$0xff]  ;;  %v5108_v62 = vcombine.low %v1147_v50, %v1151_v6 }
 0x4dd   :  { %6078 = vst [vmem:[#allocation77_spill] sm:$0xff] %v5064_v27  ;;  %6079 = vst [vmem:[#allocation78_spill] sm:$0xff] %v5066_v46 }
 0x4de   :  { %1962 = vmatpush1.bf16.msra.mxu0 %v5034_v14  ;;  %2003 = vmatpush1.bf16.msra.mxu1 %v5036_v48  ;;  %v1150_v48 = vld [vmem:[%s5795_s11 + $0x270] sm:$0xff]  ;;  %6080 = vst [vmem:[#allocation79_spill] sm:$0xff] %v5082_v47  ;;  %6085 = vst [vmem:[#allocation84_spill] sm:$0xff] %v5108_v62 }
 0x4df   :  { %1963 = vmatprep.subr.bf16.mxu0 %v5040_v56  ;;  %2004 = vmatprep.subr.bf16.mxu1 %v5042_v34  ;;  %v5088_v34 = vcombine.high %v1146_v16, %v1150_v48  ;;  %v5090_v56 = vcombine.high %v1147_v50, %v1151_v6  ;;  %v1154_v14 = vld [vmem:[%s5795_s11 + $0x290] sm:$0xff]  ;;  %v5106_v30 = vcombine.low %v1146_v16, %v1150_v48  ;;  %v1163_v16 = vld [vmem:[%s5795_s11 + $0x2d8] sm:$0xff] }
 0x4e0   :  { %v1167_v48 = vld [vmem:[%s5795_s11 + $0x2f8] sm:$0xff]  ;;  %v5132_v6 = vcombine.low %v1155_v57, %v1159_v24 }
 0x4e1   :  { %6082 = vst [vmem:[#allocation81_spill] sm:$0xff] %v5088_v34  ;;  %6083 = vst [vmem:[#allocation82_spill] sm:$0xff] %v5090_v56 }
 0x4e2   :  { %1964 = vmatpush1.bf16.msra.mxu0 %v5058_v38  ;;  %2005 = vmatpush1.bf16.msra.mxu1 %v5060_v52  ;;  %v1158_v52 = vld [vmem:[%s5795_s11 + $0x2b0] sm:$0xff]  ;;  %6084 = vst [vmem:[#allocation83_spill] sm:$0xff] %v5106_v30  ;;  %6089 = vst [vmem:[#allocation88_spill] sm:$0xff] %v5132_v6 }
 0x4e3   :  { %1965 = vmatprep.subr.bf16.mxu0 %v5064_v27  ;;  %2006 = vmatprep.subr.bf16.mxu1 %v5066_v46  ;;  %v5112_v46 = vcombine.high %v1154_v14, %v1158_v52  ;;  %v5114_v27 = vcombine.high %v1155_v57, %v1159_v24  ;;  %v1162_v38 = vld [vmem:[%s5795_s11 + $0x2d0] sm:$0xff]  ;;  %v5130_v50 = vcombine.low %v1154_v14, %v1158_v52  ;;  %v1171_v14 = vld [vmem:[%s5795_s11 + $0x318] sm:$0xff] }
 0x4e4   :  { %v1175_v52 = vld [vmem:[%s5795_s11 + $0x338] sm:$0xff]  ;;  %v5156_v24 = vcombine.low %v1163_v16, %v1167_v48 }
 0x4e5   :  { %6086 = vst [vmem:[#allocation85_spill] sm:$0xff] %v5112_v46  ;;  %6087 = vst [vmem:[#allocation86_spill] sm:$0xff] %v5114_v27 }
 0x4e6   :  { %1966 = vmatpush1.bf16.msra.mxu0 %v5082_v47  ;;  %2007 = vmatpush1.bf16.msra.mxu1 %v5084_v60  ;;  %v1166_v60 = vld [vmem:[%s5795_s11 + $0x2f0] sm:$0xff]  ;;  %6088 = vst [vmem:[#allocation87_spill] sm:$0xff] %v5130_v50  ;;  %6093 = vst [vmem:[#allocation92_spill] sm:$0xff] %v5156_v24 }
 0x4e7   :  { %1967 = vmatprep.subr.bf16.mxu0 %v5088_v34  ;;  %2008 = vmatprep.subr.bf16.mxu1 %v5090_v56  ;;  %v5136_v56 = vcombine.high %v1162_v38, %v1166_v60  ;;  %v5138_v34 = vcombine.high %v1163_v16, %v1167_v48  ;;  %v1170_v47 = vld [vmem:[%s5795_s11 + $0x310] sm:$0xff]  ;;  %v5154_v57 = vcombine.low %v1162_v38, %v1166_v60  ;;  %v1179_v38 = vld [vmem:[%s5795_s11 + $0x358] sm:$0xff] }
 0x4e8   :  { %v1183_v60 = vld [vmem:[%s5795_s11 + $0x378] sm:$0xff]  ;;  %v5180_v48 = vcombine.low %v1171_v14, %v1175_v52 }
 0x4e9   :  { %6090 = vst [vmem:[#allocation89_spill] sm:$0xff] %v5136_v56  ;;  %6091 = vst [vmem:[#allocation90_spill] sm:$0xff] %v5138_v34 }
 0x4ea   :  { %1968 = vmatpush1.bf16.msra.mxu0 %v5106_v30  ;;  %2009 = vmatpush1.bf16.msra.mxu1 %v5108_v62  ;;  %v1174_v62 = vld [vmem:[%s5795_s11 + $0x330] sm:$0xff]  ;;  %6092 = vst [vmem:[#allocation91_spill] sm:$0xff] %v5154_v57  ;;  %6097 = vst [vmem:[#allocation96_spill] sm:$0xff] %v5180_v48 }
 0x4eb   :  { %1969 = vmatprep.subr.bf16.mxu0 %v5112_v46  ;;  %2010 = vmatprep.subr.bf16.mxu1 %v5114_v27  ;;  %v5160_v27 = vcombine.high %v1170_v47, %v1174_v62  ;;  %v5162_v46 = vcombine.high %v1171_v14, %v1175_v52  ;;  %v1178_v30 = vld [vmem:[%s5795_s11 + $0x350] sm:$0xff]  ;;  %v5178_v16 = vcombine.low %v1170_v47, %v1174_v62  ;;  %v1187_v47 = vld [vmem:[%s5795_s11 + $0x398] sm:$0xff] }
 0x4ec   :  { %v1191_v62 = vld [vmem:[%s5795_s11 + $0x3b8] sm:$0xff]  ;;  %v5204_v52 = vcombine.low %v1179_v38, %v1183_v60 }
 0x4ed   :  { %6094 = vst [vmem:[#allocation93_spill] sm:$0xff] %v5160_v27  ;;  %6095 = vst [vmem:[#allocation94_spill] sm:$0xff] %v5162_v46 }
 0x4ee   :  { %1970 = vmatpush1.bf16.msra.mxu0 %v5130_v50  ;;  %2011 = vmatpush1.bf16.msra.mxu1 %v5132_v6  ;;  %v1182_v6 = vld [vmem:[%s5795_s11 + $0x370] sm:$0xff]  ;;  %6096 = vst [vmem:[#allocation95_spill] sm:$0xff] %v5178_v16 }
 0x4ef   :  { %1971 = vmatprep.subr.bf16.mxu0 %v5136_v56  ;;  %2012 = vmatprep.subr.bf16.mxu1 %v5138_v34  ;;  %v5184_v34 = vcombine.high %v1178_v30, %v1182_v6  ;;  %v5186_v56 = vcombine.high %v1179_v38, %v1183_v60  ;;  %v1186_v50 = vld [vmem:[%s5795_s11 + $0x390] sm:$0xff]  ;;  %v5202_v14 = vcombine.low %v1178_v30, %v1182_v6  ;;  %v1195_v30 = vld [vmem:[%s5795_s11 + $0x3d8] sm:$0xff] }
 0x4f0   :  { %v1199_v6 = vld [vmem:[%s5795_s11 + $0x3f8] sm:$0xff]  ;;  %v5228_v60 = vcombine.low %v1187_v47, %v1191_v62 }
 0x4f1   :  { %6098 = vst [vmem:[#allocation97_spill] sm:$0xff] %v5184_v34  ;;  %6099 = vst [vmem:[#allocation98_spill] sm:$0xff] %v5186_v56 }
 0x4f2   :  { %1972 = vmatpush1.bf16.msra.mxu0 %v5154_v57  ;;  %2013 = vmatpush1.bf16.msra.mxu1 %v5156_v24  ;;  %v1190_v24 = vld [vmem:[%s5795_s11 + $0x3b0] sm:$0xff]  ;;  %6100 = vst [vmem:[#allocation99_spill] sm:$0xff] %v5202_v14 }
 0x4f3   :  { %1973 = vmatprep.subr.bf16.mxu0 %v5160_v27  ;;  %2014 = vmatprep.subr.bf16.mxu1 %v5162_v46  ;;  %v5208_v46 = vcombine.high %v1186_v50, %v1190_v24  ;;  %v5210_v27 = vcombine.high %v1187_v47, %v1191_v62  ;;  %v1194_v57 = vld [vmem:[%s5795_s11 + $0x3d0] sm:$0xff]  ;;  %v5226_v38 = vcombine.low %v1186_v50, %v1190_v24  ;;  %v6102_v50 = vld [vmem:[#allocation20_spill] sm:$0xff]  ;;  %v6104_v24 = vld [vmem:[#allocation21_spill] sm:$0xff] }
 0x4f4   :  { %v6106_v47 = vld [vmem:[#allocation24_spill] sm:$0xff]  ;;  %v6107_v62 = vld [vmem:[#allocation27_spill] sm:$0xff] }
 0x4f6   :  { %1974 = vmatpush1.bf16.msra.mxu0 %v5178_v16  ;;  %2015 = vmatpush1.bf16.msra.mxu1 %v5180_v48  ;;  %v1198_v48 = vld [vmem:[%s5795_s11 + $0x3f0] sm:$0xff] }
 0x4f7   :  { %1975 = vmatprep.subr.bf16.mxu0 %v5184_v34  ;;  %2016 = vmatprep.subr.bf16.mxu1 %v5186_v56  ;;  %v5232_v56 = vcombine.high %v1194_v57, %v1198_v48  ;;  %v5234_v34 = vcombine.high %v1195_v30, %v1199_v6  ;;  %v5238_v16 = vcombine.low %v1194_v57, %v1198_v48  ;;  %v6103_v57 = vld [vmem:[#allocation23_spill] sm:$0xff]  ;;  %v6105_v48 = vld [vmem:[#allocation22_spill] sm:$0xff] }
 0x4fa   :  { %1976 = vmatpush1.bf16.msra.mxu0 %v5202_v14  ;;  %2017 = vmatpush1.bf16.msra.mxu1 %v5204_v52  ;;  %v5240_v14 = vcombine.low %v1195_v30, %v1199_v6  ;;  %v6108_v30 = vld [vmem:[#allocation25_spill] sm:$0xff]  ;;  %v6109_v6 = vld [vmem:[#allocation26_spill] sm:$0xff] }
 0x4fb   :  { %1977 = vmatprep.subr.bf16.mxu0 %v5208_v46  ;;  %2018 = vmatprep.subr.bf16.mxu1 %v5210_v27 }
 0x4fe   :  { %1978 = vmatpush1.bf16.msra.mxu0 %v5226_v38  ;;  %2019 = vmatpush1.bf16.msra.mxu1 %v5228_v60 }
 0x4ff   :  { %1979 = vmatprep.subr.bf16.mxu0 %v5232_v56  ;;  %2020 = vmatprep.subr.bf16.mxu1 %v5234_v34 }
 0x502   :  { %1980 = vmatpush1.bf16.msra.mxu0 %v5238_v16  ;;  %2021 = vmatpush1.bf16.msra.mxu1 %v5240_v14 }
 0x503   :  { %2134 = vmatprep.subr.bf16.mxu0 %v4456_v28  ;;  %2175 = vmatprep.subr.bf16.mxu1 %v4463_v32 }
 0x505   :  { %1982 = vmatmul.mubr.bf16.vlgmr.msra.gmra.mrb[16].mxu0 %v4890_v40  ;;  %2023 = vmatmul.mubr.bf16.vlgmr.msra.gmra.mrb[16].mxu1 %v4890_v40  ;;  %v6101_v40 = vld [vmem:[#allocation18_spill] sm:$0xff] }
 0x506   :  { %2135 = vmatpush1.bf16.msra.mxu0 %v4454_v25  ;;  %2176 = vmatpush1.bf16.msra.mxu1 %v4461_v31 }
 0x507   :  { %2136 = vmatprep.subr.bf16.mxu0 %v4482_v58  ;;  %2177 = vmatprep.subr.bf16.mxu1 %v4484_v59 }
 0x50a   :  { %2137 = vmatpush1.bf16.msra.mxu0 %v4500_v0  ;;  %2178 = vmatpush1.bf16.msra.mxu1 %v4502_v1 }
 0x50b   :  { %2138 = vmatprep.subr.bf16.mxu0 %v4506_v2  ;;  %2179 = vmatprep.subr.bf16.mxu1 %v4508_v3 }
 0x50e   :  { %2139 = vmatpush1.bf16.msra.mxu0 %v4526_v8  ;;  %2180 = vmatpush1.bf16.msra.mxu1 %v4528_v9 }
 0x50f   :  { %2140 = vmatprep.subr.bf16.mxu0 %v4532_v10  ;;  %2181 = vmatprep.subr.bf16.mxu1 %v4534_v11 }
 0x512   :  { %2141 = vmatpush1.bf16.msra.mxu0 %v4538_v12  ;;  %2182 = vmatpush1.bf16.msra.mxu1 %v4540_v13 }
 0x513   :  { %2142 = vmatprep.subr.bf16.mxu0 %v4555_v17  ;;  %2183 = vmatprep.subr.bf16.mxu1 %v4564_v21 }
 0x516   :  { %2143 = vmatpush1.bf16.msra.mxu0 %v4560_v19  ;;  %2184 = vmatpush1.bf16.msra.mxu1 %v4562_v20 }
 0x517   :  { %2144 = vmatprep.subr.bf16.mxu0 %v4579_v33  ;;  %2185 = vmatprep.subr.bf16.mxu1 %v4588_v37 }
 0x51a   :  { %2145 = vmatpush1.bf16.msra.mxu0 %v4584_v35  ;;  %2186 = vmatpush1.bf16.msra.mxu1 %v4586_v36 }
 0x51b   :  { %2146 = vmatprep.subr.bf16.mxu0 %v4603_v41  ;;  %2187 = vmatprep.subr.bf16.mxu1 %v4612_v45 }
 0x51e   :  { %2147 = vmatpush1.bf16.msra.mxu0 %v4608_v43  ;;  %2188 = vmatpush1.bf16.msra.mxu1 %v4610_v44 }
 0x51f   :  { %2148 = vmatprep.subr.bf16.mxu0 %v4627_v51  ;;  %2189 = vmatprep.subr.bf16.mxu1 %v4636_v55 }
 0x522   :  { %2149 = vmatpush1.bf16.msra.mxu0 %v4632_v53  ;;  %2190 = vmatpush1.bf16.msra.mxu1 %v4634_v54 }
 0x523   :  { %2150 = vmatprep.subr.bf16.mxu0 %v4651_v61  ;;  %2191 = vmatprep.subr.bf16.mxu1 %v4660_v5 }
 0x526   :  { %2151 = vmatpush1.bf16.msra.mxu0 %v4656_v63  ;;  %2192 = vmatpush1.bf16.msra.mxu1 %v4658_v4  ;;  %v6124_v63 = vld [vmem:[#allocation47_spill] sm:$0xff] }
 0x527   :  { %2152 = vmatprep.subr.bf16.mxu0 %v4675_v15  ;;  %2193 = vmatprep.subr.bf16.mxu1 %v4684_v23 }
 0x52a   :  { %2153 = vmatpush1.bf16.msra.mxu0 %v4680_v18  ;;  %2194 = vmatpush1.bf16.msra.mxu1 %v4682_v22 }
 0x52b   :  { %2154 = vmatprep.subr.bf16.mxu0 %v4699_v39  ;;  %2195 = vmatprep.subr.bf16.mxu1 %v4708_v49  ;;  %v6110_v49 = vld [vmem:[#allocation29_spill] sm:$0xff] }
 0x52e   :  { %2155 = vmatpush1.bf16.msra.mxu0 %v4704_v42  ;;  %2196 = vmatpush1.bf16.msra.mxu1 %v6101_v40  ;;  %v6111_v42 = vld [vmem:[#allocation31_spill] sm:$0xff]  ;;  %v6112_v40 = vld [vmem:[#allocation28_spill] sm:$0xff] }
 0x52f   :  { %2156 = vmatprep.subr.bf16.mxu0 %v6102_v50  ;;  %2197 = vmatprep.subr.bf16.mxu1 %v6103_v57  ;;  %v6113_v50 = vld [vmem:[#allocation30_spill] sm:$0xff]  ;;  %v6114_v57 = vld [vmem:[#allocation32_spill] sm:$0xff] }
 0x532   :  { %2157 = vmatpush1.bf16.msra.mxu0 %v6104_v24  ;;  %2198 = vmatpush1.bf16.msra.mxu1 %v6105_v48  ;;  %v6115_v24 = vld [vmem:[#allocation33_spill] sm:$0xff]  ;;  %v6116_v48 = vld [vmem:[#allocation34_spill] sm:$0xff] }
 0x533   :  { %2158 = vmatprep.subr.bf16.mxu0 %v6106_v47  ;;  %2199 = vmatprep.subr.bf16.mxu1 %v6107_v62  ;;  %v6117_v47 = vld [vmem:[#allocation35_spill] sm:$0xff]  ;;  %v6118_v62 = vld [vmem:[#allocation36_spill] sm:$0xff] }
 0x536   :  { %2159 = vmatpush1.bf16.msra.mxu0 %v6108_v30  ;;  %2200 = vmatpush1.bf16.msra.mxu1 %v6109_v6  ;;  %v6119_v30 = vld [vmem:[#allocation37_spill] sm:$0xff]  ;;  %v6120_v6 = vld [vmem:[#allocation38_spill] sm:$0xff] }
 0x537   :  { %2160 = vmatprep.subr.bf16.mxu0 %v6110_v49  ;;  %2201 = vmatprep.subr.bf16.mxu1 %v6111_v42  ;;  %v6121_v49 = vld [vmem:[#allocation39_spill] sm:$0xff]  ;;  %v6122_v42 = vld [vmem:[#allocation40_spill] sm:$0xff] }
 0x53a   :  { %2161 = vmatpush1.bf16.msra.mxu0 %v6112_v40  ;;  %2202 = vmatpush1.bf16.msra.mxu1 %v6113_v50  ;;  %v6123_v40 = vld [vmem:[#allocation41_spill] sm:$0xff] }
 0x53b   :  { %2162 = vmatprep.subr.bf16.mxu0 %v6114_v57  ;;  %2203 = vmatprep.subr.bf16.mxu1 %v6115_v24 }
 0x53e   :  { %2163 = vmatpush1.bf16.msra.mxu0 %v6116_v48  ;;  %2204 = vmatpush1.bf16.msra.mxu1 %v6117_v47 }
 0x53f   :  { %2164 = vmatprep.subr.bf16.mxu0 %v6118_v62  ;;  %2205 = vmatprep.subr.bf16.mxu1 %v6119_v30 }
 0x542   :  { %2165 = vmatpush1.bf16.msra.mxu0 %v6120_v6  ;;  %2206 = vmatpush1.bf16.msra.mxu1 %v6121_v49 }
 0x543   :  { %2216 = vmatprep.subr.bf16.mxu0 %v6122_v42  ;;  %2257 = vmatprep.subr.bf16.mxu1 %v6123_v40 }
 0x598   :  { %v1901_v50 = vpop.f32.mrb[12].mxu0  ;;  %v1942_v57 = vpop.f32.mrb[12].mxu1 }
 0x599   :  { %v2035_v39 = vrot.slane %v1901_v50, 6  ;;  %v1903_v24 = vpop.f32.mrb[13].mxu0  ;;  %v1944_v22 = vpop.f32.mrb[13].mxu1  ;;  %v2037_v42 = vrot.slane %v1942_v57, 6 }
 0x59a   :  { %v2036_v48 = vrot.slane %v1903_v24, 6  ;;  %v1905_v18 = vpop.f32.mrb[14].mxu0  ;;  %v1946_v47 = vpop.f32.mrb[14].mxu1  ;;  %v2038_v4 = vrot.slane %v1944_v22, 6  ;;  %v6125_v22 = vld [vmem:[#allocation48_spill] sm:$0xff] }
 0x59b   :  { %v2043_v62 = vadd.f32 %v2035_v39, %v4861_v29  ;;  %v1906_v23 = vpop.f32.mrb[15].mxu0  ;;  %v1947_v30 = vpop.f32.mrb[15].mxu1  ;;  %v2045_v5 = vadd.f32 %v2037_v42, %v6124_v63  ;;  %v6131_v63 = vld [vmem:[#allocation8_spill] sm:$0xff] }
 0x59c   :  { %v2044_v6 = vadd.f32 %v2036_v48, %v4863_v7  ;;  %v2046_v40 = vadd.f32 %v2038_v4, %v4868_v26  ;;  %v6133_v26 = vld [vmem:[#allocation7_spill] sm:$0xff] }
 0x59d   :  { %v3121_v15 = vmul.f32 -1.442695, %v2043_v62 }
 0x59e   :  { %v3122_v49 = vmul.f32 -1.442695, %v2044_v6  ;;  %v3123_v50 = vmul.f32 -1.442695, %v2046_v40 }
 0x59f   :  { %3667 = vpow2.f32 %v3121_v15  ;;  %v2092_v15 = vrot.slane %v6125_v22, 6 }
 0x5a0   :  { %3669 = vpow2.f32 %v3122_v49 }
 0x5a1   :  { %3671 = vpow2.f32 %v3123_v50  ;;  %v1200_v50 = vld [vmem:[%s5796_s12] sm:$0xf] }
 0x5a2   :  { %3673 = vtanh.f32 %v2045_v5  ;;  %v5338_v7 = vrot.slane %v1200_v50, %v6133_v26 }
 0x5a4   :  { %6134 = vst [vmem:[#allocation7_spill] sm:$0xff] %v5338_v7 }
 0x5a9   :  { %v3668_v24 = vpop.eup %3667 }
 0x5aa   :  { %v3670_v18 = vpop.eup %3669  ;;  %v2075_v47 = vadd.f32 1.0, %v3668_v24  ;;  %v6127_v24 = vld [vmem:[#allocation5_spill] sm:$0xff] }
 0x5ab   :  { %v2081_v23 = vadd.f32 1.0, %v3670_v18  ;;  %v3672_v39 = vpop.eup %3671  ;;  %v5326_v18 = vrot.slane %v1200_v50, %v6127_v24  ;;  %v5334_v24 = vrot.slane %v1200_v50, %v6131_v63 }
 0x5ac   :  { %3675 = vrcp.f32 %v2075_v47  ;;  %v3674_v48 = vpop.eup %3673  ;;  %v2088_v4 = vadd.f32 1.0, %v3672_v39  ;;  %v6129_v47 = vld [vmem:[#allocation6_spill] sm:$0xff] }
 0x5ad   :  { %3677 = vrcp.f32 %v2081_v23  ;;  %6128 = vst [vmem:[#allocation5_spill] sm:$0xff] %v5326_v18  ;;  %v5329_v23 = vrot.slane %v1200_v50, %v6129_v47  ;;  %6132 = vst [vmem:[#allocation8_spill] sm:$0xff] %v5334_v24 }
 0x5ae   :  { %3679 = vrcp.f32 %v2088_v4 }
 0x5af   :  { %6130 = vst [vmem:[#allocation6_spill] sm:$0xff] %v5329_v23 }
 0x5b6   :  { %v3676_v62 = vpop.eup %3675 }
 0x5b7   :  { %v3678_v49 = vpop.eup %3677  ;;  %v2095_v30 = vmul.f32 %v3676_v62, %v3674_v48 }
 0x5b8   :  { %v2094_v57 = vmul.f32 %v3678_v49, %v2092_v15  ;;  %v3680_v42 = vpop.eup %3679 }
 0x5ba   :  { %v5319_v40 = vadd.f32 %v2095_v30, %v2094_v57 }
 0x5bc   :  { %6126 = vst [vmem:[#allocation48_spill] sm:$0xff] %v5319_v40  ;;  %3681 = vtanh.f32 %v5319_v40 }
 0x5c6   :  { %v3682_v6 = vpop.eup %3681 }
 0x5c7   :  { %v2098_v5 = vmul.f32 %v3682_v6, %v3680_v42 }
 0x5d8   :  { %v1983_v39 = vpop.f32.mrb[16].mxu0  ;;  %v2024_v48 = vpop.f32.mrb[16].mxu1 }
 0x5d9   :  { %v2068_v62 = vadd.f32 %v5326_v18, %v1983_v39  ;;  %v1985_v22 = vpop.f32.mrb[17].mxu0  ;;  %v2026_v15 = vpop.f32.mrb[17].mxu1  ;;  %v2070_v18 = vadd.f32 %v5338_v7, %v2024_v48 }
 0x5da   :  { %v2069_v49 = vadd.f32 %v5329_v23, %v1985_v22  ;;  %v1987_v30 = vpop.f32.mrb[18].mxu0  ;;  %v2028_v4 = vpop.f32.mrb[18].mxu1  ;;  %v2071_v47 = vadd.f32 %v5334_v24, %v2026_v15 }
 0x5db   :  { %v3124_v57 = vmul.f32 -1.442695, %v2068_v62  ;;  %v1988_v42 = vpop.f32.mrb[19].mxu0  ;;  %v2029_v6 = vpop.f32.mrb[19].mxu1 }
 0x5dc   :  { %v3125_v40 = vmul.f32 -1.442695, %v2069_v49  ;;  %v3126_v39 = vmul.f32 -1.442695, %v2071_v47 }
 0x5dd   :  { %3683 = vpow2.f32 %v3124_v57 }
 0x5de   :  { %3685 = vpow2.f32 %v3125_v40 }
 0x5df   :  { %3687 = vpow2.f32 %v3126_v39 }
 0x5e0   :  { %3689 = vtanh.f32 %v2070_v18  ;;  %v2126_v18 = vpack.c.bf16 %v2098_v5, %v2098_v5  ;;  %v6139_v5 = vld [vmem:[#allocation51_spill] sm:$0xff] }
 0x5e7   :  { %v3684_v22 = vpop.eup %3683 }
 0x5e8   :  { %v3686_v30 = vpop.eup %3685  ;;  %v2102_v4 = vadd.f32 1.0, %v3684_v22 }
 0x5e9   :  { %v2108_v62 = vadd.f32 1.0, %v3686_v30  ;;  %v3688_v63 = vpop.eup %3687 }
 0x5ea   :  { %3691 = vrcp.f32 %v2102_v4  ;;  %v3690_v49 = vpop.eup %3689  ;;  %v2115_v15 = vadd.f32 1.0, %v3688_v63  ;;  %v5344_v4 = vrot.slane %v2126_v18, 1  ;;  %v6136_v63 = vld [vmem:[#allocation43_spill] sm:$0xff]  ;;  %v6148_v18 = vld [vmem:[#allocation60_spill] sm:$0xff] }
 0x5eb   :  { %3693 = vrcp.f32 %v2108_v62  ;;  %v6135_v62 = vld [vmem:[#allocation42_spill] sm:$0xff] }
 0x5ec   :  { %3695 = vrcp.f32 %v2115_v15  ;;  %v6142_v15 = vld [vmem:[#allocation54_spill] sm:$0xff] }
 0x5f4   :  { %v3692_v57 = vpop.eup %3691 }
 0x5f5   :  { %v3694_v40 = vpop.eup %3693  ;;  %v2119_v42 = vmul.f32 %v3692_v57, %v3690_v49  ;;  %v6137_v49 = vld [vmem:[#allocation49_spill] sm:$0xff]  ;;  %v6138_v57 = vld [vmem:[#allocation50_spill] sm:$0xff] }
 0x5f6   :  { %v2118_v6 = vmul.f32 0.0, %v3694_v40  ;;  %v3696_v50 = vpop.eup %3695  ;;  %v6140_v40 = vld [vmem:[#allocation52_spill] sm:$0xff] }
 0x5f8   :  { %v5341_v26 = vadd.f32 %v2119_v42, %v2118_v6  ;;  %v6141_v42 = vld [vmem:[#allocation53_spill] sm:$0xff]  ;;  %v6143_v6 = vld [vmem:[#allocation55_spill] sm:$0xff] }
 0x5fa   :  { %3697 = vtanh.f32 %v5341_v26 }
 0x604   :  { %v3698_v48 = vpop.eup %3697 }
 0x605   :  { %v2122_v47 = vmul.f32 %v3698_v48, %v3696_v50  ;;  %v6144_v50 = vld [vmem:[#allocation56_spill] sm:$0xff]  ;;  %v6145_v48 = vld [vmem:[#allocation57_spill] sm:$0xff] }
 0x607   :  { %v2124_v39 = vrot.slane %v2122_v47, 6  ;;  %v6146_v47 = vld [vmem:[#allocation58_spill] sm:$0xff] }
 0x609   :  { %v2127_v22 = vpack.c.bf16 %v2124_v39, %v2124_v39  ;;  %v6147_v39 = vld [vmem:[#allocation59_spill] sm:$0xff] }
 0x60b   :  { %v2131_v30 = vrot.slane %v2127_v22, 1  ;;  %v6149_v22 = vld [vmem:[#allocation61_spill] sm:$0xff] }
 0x60d   :  { %2166 = vmatprep.mubr.bf16.mxu0 %v2131_v30  ;;  %2207 = vmatprep.mubr.bf16.mxu1 %v2131_v30 }
 0x60e   :  { %2167 = vmatmul.mubr.bf16.vlgmr.msra.gmra.mrb[20].mxu0 %v5344_v4  ;;  %2208 = vmatmul.mubr.bf16.vlgmr.msra.gmra.mrb[20].mxu1 %v5344_v4 }
 0x60f   :  { %2217 = vmatpush1.bf16.msra.mxu0 %v6135_v62  ;;  %2258 = vmatpush1.bf16.msra.mxu1 %v6136_v63 }
 0x610   :  { %2248 = vmatprep.mubr.bf16.mxu0 %v2131_v30  ;;  %2289 = vmatprep.mubr.bf16.mxu1 %v2131_v30  ;;  %v6150_v30 = vld [vmem:[#allocation62_spill] sm:$0xff] }
 0x611   :  { %2218 = vmatprep.subr.bf16.mxu0 %v6137_v49  ;;  %2259 = vmatprep.subr.bf16.mxu1 %v6138_v57 }
 0x613   :  { %2219 = vmatpush1.bf16.msra.mxu0 %v6139_v5  ;;  %2260 = vmatpush1.bf16.msra.mxu1 %v6140_v40  ;;  %v6151_v40 = vld [vmem:[#allocation63_spill] sm:$0xff] }
 0x614   :  { %2220 = vmatprep.subr.bf16.mxu0 %v6141_v42  ;;  %2261 = vmatprep.subr.bf16.mxu1 %v6142_v15  ;;  %v6152_v42 = vld [vmem:[#allocation64_spill] sm:$0xff]  ;;  %v6153_v15 = vld [vmem:[#allocation65_spill] sm:$0xff] }
 0x617   :  { %2221 = vmatpush1.bf16.msra.mxu0 %v6143_v6  ;;  %2262 = vmatpush1.bf16.msra.mxu1 %v6144_v50  ;;  %v6154_v6 = vld [vmem:[#allocation66_spill] sm:$0xff]  ;;  %v6155_v50 = vld [vmem:[#allocation67_spill] sm:$0xff] }
 0x618   :  { %2222 = vmatprep.subr.bf16.mxu0 %v6145_v48  ;;  %2263 = vmatprep.subr.bf16.mxu1 %v6146_v47  ;;  %v6156_v48 = vld [vmem:[#allocation68_spill] sm:$0xff]  ;;  %v6157_v47 = vld [vmem:[#allocation69_spill] sm:$0xff] }
 0x61b   :  { %2223 = vmatpush1.bf16.msra.mxu0 %v6147_v39  ;;  %2264 = vmatpush1.bf16.msra.mxu1 %v6148_v18  ;;  %v6158_v39 = vld [vmem:[#allocation70_spill] sm:$0xff]  ;;  %v6159_v18 = vld [vmem:[#allocation71_spill] sm:$0xff] }
 0x61c   :  { %2224 = vmatprep.subr.bf16.mxu0 %v6149_v22  ;;  %2265 = vmatprep.subr.bf16.mxu1 %v6150_v30  ;;  %v6160_v22 = vld [vmem:[#allocation72_spill] sm:$0xff]  ;;  %v6161_v30 = vld [vmem:[#allocation73_spill] sm:$0xff] }
 0x61f   :  { %2225 = vmatpush1.bf16.msra.mxu0 %v6151_v40  ;;  %2266 = vmatpush1.bf16.msra.mxu1 %v6152_v42  ;;  %v6162_v40 = vld [vmem:[#allocation74_spill] sm:$0xff]  ;;  %v6163_v42 = vld [vmem:[#allocation75_spill] sm:$0xff] }
 0x620   :  { %2226 = vmatprep.subr.bf16.mxu0 %v6153_v15  ;;  %2267 = vmatprep.subr.bf16.mxu1 %v6154_v6  ;;  %v6164_v15 = vld [vmem:[#allocation76_spill] sm:$0xff]  ;;  %v6165_v6 = vld [vmem:[#allocation77_spill] sm:$0xff] }
 0x623   :  { %2227 = vmatpush1.bf16.msra.mxu0 %v6155_v50  ;;  %2268 = vmatpush1.bf16.msra.mxu1 %v6156_v48  ;;  %v6166_v50 = vld [vmem:[#allocation78_spill] sm:$0xff]  ;;  %v6167_v48 = vld [vmem:[#allocation79_spill] sm:$0xff] }
 0x624   :  { %2228 = vmatprep.subr.bf16.mxu0 %v6157_v47  ;;  %2269 = vmatprep.subr.bf16.mxu1 %v6158_v39  ;;  %v6168_v47 = vld [vmem:[#allocation80_spill] sm:$0xff]  ;;  %v6169_v39 = vld [vmem:[#allocation81_spill] sm:$0xff] }
 0x627   :  { %2229 = vmatpush1.bf16.msra.mxu0 %v6159_v18  ;;  %2270 = vmatpush1.bf16.msra.mxu1 %v6160_v22  ;;  %v6170_v18 = vld [vmem:[#allocation82_spill] sm:$0xff]  ;;  %v6171_v22 = vld [vmem:[#allocation83_spill] sm:$0xff] }
 0x628   :  { %2230 = vmatprep.subr.bf16.mxu0 %v6161_v30  ;;  %2271 = vmatprep.subr.bf16.mxu1 %v6162_v40  ;;  %v6172_v30 = vld [vmem:[#allocation84_spill] sm:$0xff]  ;;  %v6173_v40 = vld [vmem:[#allocation85_spill] sm:$0xff] }
 0x62b   :  { %2231 = vmatpush1.bf16.msra.mxu0 %v6163_v42  ;;  %2272 = vmatpush1.bf16.msra.mxu1 %v6164_v15  ;;  %v6174_v42 = vld [vmem:[#allocation86_spill] sm:$0xff]  ;;  %v6175_v15 = vld [vmem:[#allocation87_spill] sm:$0xff] }
 0x62c   :  { %2232 = vmatprep.subr.bf16.mxu0 %v6165_v6  ;;  %2273 = vmatprep.subr.bf16.mxu1 %v6166_v50  ;;  %v6176_v6 = vld [vmem:[#allocation88_spill] sm:$0xff]  ;;  %v6177_v50 = vld [vmem:[#allocation89_spill] sm:$0xff] }
 0x62f   :  { %2233 = vmatpush1.bf16.msra.mxu0 %v6167_v48  ;;  %2274 = vmatpush1.bf16.msra.mxu1 %v6168_v47  ;;  %v6178_v48 = vld [vmem:[#allocation90_spill] sm:$0xff]  ;;  %v6179_v47 = vld [vmem:[#allocation91_spill] sm:$0xff] }
 0x630   :  { %2234 = vmatprep.subr.bf16.mxu0 %v6169_v39  ;;  %2275 = vmatprep.subr.bf16.mxu1 %v6170_v18  ;;  %v6180_v39 = vld [vmem:[#allocation92_spill] sm:$0xff]  ;;  %v6181_v18 = vld [vmem:[#allocation93_spill] sm:$0xff] }
 0x633   :  { %2235 = vmatpush1.bf16.msra.mxu0 %v6171_v22  ;;  %2276 = vmatpush1.bf16.msra.mxu1 %v6172_v30  ;;  %v6182_v22 = vld [vmem:[#allocation94_spill] sm:$0xff]  ;;  %v6183_v30 = vld [vmem:[#allocation95_spill] sm:$0xff] }
 0x634   :  { %2236 = vmatprep.subr.bf16.mxu0 %v6173_v40  ;;  %2277 = vmatprep.subr.bf16.mxu1 %v6174_v42  ;;  %v6184_v40 = vld [vmem:[#allocation96_spill] sm:$0xff]  ;;  %v6185_v42 = vld [vmem:[#allocation97_spill] sm:$0xff] }
 0x637   :  { %2237 = vmatpush1.bf16.msra.mxu0 %v6175_v15  ;;  %2278 = vmatpush1.bf16.msra.mxu1 %v6176_v6  ;;  %v6186_v15 = vld [vmem:[#allocation98_spill] sm:$0xff]  ;;  %v6187_v6 = vld [vmem:[#allocation99_spill] sm:$0xff] }
 0x638   :  { %2238 = vmatprep.subr.bf16.mxu0 %v6177_v50  ;;  %2279 = vmatprep.subr.bf16.mxu1 %v6178_v48 }
 0x63b   :  { %2239 = vmatpush1.bf16.msra.mxu0 %v6179_v47  ;;  %2280 = vmatpush1.bf16.msra.mxu1 %v6180_v39 }
 0x63c   :  { %2240 = vmatprep.subr.bf16.mxu0 %v6181_v18  ;;  %2281 = vmatprep.subr.bf16.mxu1 %v6182_v22 }
 0x63f   :  { %2241 = vmatpush1.bf16.msra.mxu0 %v6183_v30  ;;  %2282 = vmatpush1.bf16.msra.mxu1 %v6184_v40 }
 0x640   :  { %2242 = vmatprep.subr.bf16.mxu0 %v6185_v42  ;;  %2283 = vmatprep.subr.bf16.mxu1 %v6186_v15 }
 0x643   :  { %2243 = vmatpush1.bf16.msra.mxu0 %v6187_v6  ;;  %2284 = vmatpush1.bf16.msra.mxu1 %v5204_v52 }
 0x644   :  { %2244 = vmatprep.subr.bf16.mxu0 %v5208_v46  ;;  %2285 = vmatprep.subr.bf16.mxu1 %v5210_v27 }
 0x647   :  { %2245 = vmatpush1.bf16.msra.mxu0 %v5226_v38  ;;  %2286 = vmatpush1.bf16.msra.mxu1 %v5228_v60 }
 0x648   :  { %2246 = vmatprep.subr.bf16.mxu0 %v5232_v56  ;;  %2287 = vmatprep.subr.bf16.mxu1 %v5234_v34 }
 0x64b   :  { %2247 = vmatpush1.bf16.msra.mxu0 %v5238_v16  ;;  %2288 = vmatpush1.bf16.msra.mxu1 %v5240_v14 }
 0x64c   :  { %2380 = vmatprep.subr.bf16.mxu0 %v4456_v28  ;;  %2421 = vmatprep.subr.bf16.mxu1 %v4463_v32  ;;  %v6189_v28 = vld [vmem:[#allocation9_spill] sm:$0xff]  ;;  %v6191_v32 = vld [vmem:[#allocation12_spill] sm:$0xff] }
 0x64e   :  { %2249 = vmatmul.mubr.bf16.vlgmr.msra.gmra.mrb[24].mxu0 %v5344_v4  ;;  %2290 = vmatmul.mubr.bf16.vlgmr.msra.gmra.mrb[24].mxu1 %v5344_v4 }
 0x64f   :  { %2381 = vmatpush1.bf16.msra.mxu0 %v4454_v25  ;;  %2422 = vmatpush1.bf16.msra.mxu1 %v4461_v31  ;;  %v6188_v25 = vld [vmem:[#allocation11_spill] sm:$0xff]  ;;  %v6190_v31 = vld [vmem:[#allocation10_spill] sm:$0xff] }
 0x650   :  { %2382 = vmatprep.subr.bf16.mxu0 %v4482_v58  ;;  %2423 = vmatprep.subr.bf16.mxu1 %v4484_v59  ;;  %v6192_v58 = vld [vmem:[#allocation15_spill] sm:$0xff]  ;;  %v6193_v59 = vld [vmem:[#allocation13_spill] sm:$0xff] }
 0x653   :  { %2383 = vmatpush1.bf16.msra.mxu0 %v4500_v0  ;;  %2424 = vmatpush1.bf16.msra.mxu1 %v4502_v1  ;;  %v6194_v0 = vld [vmem:[#allocation14_spill] sm:$0xff]  ;;  %v6195_v1 = vld [vmem:[#allocation16_spill] sm:$0xff] }
 0x654   :  { %2384 = vmatprep.subr.bf16.mxu0 %v4506_v2  ;;  %2425 = vmatprep.subr.bf16.mxu1 %v4508_v3  ;;  %v6196_v2 = vld [vmem:[#allocation19_spill] sm:$0xff]  ;;  %v6197_v3 = vld [vmem:[#allocation17_spill] sm:$0xff] }
 0x657   :  { %2385 = vmatpush1.bf16.msra.mxu0 %v4526_v8  ;;  %2426 = vmatpush1.bf16.msra.mxu1 %v4528_v9  ;;  %v6198_v8 = vld [vmem:[#allocation18_spill] sm:$0xff]  ;;  %v6199_v9 = vld [vmem:[#allocation20_spill] sm:$0xff] }
 0x658   :  { %2386 = vmatprep.subr.bf16.mxu0 %v4532_v10  ;;  %2427 = vmatprep.subr.bf16.mxu1 %v4534_v11  ;;  %v6200_v10 = vld [vmem:[#allocation23_spill] sm:$0xff]  ;;  %v6201_v11 = vld [vmem:[#allocation21_spill] sm:$0xff] }
 0x65b   :  { %2387 = vmatpush1.bf16.msra.mxu0 %v4538_v12  ;;  %2428 = vmatpush1.bf16.msra.mxu1 %v4540_v13  ;;  %v6202_v12 = vld [vmem:[#allocation22_spill] sm:$0xff]  ;;  %v6203_v13 = vld [vmem:[#allocation24_spill] sm:$0xff] }
 0x65c   :  { %2388 = vmatprep.subr.bf16.mxu0 %v4555_v17  ;;  %2429 = vmatprep.subr.bf16.mxu1 %v4564_v21  ;;  %v6204_v17 = vld [vmem:[#allocation27_spill] sm:$0xff]  ;;  %v6207_v21 = vld [vmem:[#allocation29_spill] sm:$0xff] }
 0x65f   :  { %2389 = vmatpush1.bf16.msra.mxu0 %v4560_v19  ;;  %2430 = vmatpush1.bf16.msra.mxu1 %v4562_v20  ;;  %v6205_v19 = vld [vmem:[#allocation25_spill] sm:$0xff]  ;;  %v6206_v20 = vld [vmem:[#allocation26_spill] sm:$0xff] }
 0x660   :  { %2390 = vmatprep.subr.bf16.mxu0 %v4579_v33  ;;  %2431 = vmatprep.subr.bf16.mxu1 %v4588_v37  ;;  %v6208_v33 = vld [vmem:[#allocation31_spill] sm:$0xff]  ;;  %v6211_v37 = vld [vmem:[#allocation32_spill] sm:$0xff] }
 0x663   :  { %2391 = vmatpush1.bf16.msra.mxu0 %v4584_v35  ;;  %2432 = vmatpush1.bf16.msra.mxu1 %v4586_v36  ;;  %v6209_v35 = vld [vmem:[#allocation28_spill] sm:$0xff]  ;;  %v6210_v36 = vld [vmem:[#allocation30_spill] sm:$0xff] }
 0x664   :  { %2392 = vmatprep.subr.bf16.mxu0 %v4603_v41  ;;  %2433 = vmatprep.subr.bf16.mxu1 %v4612_v45  ;;  %v6212_v41 = vld [vmem:[#allocation33_spill] sm:$0xff]  ;;  %v6215_v45 = vld [vmem:[#allocation36_spill] sm:$0xff] }
 0x667   :  { %2393 = vmatpush1.bf16.msra.mxu0 %v4608_v43  ;;  %2434 = vmatpush1.bf16.msra.mxu1 %v4610_v44  ;;  %v6213_v43 = vld [vmem:[#allocation34_spill] sm:$0xff]  ;;  %v6214_v44 = vld [vmem:[#allocation35_spill] sm:$0xff] }
 0x668   :  { %2394 = vmatprep.subr.bf16.mxu0 %v4627_v51  ;;  %2435 = vmatprep.subr.bf16.mxu1 %v4636_v55  ;;  %v6216_v51 = vld [vmem:[#allocation37_spill] sm:$0xff]  ;;  %v6219_v55 = vld [vmem:[#allocation40_spill] sm:$0xff] }
 0x66b   :  { %2395 = vmatpush1.bf16.msra.mxu0 %v4632_v53  ;;  %2436 = vmatpush1.bf16.msra.mxu1 %v4634_v54  ;;  %v6217_v53 = vld [vmem:[#allocation38_spill] sm:$0xff]  ;;  %v6218_v54 = vld [vmem:[#allocation39_spill] sm:$0xff] }
 0x66c   :  { %2396 = vmatprep.subr.bf16.mxu0 %v4651_v61  ;;  %2437 = vmatprep.subr.bf16.mxu1 %v6188_v25  ;;  %v6220_v61 = vld [vmem:[#allocation41_spill] sm:$0xff] }
 0x66f   :  { %2397 = vmatpush1.bf16.msra.mxu0 %v6189_v28  ;;  %2438 = vmatpush1.bf16.msra.mxu1 %v6190_v31 }
 0x670   :  { %2398 = vmatprep.subr.bf16.mxu0 %v6191_v32  ;;  %2439 = vmatprep.subr.bf16.mxu1 %v6192_v58 }
 0x673   :  { %2399 = vmatpush1.bf16.msra.mxu0 %v6193_v59  ;;  %2440 = vmatpush1.bf16.msra.mxu1 %v6194_v0 }
 0x674   :  { %2400 = vmatprep.subr.bf16.mxu0 %v6195_v1  ;;  %2441 = vmatprep.subr.bf16.mxu1 %v6196_v2 }
 0x677   :  { %2401 = vmatpush1.bf16.msra.mxu0 %v6197_v3  ;;  %2442 = vmatpush1.bf16.msra.mxu1 %v6198_v8  ;;  %v6221_v8 = vld [vmem:[#allocation45_spill] sm:$0xff] }
 0x678   :  { %2402 = vmatprep.subr.bf16.mxu0 %v6199_v9  ;;  %2443 = vmatprep.subr.bf16.mxu1 %v6200_v10 }
 0x67b   :  { %2403 = vmatpush1.bf16.msra.mxu0 %v6201_v11  ;;  %2444 = vmatpush1.bf16.msra.mxu1 %v6202_v12 }
 0x67c   :  { %2404 = vmatprep.subr.bf16.mxu0 %v6203_v13  ;;  %2445 = vmatprep.subr.bf16.mxu1 %v6204_v17  ;;  %v6222_v13 = vld [vmem:[#allocation46_spill] sm:$0xff] }
 0x67f   :  { %2405 = vmatpush1.bf16.msra.mxu0 %v6205_v19  ;;  %2446 = vmatpush1.bf16.msra.mxu1 %v6206_v20 }
 0x680   :  { %2406 = vmatprep.subr.bf16.mxu0 %v6207_v21  ;;  %2447 = vmatprep.subr.bf16.mxu1 %v6208_v33  ;;  %v6223_v21 = vld [vmem:[#allocation47_spill] sm:$0xff] }
 0x683   :  { %2407 = vmatpush1.bf16.msra.mxu0 %v6209_v35  ;;  %2448 = vmatpush1.bf16.msra.mxu1 %v6210_v36 }
 0x684   :  { %2408 = vmatprep.subr.bf16.mxu0 %v6211_v37  ;;  %2449 = vmatprep.subr.bf16.mxu1 %v6212_v41 }
 0x687   :  { %2409 = vmatpush1.bf16.msra.mxu0 %v6213_v43  ;;  %2450 = vmatpush1.bf16.msra.mxu1 %v6214_v44 }
 0x688   :  { %2410 = vmatprep.subr.bf16.mxu0 %v6215_v45  ;;  %2451 = vmatprep.subr.bf16.mxu1 %v6216_v51  ;;  %v6224_v51 = vld [vmem:[#allocation48_spill] sm:$0xff] }
 0x68b   :  { %2411 = vmatpush1.bf16.msra.mxu0 %v6217_v53  ;;  %2452 = vmatpush1.bf16.msra.mxu1 %v6218_v54  ;;  %v2338_v53 = vrot.slane %v6224_v51, 6 }
 0x68c   :  { %2462 = vmatprep.subr.bf16.mxu0 %v6219_v55  ;;  %2503 = vmatprep.subr.bf16.mxu1 %v6220_v61 }
 0x6e1   :  { %v2168_v4 = vpop.f32.mrb[20].mxu0  ;;  %v2209_v25 = vpop.f32.mrb[20].mxu1 }
 0x6e2   :  { %v2302_v28 = vrot.slane %v2168_v4, 4  ;;  %v2170_v31 = vpop.f32.mrb[21].mxu0  ;;  %v2211_v32 = vpop.f32.mrb[21].mxu1  ;;  %v2304_v19 = vrot.slane %v2209_v25, 4 }
 0x6e3   :  { %v2303_v58 = vrot.slane %v2170_v31, 4  ;;  %v2172_v59 = vpop.f32.mrb[22].mxu0  ;;  %v2213_v0 = vpop.f32.mrb[22].mxu1  ;;  %v2305_v12 = vrot.slane %v2211_v32, 4 }
 0x6e4   :  { %v2310_v1 = vadd.f32 %v2302_v28, %v4861_v29  ;;  %v2173_v2 = vpop.f32.mrb[23].mxu0  ;;  %v2214_v3 = vpop.f32.mrb[23].mxu1  ;;  %v2312_v33 = vadd.f32 %v2304_v19, %v6223_v21  ;;  %v6260_v21 = vld [vmem:[#allocation84_spill] sm:$0xff]  ;;  %v6263_v29 = vld [vmem:[#allocation87_spill] sm:$0xff] }
 0x6e5   :  { %v2311_v9 = vadd.f32 %v2303_v58, %v6221_v8  ;;  %v2313_v17 = vadd.f32 %v2305_v12, %v6222_v13  ;;  %v6226_v2 = vld [vmem:[#allocation5_spill] sm:$0xff]  ;;  %v6262_v8 = vld [vmem:[#allocation86_spill] sm:$0xff] }
 0x6e6   :  { %v3127_v10 = vmul.f32 -1.442695, %v2310_v1  ;;  %v6261_v13 = vld [vmem:[#allocation85_spill] sm:$0xff] }
 0x6e7   :  { %v3128_v11 = vmul.f32 -1.442695, %v2311_v9  ;;  %v3129_v20 = vmul.f32 -1.442695, %v2313_v17 }
 0x6e8   :  { %3699 = vpow2.f32 %v3127_v10 }
 0x6e9   :  { %3701 = vpow2.f32 %v3128_v11 }
 0x6ea   :  { %3703 = vpow2.f32 %v3129_v20 }
 0x6eb   :  { %3705 = vtanh.f32 %v2312_v33 }
 0x6f2   :  { %v3700_v35 = vpop.eup %3699 }
 0x6f3   :  { %v3702_v36 = vpop.eup %3701  ;;  %v2321_v37 = vadd.f32 1.0, %v3700_v35 }
 0x6f4   :  { %v2327_v41 = vadd.f32 1.0, %v3702_v36  ;;  %v3704_v43 = vpop.eup %3703 }
 0x6f5   :  { %3707 = vrcp.f32 %v2321_v37  ;;  %v3706_v44 = vpop.eup %3705  ;;  %v2334_v28 = vadd.f32 1.0, %v3704_v43 }
 0x6f6   :  { %3709 = vrcp.f32 %v2327_v41 }
 0x6f7   :  { %3711 = vrcp.f32 %v2334_v28 }
 0x6ff   :  { %v3708_v45 = vpop.eup %3707 }
 0x700   :  { %v3710_v54 = vpop.eup %3709  ;;  %v2341_v4 = vmul.f32 %v3708_v45, %v3706_v44 }
 0x701   :  { %v2340_v25 = vmul.f32 %v3710_v54, %v2338_v53  ;;  %v3712_v32 = vpop.eup %3711 }
 0x703   :  { %v5483_v31 = vadd.f32 %v2341_v4, %v2340_v25 }
 0x705   :  { %6225 = vst [vmem:[#allocation42_spill] sm:$0xff] %v5483_v31  ;;  %3713 = vtanh.f32 %v5483_v31  ;;  %v6259_v31 = vld [vmem:[#allocation83_spill] sm:$0xff] }
 0x70f   :  { %v3714_v58 = vpop.eup %3713 }
 0x710   :  { %v2344_v59 = vmul.f32 %v3714_v58, %v3712_v32 }
 0x721   :  { %v2250_v0 = vpop.f32.mrb[24].mxu0  ;;  %v2291_v1 = vpop.f32.mrb[24].mxu1 }
 0x722   :  { %v2314_v3 = vadd.f32 %v2250_v0, %v6226_v2  ;;  %v2252_v9 = vpop.f32.mrb[25].mxu0  ;;  %v2293_v10 = vpop.f32.mrb[25].mxu1  ;;  %v2316_v41 = vadd.f32 %v2291_v1, %v5338_v7  ;;  %v6255_v7 = vld [vmem:[#allocation79_spill] sm:$0xff]  ;;  %v6258_v2 = vld [vmem:[#allocation82_spill] sm:$0xff] }
 0x723   :  { %v2315_v11 = vadd.f32 %v2252_v9, %v5329_v23  ;;  %v2254_v12 = vpop.f32.mrb[26].mxu0  ;;  %v2295_v17 = vpop.f32.mrb[26].mxu1  ;;  %v2317_v36 = vadd.f32 %v2293_v10, %v5334_v24  ;;  %v6256_v24 = vld [vmem:[#allocation80_spill] sm:$0xff]  ;;  %v6257_v23 = vld [vmem:[#allocation81_spill] sm:$0xff] }
 0x724   :  { %v3130_v19 = vmul.f32 -1.442695, %v2314_v3  ;;  %v2255_v20 = vpop.f32.mrb[27].mxu0  ;;  %v2296_v33 = vpop.f32.mrb[27].mxu1 }
 0x725   :  { %v3131_v35 = vmul.f32 -1.442695, %v2315_v11  ;;  %v3132_v37 = vmul.f32 -1.442695, %v2317_v36  ;;  %v2372_v11 = vpack.c.bf16 %v2344_v59, %v2344_v59  ;;  %v6229_v59 = vld [vmem:[#allocation53_spill] sm:$0xff]  ;;  %v6230_v20 = vld [vmem:[#allocation54_spill] sm:$0xff] }
 0x726   :  { %3715 = vpow2.f32 %v3130_v19  ;;  %v6231_v33 = vld [vmem:[#allocation55_spill] sm:$0xff]  ;;  %v6233_v36 = vld [vmem:[#allocation57_spill] sm:$0xff] }
 0x727   :  { %3717 = vpow2.f32 %v3131_v35  ;;  %v5494_v19 = vrot.slane %v2372_v11, 2  ;;  %v6232_v35 = vld [vmem:[#allocation56_spill] sm:$0xff]  ;;  %v6251_v11 = vld [vmem:[#allocation75_spill] sm:$0xff] }
 0x728   :  { %3719 = vpow2.f32 %v3132_v37  ;;  %v6234_v37 = vld [vmem:[#allocation58_spill] sm:$0xff] }
 0x729   :  { %3721 = vtanh.f32 %v2316_v41  ;;  %v6235_v41 = vld [vmem:[#allocation59_spill] sm:$0xff] }
 0x730   :  { %v3716_v43 = vpop.eup %3715 }
 0x731   :  { %v3718_v44 = vpop.eup %3717  ;;  %v2348_v45 = vadd.f32 1.0, %v3716_v43  ;;  %v6236_v43 = vld [vmem:[#allocation60_spill] sm:$0xff] }
 0x732   :  { %v2354_v51 = vadd.f32 1.0, %v3718_v44  ;;  %v3720_v53 = vpop.eup %3719  ;;  %v6237_v44 = vld [vmem:[#allocation61_spill] sm:$0xff] }
 0x733   :  { %3723 = vrcp.f32 %v2348_v45  ;;  %v3722_v54 = vpop.eup %3721  ;;  %v2361_v32 = vadd.f32 1.0, %v3720_v53  ;;  %v6238_v45 = vld [vmem:[#allocation62_spill] sm:$0xff]  ;;  %v6240_v53 = vld [vmem:[#allocation64_spill] sm:$0xff] }
 0x734   :  { %3725 = vrcp.f32 %v2354_v51  ;;  %v6239_v51 = vld [vmem:[#allocation63_spill] sm:$0xff] }
 0x735   :  { %3727 = vrcp.f32 %v2361_v32  ;;  %v6245_v32 = vld [vmem:[#allocation69_spill] sm:$0xff] }
 0x73d   :  { %v3724_v4 = vpop.eup %3723 }
 0x73e   :  { %v3726_v28 = vpop.eup %3725  ;;  %v2365_v25 = vmul.f32 %v3724_v4, %v3722_v54  ;;  %v6241_v54 = vld [vmem:[#allocation65_spill] sm:$0xff]  ;;  %v6242_v4 = vld [vmem:[#allocation66_spill] sm:$0xff] }
 0x73f   :  { %v2364_v58 = vmul.f32 %v3726_v28, %v5341_v26  ;;  %v3728_v1 = vpop.eup %3727  ;;  %v6228_v26 = vld [vmem:[#allocation52_spill] sm:$0xff]  ;;  %v6243_v28 = vld [vmem:[#allocation67_spill] sm:$0xff] }
 0x741   :  { %v5491_v0 = vadd.f32 %v2365_v25, %v2364_v58  ;;  %v6244_v25 = vld [vmem:[#allocation68_spill] sm:$0xff]  ;;  %v6246_v58 = vld [vmem:[#allocation70_spill] sm:$0xff] }
 0x743   :  { %6227 = vst [vmem:[#allocation43_spill] sm:$0xff] %v5491_v0  ;;  %3729 = vtanh.f32 %v5491_v0  ;;  %v6254_v0 = vld [vmem:[#allocation78_spill] sm:$0xff] }
 0x74d   :  { %v3730_v3 = vpop.eup %3729 }
 0x74e   :  { %v2368_v9 = vmul.f32 %v3730_v3, %v3728_v1  ;;  %v6247_v1 = vld [vmem:[#allocation71_spill] sm:$0xff]  ;;  %v6248_v3 = vld [vmem:[#allocation72_spill] sm:$0xff] }
 0x750   :  { %v2370_v10 = vrot.slane %v2368_v9, 4  ;;  %v6249_v9 = vld [vmem:[#allocation73_spill] sm:$0xff] }
 0x752   :  { %v2373_v12 = vpack.c.bf16 %v2370_v10, %v2370_v10  ;;  %v6250_v10 = vld [vmem:[#allocation74_spill] sm:$0xff] }
 0x754   :  { %v2377_v17 = vrot.slane %v2373_v12, 2  ;;  %v6252_v12 = vld [vmem:[#allocation76_spill] sm:$0xff] }
 0x756   :  { %2412 = vmatprep.mubr.bf16.mxu0 %v2377_v17  ;;  %2453 = vmatprep.mubr.bf16.mxu1 %v2377_v17 }
 0x757   :  { %2413 = vmatmul.mubr.bf16.vlgmr.msra.gmra.mrb[28].mxu0 %v5494_v19  ;;  %2454 = vmatmul.mubr.bf16.vlgmr.msra.gmra.mrb[28].mxu1 %v5494_v19 }
 0x758   :  { %2463 = vmatpush1.bf16.msra.mxu0 %v6135_v62  ;;  %2504 = vmatpush1.bf16.msra.mxu1 %v6136_v63 }
 0x759   :  { %2494 = vmatprep.mubr.bf16.mxu0 %v2377_v17  ;;  %2535 = vmatprep.mubr.bf16.mxu1 %v2377_v17  ;;  %v6253_v17 = vld [vmem:[#allocation77_spill] sm:$0xff] }
 0x75a   :  { %2464 = vmatprep.subr.bf16.mxu0 %v6137_v49  ;;  %2505 = vmatprep.subr.bf16.mxu1 %v6138_v57 }
 0x75c   :  { %2465 = vmatpush1.bf16.msra.mxu0 %v6139_v5  ;;  %2506 = vmatpush1.bf16.msra.mxu1 %v6228_v26 }
 0x75d   :  { %2466 = vmatprep.subr.bf16.mxu0 %v6229_v59  ;;  %2507 = vmatprep.subr.bf16.mxu1 %v6230_v20 }
 0x760   :  { %2467 = vmatpush1.bf16.msra.mxu0 %v6231_v33  ;;  %2508 = vmatpush1.bf16.msra.mxu1 %v6232_v35 }
 0x761   :  { %2468 = vmatprep.subr.bf16.mxu0 %v6233_v36  ;;  %2509 = vmatprep.subr.bf16.mxu1 %v6234_v37 }
 0x764   :  { %2469 = vmatpush1.bf16.msra.mxu0 %v6235_v41  ;;  %2510 = vmatpush1.bf16.msra.mxu1 %v6236_v43 }
 0x765   :  { %2470 = vmatprep.subr.bf16.mxu0 %v6237_v44  ;;  %2511 = vmatprep.subr.bf16.mxu1 %v6238_v45 }
 0x768   :  { %2471 = vmatpush1.bf16.msra.mxu0 %v6239_v51  ;;  %2512 = vmatpush1.bf16.msra.mxu1 %v6240_v53 }
 0x769   :  { %2472 = vmatprep.subr.bf16.mxu0 %v6241_v54  ;;  %2513 = vmatprep.subr.bf16.mxu1 %v6242_v4 }
 0x76c   :  { %2473 = vmatpush1.bf16.msra.mxu0 %v6243_v28  ;;  %2514 = vmatpush1.bf16.msra.mxu1 %v6244_v25 }
 0x76d   :  { %2474 = vmatprep.subr.bf16.mxu0 %v6245_v32  ;;  %2515 = vmatprep.subr.bf16.mxu1 %v6246_v58 }
 0x770   :  { %2475 = vmatpush1.bf16.msra.mxu0 %v6247_v1  ;;  %2516 = vmatpush1.bf16.msra.mxu1 %v6248_v3 }
 0x771   :  { %2476 = vmatprep.subr.bf16.mxu0 %v6249_v9  ;;  %2517 = vmatprep.subr.bf16.mxu1 %v6250_v10 }
 0x774   :  { %2477 = vmatpush1.bf16.msra.mxu0 %v6251_v11  ;;  %2518 = vmatpush1.bf16.msra.mxu1 %v6252_v12 }
 0x775   :  { %2478 = vmatprep.subr.bf16.mxu0 %v6253_v17  ;;  %2519 = vmatprep.subr.bf16.mxu1 %v6254_v0  ;;  %v6264_v17 = vld [vmem:[#allocation88_spill] sm:$0xff] }
 0x778   :  { %2479 = vmatpush1.bf16.msra.mxu0 %v6255_v7  ;;  %2520 = vmatpush1.bf16.msra.mxu1 %v6256_v24 }
 0x779   :  { %2480 = vmatprep.subr.bf16.mxu0 %v6257_v23  ;;  %2521 = vmatprep.subr.bf16.mxu1 %v6258_v2 }
 0x77c   :  { %2481 = vmatpush1.bf16.msra.mxu0 %v6259_v31  ;;  %2522 = vmatpush1.bf16.msra.mxu1 %v6260_v21 }
 0x77d   :  { %2482 = vmatprep.subr.bf16.mxu0 %v6261_v13  ;;  %2523 = vmatprep.subr.bf16.mxu1 %v6262_v8 }
 0x780   :  { %2483 = vmatpush1.bf16.msra.mxu0 %v6263_v29  ;;  %2524 = vmatpush1.bf16.msra.mxu1 %v6264_v17 }
 0x781   :  { %2484 = vmatprep.subr.bf16.mxu0 %v6177_v50  ;;  %2525 = vmatprep.subr.bf16.mxu1 %v6178_v48 }
 0x784   :  { %2485 = vmatpush1.bf16.msra.mxu0 %v6179_v47  ;;  %2526 = vmatpush1.bf16.msra.mxu1 %v6180_v39 }
 0x785   :  { %2486 = vmatprep.subr.bf16.mxu0 %v6181_v18  ;;  %2527 = vmatprep.subr.bf16.mxu1 %v6182_v22 }
 0x788   :  { %2487 = vmatpush1.bf16.msra.mxu0 %v6183_v30  ;;  %2528 = vmatpush1.bf16.msra.mxu1 %v6184_v40 }
 0x789   :  { %2488 = vmatprep.subr.bf16.mxu0 %v6185_v42  ;;  %2529 = vmatprep.subr.bf16.mxu1 %v6186_v15 }
 0x78c   :  { %2489 = vmatpush1.bf16.msra.mxu0 %v6187_v6  ;;  %2530 = vmatpush1.bf16.msra.mxu1 %v5204_v52 }
 0x78d   :  { %2490 = vmatprep.subr.bf16.mxu0 %v5208_v46  ;;  %2531 = vmatprep.subr.bf16.mxu1 %v5210_v27 }
 0x790   :  { %2491 = vmatpush1.bf16.msra.mxu0 %v5226_v38  ;;  %2532 = vmatpush1.bf16.msra.mxu1 %v5228_v60 }
 0x791   :  { %2492 = vmatprep.subr.bf16.mxu0 %v5232_v56  ;;  %2533 = vmatprep.subr.bf16.mxu1 %v5234_v34 }
 0x794   :  { %2493 = vmatpush1.bf16.msra.mxu0 %v5238_v16  ;;  %2534 = vmatpush1.bf16.msra.mxu1 %v5240_v14 }
 0x795   :  { %2626 = vmatprep.subr.bf16.mxu0 %v6219_v55  ;;  %2667 = vmatprep.subr.bf16.mxu1 %v6220_v61 }
 0x797   :  { %2495 = vmatmul.mubr.bf16.vlgmr.msra.gmra.mrb[32].mxu0 %v5494_v19  ;;  %2536 = vmatmul.mubr.bf16.vlgmr.msra.gmra.mrb[32].mxu1 %v5494_v19 }
 0x798   :  { %2627 = vmatpush1.bf16.msra.mxu0 %v6135_v62  ;;  %2668 = vmatpush1.bf16.msra.mxu1 %v6136_v63  ;;  %v6265_v62 = vld [vmem:[#allocation77_spill] sm:$0xff]  ;;  %v6267_v63 = vld [vmem:[#allocation44_spill] sm:$0xff] }
 0x799   :  { %2628 = vmatprep.subr.bf16.mxu0 %v6137_v49  ;;  %2669 = vmatprep.subr.bf16.mxu1 %v6138_v57  ;;  %v6268_v57 = vld [vmem:[#allocation45_spill] sm:$0xff] }
 0x79c   :  { %2629 = vmatpush1.bf16.msra.mxu0 %v6139_v5  ;;  %2670 = vmatpush1.bf16.msra.mxu1 %v6228_v26 }
 0x79d   :  { %2630 = vmatprep.subr.bf16.mxu0 %v6229_v59  ;;  %2671 = vmatprep.subr.bf16.mxu1 %v6230_v20 }
 0x7a0   :  { %2631 = vmatpush1.bf16.msra.mxu0 %v6231_v33  ;;  %2672 = vmatpush1.bf16.msra.mxu1 %v6232_v35 }
 0x7a1   :  { %2632 = vmatprep.subr.bf16.mxu0 %v6233_v36  ;;  %2673 = vmatprep.subr.bf16.mxu1 %v6234_v37  ;;  %v6272_v37 = vld [vmem:[#allocation5_spill] sm:$0xff] }
 0x7a4   :  { %2633 = vmatpush1.bf16.msra.mxu0 %v6235_v41  ;;  %2674 = vmatpush1.bf16.msra.mxu1 %v6236_v43 }
 0x7a5   :  { %2634 = vmatprep.subr.bf16.mxu0 %v6237_v44  ;;  %2675 = vmatprep.subr.bf16.mxu1 %v6238_v45  ;;  %v6273_v45 = vld [vmem:[#allocation6_spill] sm:$0xff] }
 0x7a8   :  { %2635 = vmatpush1.bf16.msra.mxu0 %v6239_v51  ;;  %2676 = vmatpush1.bf16.msra.mxu1 %v6240_v53 }
 0x7a9   :  { %2636 = vmatprep.subr.bf16.mxu0 %v6241_v54  ;;  %2677 = vmatprep.subr.bf16.mxu1 %v6242_v4 }
 0x7ac   :  { %2637 = vmatpush1.bf16.msra.mxu0 %v6243_v28  ;;  %2678 = vmatpush1.bf16.msra.mxu1 %v6244_v25 }
 0x7ad   :  { %2638 = vmatprep.subr.bf16.mxu0 %v6245_v32  ;;  %2679 = vmatprep.subr.bf16.mxu1 %v6246_v58  ;;  %v6274_v58 = vld [vmem:[#allocation8_spill] sm:$0xff] }
 0x7b0   :  { %2639 = vmatpush1.bf16.msra.mxu0 %v6247_v1  ;;  %2680 = vmatpush1.bf16.msra.mxu1 %v6248_v3 }
 0x7b1   :  { %2640 = vmatprep.subr.bf16.mxu0 %v6249_v9  ;;  %2681 = vmatprep.subr.bf16.mxu1 %v6250_v10  ;;  %v6275_v9 = vld [vmem:[#allocation7_spill] sm:$0xff] }
 0x7b4   :  { %2641 = vmatpush1.bf16.msra.mxu0 %v6251_v11  ;;  %2682 = vmatpush1.bf16.msra.mxu1 %v6252_v12 }
 0x7b5   :  { %2642 = vmatprep.subr.bf16.mxu0 %v6265_v62  ;;  %2683 = vmatprep.subr.bf16.mxu1 %v6254_v0 }
 0x7b8   :  { %2643 = vmatpush1.bf16.msra.mxu0 %v6255_v7  ;;  %2684 = vmatpush1.bf16.msra.mxu1 %v6256_v24  ;;  %v6266_v7 = vmov 0.0|0.0  }
 0x7b9   :  { %2644 = vmatprep.subr.bf16.mxu0 %v6257_v23  ;;  %2685 = vmatprep.subr.bf16.mxu1 %v6258_v2 }
 0x7bc   :  { %2645 = vmatpush1.bf16.msra.mxu0 %v6259_v31  ;;  %2686 = vmatpush1.bf16.msra.mxu1 %v6260_v21 }
 0x7bd   :  { %2646 = vmatprep.subr.bf16.mxu0 %v6261_v13  ;;  %2687 = vmatprep.subr.bf16.mxu1 %v6262_v8  ;;  %v6271_v13 = vld [vmem:[#allocation42_spill] sm:$0xff] }
 0x7be   :  { %v2584_v21 = vrot.slane %v6271_v13, 6  ;;  %v2757_v13 = vld [vmem:[%s5799_s15 + $0x40] sm:$0xff] }
 0x7c0   :  { %2647 = vmatpush1.bf16.msra.mxu0 %v6263_v29  ;;  %2688 = vmatpush1.bf16.msra.mxu1 %v6264_v17 }
 0x7c1   :  { %2648 = vmatprep.subr.bf16.mxu0 %v6177_v50  ;;  %2689 = vmatprep.subr.bf16.mxu1 %v6178_v48  ;;  %v6270_v48 = vld [vmem:[#allocation47_spill] sm:$0xff] }
 0x7c4   :  { %2649 = vmatpush1.bf16.msra.mxu0 %v6179_v47  ;;  %2690 = vmatpush1.bf16.msra.mxu1 %v6180_v39 }
 0x7c5   :  { %2650 = vmatprep.subr.bf16.mxu0 %v6181_v18  ;;  %2691 = vmatprep.subr.bf16.mxu1 %v6182_v22 }
 0x7c8   :  { %2651 = vmatpush1.bf16.msra.mxu0 %v6183_v30  ;;  %2692 = vmatpush1.bf16.msra.mxu1 %v6184_v40 }
 0x7c9   :  { %2652 = vmatprep.subr.bf16.mxu0 %v6185_v42  ;;  %2693 = vmatprep.subr.bf16.mxu1 %v6186_v15  ;;  %v6269_v42 = vld [vmem:[#allocation46_spill] sm:$0xff] }
 0x7cc   :  { %2653 = vmatpush1.bf16.msra.mxu0 %v6187_v6  ;;  %2694 = vmatpush1.bf16.msra.mxu1 %v5204_v52 }
 0x7cd   :  { %2654 = vmatprep.subr.bf16.mxu0 %v5208_v46  ;;  %2695 = vmatprep.subr.bf16.mxu1 %v5210_v27 }
 0x7d0   :  { %2655 = vmatpush1.bf16.msra.mxu0 %v5226_v38  ;;  %2696 = vmatpush1.bf16.msra.mxu1 %v5228_v60 }
 0x7d1   :  { %2656 = vmatprep.subr.bf16.mxu0 %v5232_v56  ;;  %2697 = vmatprep.subr.bf16.mxu1 %v5234_v34 }
 0x7d4   :  { %2657 = vmatpush1.bf16.msra.mxu0 %v5238_v16  ;;  %2698 = vmatpush1.bf16.msra.mxu1 %v5240_v14 }
 0x7d5   :  { %3550 = vmatprep.subr.bf16.mxu0 %v6266_v7  ;;  %3574 = vmatprep.subr.bf16.mxu1 %v6266_v7 }
 0x82a   :  { %v2414_v29 = vpop.f32.mrb[28].mxu0  ;;  %v2455_v46 = vpop.f32.mrb[28].mxu1 }
 0x82b   :  { %v2548_v52 = vrot.slane %v2414_v29, 2  ;;  %v2416_v27 = vpop.f32.mrb[29].mxu0  ;;  %v2457_v23 = vpop.f32.mrb[29].mxu1  ;;  %v2550_v6 = vrot.slane %v2455_v46, 2 }
 0x82c   :  { %v2549_v38 = vrot.slane %v2416_v27, 2  ;;  %v2418_v24 = vpop.f32.mrb[30].mxu0  ;;  %v2459_v60 = vpop.f32.mrb[30].mxu1  ;;  %v2551_v40 = vrot.slane %v2457_v23, 2 }
 0x82d   :  { %v2556_v56 = vadd.f32 %v2548_v52, %v6267_v63  ;;  %v2419_v49 = vpop.f32.mrb[31].mxu0  ;;  %v2460_v34 = vpop.f32.mrb[31].mxu1  ;;  %v2558_v47 = vadd.f32 %v2550_v6, %v6270_v48  ;;  %v6276_v24 = vld [vmem:[#allocation43_spill] sm:$0xff]  ;;  %v2750_v6 = vld [vmem:[%s5799_s15 + $0x8] sm:$0xff] }
 0x82e   :  { %v2557_v16 = vadd.f32 %v2549_v38, %v6268_v57  ;;  %v2559_v15 = vadd.f32 %v2551_v40, %v6269_v42  ;;  %v6277_v42 = vmov 0.0   ;;  %v2751_v48 = vld [vmem:[%s5799_s15 + $0x10] sm:$0xff] }
 0x82f   :  { %v3133_v5 = vmul.f32 -1.442695, %v2556_v56 }
 0x830   :  { %v3134_v14 = vmul.f32 -1.442695, %v2557_v16  ;;  %v3135_v50 = vmul.f32 -1.442695, %v2559_v15  ;;  %v2749_v15 = vld [vmem:[%s5799_s15] sm:$0xff] }
 0x831   :  { %3731 = vpow2.f32 %v3133_v5 }
 0x832   :  { %3733 = vpow2.f32 %v3134_v14 }
 0x833   :  { %3735 = vpow2.f32 %v3135_v50  ;;  %v3551_v50 = vpack.c.bf16 %v2750_v6, %v2749_v15 }
 0x834   :  { %3737 = vtanh.f32 %v2558_v47  ;;  %v2752_v47 = vld [vmem:[%s5799_s15 + $0x18] sm:$0xff] }
 0x83b   :  { %v3732_v39 = vpop.eup %3731 }
 0x83c   :  { %v3734_v18 = vpop.eup %3733  ;;  %v2567_v22 = vadd.f32 1.0, %v3732_v39  ;;  %v3554_v39 = vpack.c.bf16 %v2752_v47, %v2751_v48 }
 0x83d   :  { %v2573_v30 = vadd.f32 1.0, %v3734_v18  ;;  %v3736_v55 = vpop.eup %3735  ;;  %v2753_v18 = vld [vmem:[%s5799_s15 + $0x20] sm:$0xff] }
 0x83e   :  { %3739 = vrcp.f32 %v2567_v22  ;;  %v3738_v61 = vpop.eup %3737  ;;  %v2580_v0 = vadd.f32 1.0, %v3736_v55  ;;  %v2754_v22 = vld [vmem:[%s5799_s15 + $0x28] sm:$0xff]  ;;  %v2755_v55 = vld [vmem:[%s5799_s15 + $0x30] sm:$0xff] }
 0x83f   :  { %3741 = vrcp.f32 %v2573_v30  ;;  %v3557_v30 = vpack.c.bf16 %v2754_v22, %v2753_v18 }
 0x840   :  { %3743 = vrcp.f32 %v2580_v0  ;;  %v2760_v0 = vld [vmem:[%s5799_s15 + $0x58] sm:$0xff] }
 0x848   :  { %v3740_v8 = vpop.eup %3739 }
 0x849   :  { %v3742_v31 = vpop.eup %3741  ;;  %v2587_v2 = vmul.f32 %v3740_v8, %v3738_v61  ;;  %v2756_v61 = vld [vmem:[%s5799_s15 + $0x38] sm:$0xff] }
 0x84a   :  { %v2586_v19 = vmul.f32 %v3742_v31, %v2584_v21  ;;  %v3744_v59 = vpop.eup %3743  ;;  %v3560_v8 = vpack.c.bf16 %v2756_v61, %v2755_v55  ;;  %v2758_v21 = vld [vmem:[%s5799_s15 + $0x48] sm:$0xff] }
 0x84b   :  { %v3563_v31 = vpack.c.bf16 %v2758_v21, %v2757_v13  ;;  %v3143_v21 = vld [vmem:[%s5798_s14] ss:$0 sm:$0xff] }
 0x84c   :  { %v2588_v26 = vadd.f32 %v2587_v2, %v2586_v19  ;;  %v2759_v2 = vld [vmem:[%s5799_s15 + $0x50] sm:$0xff] }
 0x84d   :  { %v3566_v19 = vpack.c.bf16 %v2760_v0, %v2759_v2 }
 0x84e   :  { %3745 = vtanh.f32 %v2588_v26  ;;  %v2761_v26 = vld [vmem:[%s5799_s15 + $0x60] sm:$0xff] }
 0x858   :  { %v3746_v20 = vpop.eup %3745 }
 0x859   :  { %v2590_v33 = vmul.f32 %v3746_v20, %v3744_v59  ;;  %v2762_v59 = vld [vmem:[%s5799_s15 + $0x68] sm:$0xff] }
 0x85a   :  { %v3569_v20 = vpack.c.bf16 %v2762_v59, %v2761_v26  ;;  %v3144_v59 = vld [vmem:[%s5800_s16] ss:$0 sm:$0xff] }
 0x85b   :  { %v2618_v16 = vpack.c.bf16 %v2590_v33, %v2590_v33  ;;  %v2763_v33 = vld [vmem:[%s5799_s15 + $0x70] sm:$0xff] }
 0x85d   :  { %v2622_v40 = vrot.slane %v2618_v16, 3 }
 0x86a   :  { %v2496_v35 = vpop.f32.mrb[32].mxu0  ;;  %v2537_v36 = vpop.f32.mrb[32].mxu1 }
 0x86b   :  { %v2560_v41 = vadd.f32 %v2496_v35, %v6272_v37  ;;  %v2498_v43 = vpop.f32.mrb[33].mxu0  ;;  %v2539_v44 = vpop.f32.mrb[33].mxu1  ;;  %v2562_v10 = vadd.f32 %v2537_v36, %v6275_v9  ;;  %v2764_v35 = vld [vmem:[%s5799_s15 + $0x78] sm:$0xff] }
 0x86c   :  { %v2561_v51 = vadd.f32 %v2498_v43, %v6273_v45  ;;  %v2500_v53 = vpop.f32.mrb[34].mxu0  ;;  %v2541_v54 = vpop.f32.mrb[34].mxu1  ;;  %v2563_v1 = vadd.f32 %v2539_v44, %v6274_v58  ;;  %v3572_v36 = vpack.c.bf16 %v2764_v35, %v2763_v33  ;;  %v2844_v43 = vld [vmem:[%s5801_s17 + $0x8] sm:$0xff]  ;;  %v2845_v44 = vld [vmem:[%s5801_s17 + $0x10] sm:$0xff] }
 0x86d   :  { %v3136_v4 = vmul.f32 -1.442695, %v2560_v41  ;;  %v2501_v28 = vpop.f32.mrb[35].mxu0  ;;  %v2542_v25 = vpop.f32.mrb[35].mxu1  ;;  %v2843_v41 = vld [vmem:[%s5801_s17] sm:$0xff]  ;;  %v2846_v53 = vld [vmem:[%s5801_s17 + $0x18] sm:$0xff] }
 0x86e   :  { %v3137_v32 = vmul.f32 -1.442695, %v2561_v51  ;;  %v3138_v3 = vmul.f32 -1.442695, %v2563_v1  ;;  %v3575_v51 = vpack.c.bf16 %v2844_v43, %v2843_v41  ;;  %v3578_v54 = vpack.c.bf16 %v2846_v53, %v2845_v44  ;;  %v2848_v28 = vld [vmem:[%s5801_s17 + $0x28] sm:$0xff]  ;;  %v2850_v1 = vld [vmem:[%s5801_s17 + $0x38] sm:$0xff] }
 0x86f   :  { %3747 = vpow2.f32 %v3136_v4  ;;  %v2847_v4 = vld [vmem:[%s5801_s17 + $0x20] sm:$0xff] }
 0x870   :  { %3749 = vpow2.f32 %v3137_v32  ;;  %v3581_v25 = vpack.c.bf16 %v2848_v28, %v2847_v4  ;;  %v2849_v32 = vld [vmem:[%s5801_s17 + $0x30] sm:$0xff]  ;;  %v3145_v41 = vld [vmem:[%s5802_s18] ss:$0 sm:$0xff] }
 0x871   :  { %3751 = vpow2.f32 %v3138_v3  ;;  %v3584_v3 = vpack.c.bf16 %v2850_v1, %v2849_v32 }
 0x872   :  { %3753 = vtanh.f32 %v2562_v10  ;;  %v2851_v10 = vld [vmem:[%s5801_s17 + $0x40] sm:$0xff] }
 0x879   :  { %v3748_v11 = vpop.eup %3747 }
 0x87a   :  { %v3750_v12 = vpop.eup %3749  ;;  %v2594_v17 = vadd.f32 1.0, %v3748_v11  ;;  %v2852_v11 = vld [vmem:[%s5801_s17 + $0x48] sm:$0xff] }
 0x87b   :  { %v2600_v62 = vadd.f32 1.0, %v3750_v12  ;;  %v3752_v29 = vpop.eup %3751  ;;  %v3587_v12 = vpack.c.bf16 %v2852_v11, %v2851_v10 }
 0x87c   :  { %3755 = vrcp.f32 %v2594_v17  ;;  %v3754_v46 = vpop.eup %3753  ;;  %v2607_v38 = vadd.f32 1.0, %v3752_v29  ;;  %v2853_v17 = vld [vmem:[%s5801_s17 + $0x50] sm:$0xff] }
 0x87d   :  { %3757 = vrcp.f32 %v2600_v62  ;;  %v2854_v62 = vld [vmem:[%s5801_s17 + $0x58] sm:$0xff] }
 0x87e   :  { %3759 = vrcp.f32 %v2607_v38  ;;  %v3590_v29 = vpack.c.bf16 %v2854_v62, %v2853_v17 }
 0x886   :  { %v3756_v52 = vpop.eup %3755 }
 0x887   :  { %v3758_v27 = vpop.eup %3757  ;;  %v2611_v23 = vmul.f32 %v3756_v52, %v3754_v46  ;;  %v2855_v46 = vld [vmem:[%s5801_s17 + $0x60] sm:$0xff]  ;;  %v2856_v52 = vld [vmem:[%s5801_s17 + $0x68] sm:$0xff] }
 0x888   :  { %v2610_v60 = vmul.f32 %v3758_v27, %v6276_v24  ;;  %v3760_v56 = vpop.eup %3759  ;;  %v3593_v27 = vpack.c.bf16 %v2856_v52, %v2855_v46 }
 0x88a   :  { %v5638_v63 = vadd.f32 %v2611_v23, %v2610_v60 }
 0x88c   :  { %3761 = vtanh.f32 %v5638_v63 }
 0x896   :  { %v3762_v49 = vpop.eup %3761 }
 0x897   :  { %v2614_v34 = vmul.f32 %v3762_v49, %v3760_v56 }
 0x899   :  { %v2616_v57 = vrot.slane %v2614_v34, 2 }
 0x89b   :  { %v2619_v5 = vpack.c.bf16 %v2616_v57, %v2616_v57 }
 0x89d   :  { %v2623_v14 = vrot.slane %v2619_v5, 3 }
 0x89f   :  { %2658 = vmatprep.mubr.bf16.mxu0 %v2623_v14  ;;  %2699 = vmatprep.mubr.bf16.mxu1 %v2623_v14 }
 0x8a0   :  { %2659 = vmatmul.mubr.bf16.vlgmr.msra.gmra.mrb[36].mxu0 %v2622_v40  ;;  %2700 = vmatmul.mubr.bf16.vlgmr.msra.gmra.mrb[36].mxu1 %v2622_v40 }
 0x8a1   :  { %3376 = vmatprep.mubr.msk.f32.mxu0 %vm3805_vm1, %v6277_v42  ;;  %3411 = vmatprep.mubr.msk.f32.mxu1 %vm3805_vm1, %v6277_v42 }
 0x8a2   :  { %3552 = vmatpush3.bf16.msra.mxu0 %v3551_v50  ;;  %3576 = vmatpush3.bf16.msra.mxu1 %v3575_v51 }
 0x8a3   :  { %3553 = vmatprep.subr.bf16.mxu0 %v6266_v7  ;;  %3577 = vmatprep.subr.bf16.mxu1 %v6266_v7 }
 0x8a6   :  { %3555 = vmatpush3.bf16.msra.mxu0 %v3554_v39  ;;  %3579 = vmatpush3.bf16.msra.mxu1 %v3578_v54 }
 0x8a7   :  { %3556 = vmatprep.subr.bf16.mxu0 %v6266_v7  ;;  %3580 = vmatprep.subr.bf16.mxu1 %v6266_v7 }
 0x8aa   :  { %3558 = vmatpush3.bf16.msra.mxu0 %v3557_v30  ;;  %3582 = vmatpush3.bf16.msra.mxu1 %v3581_v25 }
 0x8ab   :  { %3559 = vmatprep.subr.bf16.mxu0 %v6266_v7  ;;  %3583 = vmatprep.subr.bf16.mxu1 %v6266_v7 }
 0x8ae   :  { %3561 = vmatpush3.bf16.msra.mxu0 %v3560_v8  ;;  %3585 = vmatpush3.bf16.msra.mxu1 %v3584_v3  ;;  %v3142_v8 = vld [vmem:[%s5797_s13] ss:$0 sm:$0xff] }
 0x8af   :  { %3562 = vmatprep.subr.bf16.mxu0 %v6266_v7  ;;  %3586 = vmatprep.subr.bf16.mxu1 %v6266_v7 }
 0x8b2   :  { %3564 = vmatpush3.bf16.msra.mxu0 %v3563_v31  ;;  %3588 = vmatpush3.bf16.msra.mxu1 %v3587_v12 }
 0x8b3   :  { %3565 = vmatprep.subr.bf16.mxu0 %v6266_v7  ;;  %3589 = vmatprep.subr.bf16.mxu1 %v6266_v7 }
 0x8b6   :  { %3567 = vmatpush3.bf16.msra.mxu0 %v3566_v19  ;;  %3591 = vmatpush3.bf16.msra.mxu1 %v3590_v29  ;;  %v2858_v19 = vld [vmem:[%s5801_s17 + $0x78] sm:$0xff] }
 0x8b7   :  { %3568 = vmatprep.subr.bf16.mxu0 %v6266_v7  ;;  %3592 = vmatprep.subr.bf16.mxu1 %v6266_v7 }
 0x8ba   :  { %3570 = vmatpush3.bf16.msra.mxu0 %v3569_v20  ;;  %3594 = vmatpush3.bf16.msra.mxu1 %v3593_v27 }
 0x8bb   :  { %3571 = vmatprep.subr.bf16.mxu0 %v6266_v7  ;;  %3595 = vmatprep.subr.bf16.mxu1 %v6266_v7 }
 0x8be   :  { %3573 = vmatpush3.bf16.msra.mxu0 %v3572_v36 }
 0x973   :  { %v2660_v23 = vpop.f32.mrb[36].mxu0  ;;  %v2701_v38 = vpop.f32.mrb[36].mxu1 }
 0x974   :  { %v2661_v24 = vadd.f32 %v2660_v23, %v6272_v37  ;;  %v2662_v60 = vpop.f32.mrb[37].mxu0  ;;  %v2703_v56 = vpop.f32.mrb[37].mxu1  ;;  %v2702_v7 = vadd.f32 %v2701_v38, %v6275_v9 }
 0x975   :  { %v2663_v49 = vadd.f32 %v2662_v60, %v6273_v45  ;;  %v2664_v34 = vpop.f32.mrb[38].mxu0  ;;  %v2705_v57 = vpop.f32.mrb[38].mxu1  ;;  %v2704_v42 = vadd.f32 %v2703_v56, %v6274_v58 }
 0x976   :  { %v3139_v16 = vmul.f32 -1.442695, %v2661_v24  ;;  %v2665_v5 = vpop.f32.mrb[39].mxu0  ;;  %v2706_v14 = vpop.f32.mrb[39].mxu1 }
 0x977   :  { %v3140_v40 = vmul.f32 -1.442695, %v2663_v49  ;;  %v3141_v15 = vmul.f32 -1.442695, %v2704_v42 }
 0x978   :  { %3763 = vpow2.f32 %v3139_v16 }
 0x979   :  { %3765 = vpow2.f32 %v3140_v40 }
 0x97a   :  { %3767 = vpow2.f32 %v3141_v15 }
 0x97b   :  { %3769 = vtanh.f32 %v2702_v7 }
 0x982   :  { %v3764_v6 = vpop.eup %3763 }
 0x983   :  { %v3766_v50 = vpop.eup %3765  ;;  %v2711_v37 = vadd.f32 1.0, %v3764_v6 }
 0x984   :  { %v2717_v48 = vadd.f32 1.0, %v3766_v50  ;;  %v3768_v45 = vpop.eup %3767 }
 0x985   :  { %3771 = vrcp.f32 %v2711_v37  ;;  %v3770_v47 = vpop.eup %3769  ;;  %v2724_v30 = vadd.f32 1.0, %v3768_v45 }
 0x986   :  { %3773 = vrcp.f32 %v2717_v48 }
 0x987   :  { %3775 = vrcp.f32 %v2724_v30 }
 0x98f   :  { %v3772_v39 = vpop.eup %3771 }
 0x990   :  { %v3774_v18 = vpop.eup %3773  ;;  %v2728_v22 = vmul.f32 %v3772_v39, %v3770_v47 }
 0x991   :  { %v2727_v55 = vmul.f32 %v3774_v18, %v5638_v63  ;;  %v3776_v9 = vpop.eup %3775  ;;  %v2857_v63 = vld [vmem:[%s5801_s17 + $0x70] sm:$0xff]  ;;  %s3779_s17 = scalar_lea.vmem %s2945_s25, 32 }
 0x992   :  { %v3596_v26 = vpack.c.bf16 %v2858_v19, %v2857_v63  ;;  %p3780_p0 = scmp.ne.s32.totalorder %s2945_s25, %s3779_s17  ;;  %p3785_p2 = scmp.lt.s32.totalorder %s3779_s17, %s3779_s17 }
 0x993   :  { %v2729_v58 = vadd.f32 %v2728_v22, %v2727_v55 }
 0x994   :  { %3597 = vmatpush3.bf16.msra.mxu1 %v3596_v26  ;;  %p3786_p3 = por %p3785_p2, %p3784_p1 }
 0x995   :  { %3777 = vtanh.f32 %v2729_v58 }
 0x996   :  { %p3787_p4 = pnand %p3786_p3, %p3780_p0 }
 0x99f   :  { %v3778_v61 = vpop.eup %3777 }
 0x9a0   :  { %v2731_v13 = vmul.f32 %v3778_v61, %v3776_v9 }
 0x9a2   :  { %v2739_v31 = vmul.f32 %v3142_v8, %v2731_v13 }
 0x9a4   :  { %v2747_v2 = vadd.f32 %v3143_v21, %v2739_v31 }
 0x9a6   :  { %v2748_v0 = vmax.f32 %v2747_v2, 0.0 }
 0x9a8   :  { %3377 = vmatmul.mubr.f32.vlgmr.msra.gmra.mrb[40].mxu0 %v2748_v0 }
 0xa7b   :  { %v2838_v20 = vpop.f32.mrb[40].mxu0 }
 0xa7c   :  { %v2839_v33 = vadd.f32 %v3144_v59, %v2838_v20  ;;  %v3378_v35 = vpop.f32.mrb[41].mxu0 }
 0xa7e   :  { %v2842_v36 = vmax.f32 %v2839_v33, 0.0 }
 0xa80   :  { %3412 = vmatmul.mubr.f32.vlgmr.msra.gmra.mrb[6].mxu1 %v2842_v36 }
 0xb53   :  { %v2932_v43 = vpop.f32.mrb[6].mxu1 }
 0xb54   :  { %v2933_v44 = vadd.f32 %v3145_v41, %v2932_v43  ;;  %v3413_v51 = vpop.f32.mrb[7].mxu1 }
 0xb56   :  { %2937 = vst.msk [vmem:[#allocation2] sm:$0x3] %vm2936_vm10, %v2933_v44 }
 0xb57   :  { %3790 = shalt.err (!%p3787_p4)
}
 0xb58   :  { %s3791_s20 = scalar_lea.hbm %s5803_s19, 32 }
 0xb59   :  { %p3792_p5 = scmp.ne.s32.totalorder %s5803_s19, %s3791_s20  ;;  %p3795_p6 = scmp.lt.u32.totalorder %s3791_s20, %s5803_s19 }
 0xb5b   :  { %p3797_p7 = pnand %p3795_p6, %p3792_p5 }
 0xb5d   :  { %3800 = shalt.err (!%p3797_p7)
}
 0xb5e   :  { %2947 = dma.vmem_to_hbm [thread:$0]  %s2945_s25, 32, %s5803_s19, [#allocation3]  }
 0xb5f   :  { %3801 = dma.done.wait [#allocation3], 32  }
 0xb60   :  { %3802 = vsyncadd [#allocation3], 4294967264 }
 0xb61   :  { %2951 = vsyncpa [#allocation3], 1 }

</bundles_post_ra>
